<compile_context>
chip_gen: v7x
topology: tpu7x:2x2x1
jax: 0.10.0
libtpu: 0.0.40
codegen_flags: <defaults>
</compile_context>

<pallas_src>
import functools

import jax
import jax.numpy as jnp
from jax import lax
from jax.experimental import pallas as pl
from jax.experimental.pallas import tpu as pltpu

BN_EPS = 1e-5
_FOLD_CIN_MAX = 64                       # im2col K-fold only for thin Cin
_FUSED_VMEM_BUDGET = 40 * 1024 * 1024    # conservative for v7x (64 MiB / TC)


def _largest_divisor_leq(n, cap):
    for t in range(min(n, cap), 0, -1):
        if n % t == 0:
            return t
    return 1


def _cout_tile(cout):
    # <=128: full; 256 -> 128 (two co tiles => both TCs usable on v7x, lighter
    # vreg pressure on v5e); 512 -> 256 (fills the 256-wide MXU on v6e/v7x
    # while still giving two parallel co tiles).
    if cout <= 128:
        return cout
    if cout == 256:
        return 128
    return 256


# ----------------------------------------------------------------------------
# Fused kernel: 3x3 dilated conv (bf16 operands, f32 MXU accumulation)
#               + BatchNorm2d(train, robust two-pass stats) + ReLU
#               (+ optional fused MaxPool2d(kernel=2, stride=2)).
# Grid: (n_co ["parallel"], n_h ["arbitrary"]).  At the test resolutions
# n_h == 1 and the whole layer (per Cout tile) is one grid step.
# ----------------------------------------------------------------------------
def _conv_bn_relu_kernel(x_ref, w_ref, g_ref, b_ref, o_ref, *scratch,
                         dilation, fold, h_tile, n_h, pool2, eps):
    # x_ref  : (N, Hp, Wp, Cin) bf16  spatially padded input, full batch
    # w_ref  : (3, 3, Cin, Ct)  bf16  weight tile for the current Cout tile
    # g_ref  : (1, Ct) f32 gamma      b_ref: (1, Ct) f32 beta
    # o_ref  : (N, Ho, Wo, Ct)  bf16  output (2x2/s2-pooled when pool2)
    # scratch: optional (N, H, W, Ct) f32 pre-BN buffer (only when n_h > 1)
    N, Hp, Wp, Cin = x_ref.shape
    Ct = o_ref.shape[-1]
    d = dilation
    H = Hp - 2 * d
    W = Wp - 2 * d

    if n_h == 1:
        row0 = 0
    else:
        row0 = pl.program_id(1) * h_tile
        if h_tile % 8 == 0:
            row0 = pl.multiple_of(row0, 8)      # aligned tap-window loads

    def tap(kh, kw):
        # Tap window with batch folded into M (M = N*h_tile*W rows for the MXU
        # even at the tiny late-stage spatial sizes).
        wins = [x_ref[n, pl.ds(row0 + kh * d, h_tile), pl.ds(kw * d, W), :]
                for n in range(N)]
        return wins[0] if N == 1 else jnp.concatenate(wins, axis=0)

    M = N * h_tile * W
    if fold:
        # Thin Cin: im2col all nine taps -> single K = 9*Cin contraction.
        lhs = jnp.concatenate(
            [tap(kh, kw) for kh in range(3) for kw in range(3)],
            axis=-1).reshape(M, 9 * Cin)
        acc = jnp.dot(lhs, w_ref[...].reshape(9 * Cin, Ct),
                      preferred_element_type=jnp.float32)
    else:
        # Wide Cin: nine K = Cin matmuls, windows sliced lazily from the ref.
        acc = jnp.zeros((M, Ct), jnp.float32)
        for kh in range(3):
            for kw in range(3):
                acc = acc + jnp.dot(tap(kh, kw).reshape(M, Cin), w_ref[kh, kw],
                                    preferred_element_type=jnp.float32)

    if n_h > 1:
        scratch[0][:, pl.ds(row0, h_tile), :, :] = acc.reshape(N, h_tile, W, Ct)

    def _finalize():
        # Two-pass (centered) batch statistics over the resident conv output:
        # numerically robust (no E[x^2]-E[x]^2 cancellation) and no HBM
        # round-trip of the f32 intermediate.
        count = N * H * W
        y = acc if n_h == 1 else scratch[0][...].reshape(count, Ct)
        mean = jnp.sum(y, axis=0, keepdims=True) * (1.0 / count)       # (1, Ct)
        cen = y - mean
        var = jnp.sum(cen * cen, axis=0, keepdims=True) * (1.0 / count)
        scale = g_ref[...] * lax.rsqrt(var + eps)                      # (1, Ct)
        out = jnp.maximum(cen * scale + b_ref[...], 0.0).reshape(N, H, W, Ct)
        if pool2:
            # Fused MaxPool2d(kernel=2, stride=2): reshape+max (no strided
            # sublane slices), PyTorch floor behaviour via crop.
            Ho, Wo = o_ref.shape[1], o_ref.shape[2]
            out = out[:, :2 * Ho, :2 * Wo, :]
            out = jnp.max(out.reshape(N, 2 * Ho, Wo, 2, Ct), axis=3)
            out = jnp.max(out.reshape(N, Ho, 2, Wo, Ct), axis=2)
        o_ref[...] = out.astype(o_ref.dtype)

    if n_h == 1:
        _finalize()
    else:
        pl.when(pl.program_id(1) == n_h - 1)(_finalize)


def conv_bn_relu(x_nhwc, w, gamma, beta, *, dilation=1, fuse_pool2=False):
    """'same' 3x3 dilated conv (pad == dilation) + BatchNorm2d(train) + ReLU,
    optionally fused with a following MaxPool2d(kernel_size=2, stride=2)."""
    pad = dilation
    N, H, W, Cin = x_nhwc.shape
    Cout = w.shape[-1]
    x_pad = jnp.pad(x_nhwc.astype(jnp.bfloat16),
                    ((0, 0), (pad, pad), (pad, pad), (0, 0)))
    Hp, Wp = H + 2 * pad, W + 2 * pad

    ct = _cout_tile(Cout)
    n_co = Cout // ct
    fold = Cin <= _FOLD_CIN_MAX

    # Output-row tile: whole-H when small (fewest grid steps, biggest MXU M);
    # otherwise bounded so the per-step working set stays modest.
    max_rows = max(1, 4096 // max(1, N * W))
    h_tile = H if H <= max_rows else _largest_divisor_leq(H, max_rows)
    n_h = H // h_tile

    Ho, Wo = (H // 2, W // 2) if fuse_pool2 else (H, W)

    # VMEM gate for the fused layer (input + weights double-buffered, optional
    # f32 scratch, bf16 output block, im2col staging).
    est = (2 * N * Hp * Wp * Cin * 2 + 2 * 9 * Cin * ct * 2
           + (N * H * W * ct * 4 if n_h > 1 else 0)
           + 2 * N * Ho * Wo * ct * 2
           + (N * h_tile * W * 9 * Cin * 2 if fold else 0))
    if est > _FUSED_VMEM_BUDGET:
        # TODO(synk): H-tiled two-kernel fallback (bf16 intermediate + halo
        # DMA) for resolutions beyond the fused-layer VMEM budget.
        raise NotImplementedError(
            f"fused conv+BN layer needs ~{est / 2**20:.1f} MiB VMEM")

    kernel = functools.partial(
        _conv_bn_relu_kernel, dilation=dilation, fold=fold, h_tile=h_tile,
        n_h=n_h, pool2=fuse_pool2, eps=BN_EPS)
    scratch_shapes = ([pltpu.VMEM((N, H, W, ct), jnp.float32)]
                      if n_h > 1 else [])

    return pl.pallas_call(
        kernel,
        grid=(n_co, n_h),
        in_specs=[
            pl.BlockSpec((N, Hp, Wp, Cin), lambda co, h: (0, 0, 0, 0)),
            pl.BlockSpec((3, 3, Cin, ct), lambda co, h: (0, 0, 0, co)),
            pl.BlockSpec((1, ct), lambda co, h: (0, co)),
            pl.BlockSpec((1, ct), lambda co, h: (0, co)),
        ],
        out_specs=pl.BlockSpec((N, Ho, Wo, ct), lambda co, h: (0, 0, 0, co)),
        out_shape=jax.ShapeDtypeStruct((N, Ho, Wo, Cout), jnp.bfloat16),
        scratch_shapes=scratch_shapes,
        compiler_params=pltpu.CompilerParams(
            dimension_semantics=("parallel", "arbitrary")),
    )(x_pad, w.astype(jnp.bfloat16),
      gamma.reshape(1, -1).astype(jnp.float32),
      beta.reshape(1, -1).astype(jnp.float32))


# ----------------------------------------------------------------------------
# Standalone MaxPool2d(kernel=2, stride=1) kernel (stages 4 & 5 only; the
# stride-2 pools are fused into the preceding conv layer).
# ----------------------------------------------------------------------------
def _maxpool_s1_kernel(x_ref, o_ref):
    _, Ho, Wo, _ = o_ref.shape
    x = x_ref[...]
    out = x[:, 0:Ho, 0:Wo, :]
    for kh in range(2):
        for kw in range(2):
            if kh == 0 and kw == 0:
                continue
            out = jnp.maximum(out, x[:, kh:kh + Ho, kw:kw + Wo, :])
    o_ref[...] = out


def maxpool_2x2_s1(x_nhwc, *, padding=0):
    """MaxPool2d(kernel_size=2, stride=1, padding) with PyTorch semantics."""
    N, H, W, C = x_nhwc.shape
    Ho, Wo = H + 2 * padding - 1, W + 2 * padding - 1
    x = x_nhwc
    if padding:
        # -inf padding == padded positions never win (floating activations).
        x = jnp.pad(x, ((0, 0), (padding, padding), (padding, padding), (0, 0)),
                    constant_values=-jnp.inf)
    Hp, Wp = x.shape[1], x.shape[2]
    ct = C if C <= 128 else 128
    n_c = C // ct
    return pl.pallas_call(
        _maxpool_s1_kernel,
        grid=(n_c,),
        in_specs=[pl.BlockSpec((N, Hp, Wp, ct), lambda c: (0, 0, 0, c))],
        out_specs=pl.BlockSpec((N, Ho, Wo, ct), lambda c: (0, 0, 0, c)),
        out_shape=jax.ShapeDtypeStruct((N, Ho, Wo, C), x.dtype),
        compiler_params=pltpu.CompilerParams(
            dimension_semantics=("parallel",)),
    )(x)


# ----------------------------------------------------------------------------
# VGG13 module definition (shapes from the PyTorch __init__)
# ----------------------------------------------------------------------------
# per conv: (in_channels, out_channels, dilation)
STAGE_CONVS = [
    [(3, 64, 1), (64, 64, 1)],
    [(64, 128, 1), (128, 128, 1)],
    [(128, 256, 1), (256, 256, 1), (256, 256, 1)],
    [(256, 512, 1), (512, 512, 1), (512, 512, 1)],
    [(512, 512, 2), (512, 512, 2), (512, 512, 2), (512, 512, 4)],
]
# per stage max-pool: (kernel, stride, padding)
STAGE_POOLS = [(2, 2, 0), (2, 2, 0), (2, 2, 0), (2, 1, 1), (2, 1, 0)]


def init_params(key):
    params = []
    for stage in STAGE_CONVS:
        stage_params = []
        for (cin, cout, d) in stage:
            key, k1, k2, k3 = jax.random.split(key, 4)
            w = jax.random.normal(k1, (3, 3, cin, cout), jnp.float32)
            w = (w * (2.0 / (9.0 * cin)) ** 0.5).astype(jnp.bfloat16)  # He-style
            gamma = 1.0 + 0.1 * jax.random.normal(k2, (cout,), jnp.float32)
            beta = 0.1 * jax.random.normal(k3, (cout,), jnp.float32)
            stage_params.append((w, gamma, beta, d))
        params.append(stage_params)
    return params


def vgg13_forward(x_nchw, params):
    """Returns [stage_1, ..., stage_5] in NCHW f32, matching the PyTorch module."""
    x = jnp.transpose(x_nchw, (0, 2, 3, 1)).astype(jnp.bfloat16)   # NCHW -> NHWC
    outs = []
    for stage_params, (k, s, p) in zip(params, STAGE_POOLS):
        last = len(stage_params) - 1
        for li, (w, g, b, d) in enumerate(stage_params):
            fuse = (li == last) and (s == 2)        # fuse the stride-2 pool
            x = conv_bn_relu(x, w, g, b, dilation=d, fuse_pool2=fuse)
        if s == 1:
            x = maxpool_2x2_s1(x, padding=p)
        outs.append(jnp.transpose(x, (0, 3, 1, 2)).astype(jnp.float32))
    return outs


# ----------------------------------------------------------------------------
# References (no Pallas) — correctness checks only.
# ----------------------------------------------------------------------------
def _conv3x3_ref(x_bf16, w_bf16, d):
    """Pure-jnp 'same' dilated 3x3 conv with the kernel's bf16/f32 policy."""
    N, H, W, Cin = x_bf16.shape
    Cout = w_bf16.shape[-1]
    xp = jnp.pad(x_bf16, ((0, 0), (d, d), (d, d), (0, 0)))
    taps = [xp[:, kh * d:kh * d + H, kw * d:kw * d + W, :]
            for kh in range(3) for kw in range(3)]
    if Cin <= _FOLD_CIN_MAX:
        lhs = jnp.concatenate(taps, axis=-1).reshape(N * H * W, 9 * Cin)
        y = jnp.dot(lhs, w_bf16.reshape(9 * Cin, Cout),
                    preferred_element_type=jnp.float32)
    else:
        y = jnp.zeros((N * H * W, Cout), jnp.float32)
        for t, tp in enumerate(taps):
            kh, kw = divmod(t, 3)
            y = y + jnp.dot(tp.reshape(N * H * W, Cin), w_bf16[kh, kw],
                            preferred_element_type=jnp.float32)
    return y.reshape(N, H, W, Cout)


def _bn_relu_ref(y_f32, gamma, beta):
    mean = jnp.mean(y_f32, axis=(0, 1, 2), keepdims=True)
    cen = y_f32 - mean
    var = jnp.mean(cen * cen, axis=(0, 1, 2), keepdims=True)
    out = cen * (gamma.reshape(1, 1, 1, -1) * lax.rsqrt(var + BN_EPS))
    out = out + beta.reshape(1, 1, 1, -1)
    return jnp.maximum(out, 0.0).astype(jnp.bfloat16)


def _pool_ref(x, k, s, p):
    y = lax.reduce_window(x.astype(jnp.float32), -jnp.inf, lax.max,
                          (1, k, k, 1), (1, s, s, 1),
                          [(0, 0), (p, p), (p, p), (0, 0)])
    return y.astype(x.dtype)


def vgg13_stage_ref(x_nhwc_bf16, stage_params, pool_cfg):
    k, s, p = pool_cfg
    x = x_nhwc_bf16
    for (w, g, b, d) in stage_params:
        x = _bn_relu_ref(_conv3x3_ref(x, w, d), g, b)
    return _pool_ref(x, k, s, p)


def _conv_bn_relu_xla(x_bf16, w_bf16, gamma, beta, d):
    """Independent single-layer reference via XLA's dilated convolution."""
    y = lax.conv_general_dilated(
        x_bf16, w_bf16, window_strides=(1, 1), padding=[(d, d), (d, d)],
        rhs_dilation=(d, d), dimension_numbers=("NHWC", "HWIO", "NHWC"),
        preferred_element_type=jnp.float32)
    return _bn_relu_ref(y, gamma, beta)


# ----------------------------------------------------------------------------
if __name__ == "__main__":
    key = jax.random.PRNGKey(0)
    pkey, xkey, skey = jax.random.split(key, 3)
    params = init_params(pkey)

    # Small input consistent with the module: N=2, C=3 (RGB), H=W=16.
    x = jax.random.normal(xkey, (2, 3, 16, 16), jnp.float32)

    outs = vgg13_forward(x, params)
    outs = [jax.block_until_ready(o) for o in outs]

    expected_shapes = [(2, 64, 8, 8), (2, 128, 4, 4), (2, 256, 2, 2),
                       (2, 512, 3, 3), (2, 512, 2, 2)]
    for o, es in zip(outs, expected_shapes):
        assert o.shape == es, (o.shape, es)

    # --- Check 1: single fused layer vs XLA's dilated conv (well-conditioned
    # shapes; covers dilation 1/2 and both the fold and 9-matmul paths). ------
    ks = jax.random.split(skey, 8)
    for idx, (cin, cout, d) in enumerate([(32, 64, 1), (32, 64, 2),
                                          (128, 256, 2)]):
        xs = jax.random.normal(ks[idx], (2, 8, 8, cin),
                               jnp.float32).astype(jnp.bfloat16)
        ws = (0.1 * jax.random.normal(ks[idx + 3], (3, 3, cin, cout),
                                      jnp.float32)).astype(jnp.bfloat16)
        gs = 1.0 + 0.1 * jax.random.normal(ks[6], (cout,), jnp.float32)
        bs = 0.1 * jax.random.normal(ks[7], (cout,), jnp.float32)
        got = conv_bn_relu(xs, ws, gs, bs, dilation=d).astype(jnp.float32)
        want = _conv_bn_relu_xla(xs, ws, gs, bs, d).astype(jnp.float32)
        assert jnp.allclose(got, want, atol=2e-2, rtol=2e-2), \
            f"single-layer check failed (cin={cin}, dilation={d})"

    # --- Check 2: full forward, stage-by-stage vs the pure-jnp reference with
    # matched stage inputs (avoids cross-stage drift amplification by the
    # ill-conditioned late-stage batch statistics). ---------------------------
    prev = jnp.transpose(x, (0, 2, 3, 1)).astype(jnp.bfloat16)
    for i, (stage_params, pool_cfg) in enumerate(zip(params, STAGE_POOLS)):
        ref_nhwc = vgg13_stage_ref(prev, stage_params,
                                   pool_cfg).astype(jnp.float32)
        got_nhwc = jnp.transpose(outs[i], (0, 2, 3, 1))
        assert jnp.allclose(got_nhwc, ref_nhwc, atol=5e-2, rtol=5e-2), \
            f"stage {i + 1} mismatch"
        prev = got_nhwc.astype(jnp.bfloat16)

    print("KERNEL_OK")
</pallas_src>

<mosaic_0001>
module attributes {stable_mosaic.version = 11 : i64} {
  func.func @_conv_bn_relu_kernel(%arg0: i32, %arg1: i32, %arg2: memref<2x18x18x3xbf16, #tpu.memory_space<vmem>>, %arg3: memref<3x3x3x64xbf16, #tpu.memory_space<vmem>>, %arg4: memref<1x64xf32, #tpu.memory_space<vmem>>, %arg5: memref<1x64xf32, #tpu.memory_space<vmem>>, %arg6: memref<2x16x16x64xbf16, #tpu.memory_space<vmem>>) attributes {dimension_semantics = [#tpu.dimension_semantics<parallel>, #tpu.dimension_semantics<arbitrary>], iteration_bounds = array<i64: 1, 1>, scalar_prefetch = 0 : i64, scratch_operands = 0 : i64, tpu.core_type = #tpu.core_type<tc>, window_params = [{pipeline_mode = #tpu.pipeline_mode<synchronous>, transform_indices = @transform_0, window_bounds = array<i64: 2, 18, 18, 3>}, {transform_indices = @transform_1, window_bounds = array<i64: 3, 3, 3, 64>}, {transform_indices = @transform_2, window_bounds = array<i64: 1, 64>}, {transform_indices = @transform_3, window_bounds = array<i64: 1, 64>}, {transform_indices = @transform_4, window_bounds = array<i64: 2, 16, 16, 64>}]} {
    %c0 = arith.constant 0 : index
    %c0_0 = arith.constant 0 : index
    %c0_1 = arith.constant 0 : index
    %c0_2 = arith.constant 0 : index
    %0 = vector.load %arg2[%c0, %c0_0, %c0_1, %c0_2] : memref<2x18x18x3xbf16, #tpu.memory_space<vmem>>, vector<1x16x16x3xbf16>
    %1 = vector.shape_cast %0 : vector<1x16x16x3xbf16> to vector<16x16x3xbf16>
    %c1 = arith.constant 1 : index
    %c0_3 = arith.constant 0 : index
    %c0_4 = arith.constant 0 : index
    %c0_5 = arith.constant 0 : index
    %2 = vector.load %arg2[%c1, %c0_3, %c0_4, %c0_5] : memref<2x18x18x3xbf16, #tpu.memory_space<vmem>>, vector<1x16x16x3xbf16>
    %3 = vector.shape_cast %2 : vector<1x16x16x3xbf16> to vector<16x16x3xbf16>
    %4 = tpu.concatenate %1, %3 in 0 : vector<16x16x3xbf16>, vector<16x16x3xbf16> -> vector<32x16x3xbf16>
    %c0_6 = arith.constant 0 : index
    %c0_7 = arith.constant 0 : index
    %c1_8 = arith.constant 1 : index
    %c0_9 = arith.constant 0 : index
    %5 = vector.load %arg2[%c0_6, %c0_7, %c1_8, %c0_9] : memref<2x18x18x3xbf16, #tpu.memory_space<vmem>>, vector<1x16x16x3xbf16>
    %6 = vector.shape_cast %5 : vector<1x16x16x3xbf16> to vector<16x16x3xbf16>
    %c1_10 = arith.constant 1 : index
    %c0_11 = arith.constant 0 : index
    %c1_12 = arith.constant 1 : index
    %c0_13 = arith.constant 0 : index
    %7 = vector.load %arg2[%c1_10, %c0_11, %c1_12, %c0_13] : memref<2x18x18x3xbf16, #tpu.memory_space<vmem>>, vector<1x16x16x3xbf16>
    %8 = vector.shape_cast %7 : vector<1x16x16x3xbf16> to vector<16x16x3xbf16>
    %9 = tpu.concatenate %6, %8 in 0 : vector<16x16x3xbf16>, vector<16x16x3xbf16> -> vector<32x16x3xbf16>
    %c0_14 = arith.constant 0 : index
    %c0_15 = arith.constant 0 : index
    %c2 = arith.constant 2 : index
    %c0_16 = arith.constant 0 : index
    %10 = vector.load %arg2[%c0_14, %c0_15, %c2, %c0_16] : memref<2x18x18x3xbf16, #tpu.memory_space<vmem>>, vector<1x16x16x3xbf16>
    %11 = vector.shape_cast %10 : vector<1x16x16x3xbf16> to vector<16x16x3xbf16>
    %c1_17 = arith.constant 1 : index
    %c0_18 = arith.constant 0 : index
    %c2_19 = arith.constant 2 : index
    %c0_20 = arith.constant 0 : index
    %12 = vector.load %arg2[%c1_17, %c0_18, %c2_19, %c0_20] : memref<2x18x18x3xbf16, #tpu.memory_space<vmem>>, vector<1x16x16x3xbf16>
    %13 = vector.shape_cast %12 : vector<1x16x16x3xbf16> to vector<16x16x3xbf16>
    %14 = tpu.concatenate %11, %13 in 0 : vector<16x16x3xbf16>, vector<16x16x3xbf16> -> vector<32x16x3xbf16>
    %c0_21 = arith.constant 0 : index
    %c1_22 = arith.constant 1 : index
    %c0_23 = arith.constant 0 : index
    %c0_24 = arith.constant 0 : index
    %15 = vector.load %arg2[%c0_21, %c1_22, %c0_23, %c0_24] : memref<2x18x18x3xbf16, #tpu.memory_space<vmem>>, vector<1x16x16x3xbf16>
    %16 = vector.shape_cast %15 : vector<1x16x16x3xbf16> to vector<16x16x3xbf16>
    %c1_25 = arith.constant 1 : index
    %c1_26 = arith.constant 1 : index
    %c0_27 = arith.constant 0 : index
    %c0_28 = arith.constant 0 : index
    %17 = vector.load %arg2[%c1_25, %c1_26, %c0_27, %c0_28] : memref<2x18x18x3xbf16, #tpu.memory_space<vmem>>, vector<1x16x16x3xbf16>
    %18 = vector.shape_cast %17 : vector<1x16x16x3xbf16> to vector<16x16x3xbf16>
    %19 = tpu.concatenate %16, %18 in 0 : vector<16x16x3xbf16>, vector<16x16x3xbf16> -> vector<32x16x3xbf16>
    %c0_29 = arith.constant 0 : index
    %c1_30 = arith.constant 1 : index
    %c1_31 = arith.constant 1 : index
    %c0_32 = arith.constant 0 : index
    %20 = vector.load %arg2[%c0_29, %c1_30, %c1_31, %c0_32] : memref<2x18x18x3xbf16, #tpu.memory_space<vmem>>, vector<1x16x16x3xbf16>
    %21 = vector.shape_cast %20 : vector<1x16x16x3xbf16> to vector<16x16x3xbf16>
    %c1_33 = arith.constant 1 : index
    %c1_34 = arith.constant 1 : index
    %c1_35 = arith.constant 1 : index
    %c0_36 = arith.constant 0 : index
    %22 = vector.load %arg2[%c1_33, %c1_34, %c1_35, %c0_36] : memref<2x18x18x3xbf16, #tpu.memory_space<vmem>>, vector<1x16x16x3xbf16>
    %23 = vector.shape_cast %22 : vector<1x16x16x3xbf16> to vector<16x16x3xbf16>
    %24 = tpu.concatenate %21, %23 in 0 : vector<16x16x3xbf16>, vector<16x16x3xbf16> -> vector<32x16x3xbf16>
    %c0_37 = arith.constant 0 : index
    %c1_38 = arith.constant 1 : index
    %c2_39 = arith.constant 2 : index
    %c0_40 = arith.constant 0 : index
    %25 = vector.load %arg2[%c0_37, %c1_38, %c2_39, %c0_40] : memref<2x18x18x3xbf16, #tpu.memory_space<vmem>>, vector<1x16x16x3xbf16>
    %26 = vector.shape_cast %25 : vector<1x16x16x3xbf16> to vector<16x16x3xbf16>
    %c1_41 = arith.constant 1 : index
    %c1_42 = arith.constant 1 : index
    %c2_43 = arith.constant 2 : index
    %c0_44 = arith.constant 0 : index
    %27 = vector.load %arg2[%c1_41, %c1_42, %c2_43, %c0_44] : memref<2x18x18x3xbf16, #tpu.memory_space<vmem>>, vector<1x16x16x3xbf16>
    %28 = vector.shape_cast %27 : vector<1x16x16x3xbf16> to vector<16x16x3xbf16>
    %29 = tpu.concatenate %26, %28 in 0 : vector<16x16x3xbf16>, vector<16x16x3xbf16> -> vector<32x16x3xbf16>
    %c0_45 = arith.constant 0 : index
    %c2_46 = arith.constant 2 : index
    %c0_47 = arith.constant 0 : index
    %c0_48 = arith.constant 0 : index
    %30 = vector.load %arg2[%c0_45, %c2_46, %c0_47, %c0_48] : memref<2x18x18x3xbf16, #tpu.memory_space<vmem>>, vector<1x16x16x3xbf16>
    %31 = vector.shape_cast %30 : vector<1x16x16x3xbf16> to vector<16x16x3xbf16>
    %c1_49 = arith.constant 1 : index
    %c2_50 = arith.constant 2 : index
    %c0_51 = arith.constant 0 : index
    %c0_52 = arith.constant 0 : index
    %32 = vector.load %arg2[%c1_49, %c2_50, %c0_51, %c0_52] : memref<2x18x18x3xbf16, #tpu.memory_space<vmem>>, vector<1x16x16x3xbf16>
    %33 = vector.shape_cast %32 : vector<1x16x16x3xbf16> to vector<16x16x3xbf16>
    %34 = tpu.concatenate %31, %33 in 0 : vector<16x16x3xbf16>, vector<16x16x3xbf16> -> vector<32x16x3xbf16>
    %c0_53 = arith.constant 0 : index
    %c2_54 = arith.constant 2 : index
    %c1_55 = arith.constant 1 : index
    %c0_56 = arith.constant 0 : index
    %35 = vector.load %arg2[%c0_53, %c2_54, %c1_55, %c0_56] : memref<2x18x18x3xbf16, #tpu.memory_space<vmem>>, vector<1x16x16x3xbf16>
    %36 = vector.shape_cast %35 : vector<1x16x16x3xbf16> to vector<16x16x3xbf16>
    %c1_57 = arith.constant 1 : index
    %c2_58 = arith.constant 2 : index
    %c1_59 = arith.constant 1 : index
    %c0_60 = arith.constant 0 : index
    %37 = vector.load %arg2[%c1_57, %c2_58, %c1_59, %c0_60] : memref<2x18x18x3xbf16, #tpu.memory_space<vmem>>, vector<1x16x16x3xbf16>
    %38 = vector.shape_cast %37 : vector<1x16x16x3xbf16> to vector<16x16x3xbf16>
    %39 = tpu.concatenate %36, %38 in 0 : vector<16x16x3xbf16>, vector<16x16x3xbf16> -> vector<32x16x3xbf16>
    %c0_61 = arith.constant 0 : index
    %c2_62 = arith.constant 2 : index
    %c2_63 = arith.constant 2 : index
    %c0_64 = arith.constant 0 : index
    %40 = vector.load %arg2[%c0_61, %c2_62, %c2_63, %c0_64] : memref<2x18x18x3xbf16, #tpu.memory_space<vmem>>, vector<1x16x16x3xbf16>
    %41 = vector.shape_cast %40 : vector<1x16x16x3xbf16> to vector<16x16x3xbf16>
    %c1_65 = arith.constant 1 : index
    %c2_66 = arith.constant 2 : index
    %c2_67 = arith.constant 2 : index
    %c0_68 = arith.constant 0 : index
    %42 = vector.load %arg2[%c1_65, %c2_66, %c2_67, %c0_68] : memref<2x18x18x3xbf16, #tpu.memory_space<vmem>>, vector<1x16x16x3xbf16>
    %43 = vector.shape_cast %42 : vector<1x16x16x3xbf16> to vector<16x16x3xbf16>
    %44 = tpu.concatenate %41, %43 in 0 : vector<16x16x3xbf16>, vector<16x16x3xbf16> -> vector<32x16x3xbf16>
    %45 = tpu.concatenate %4, %9, %14, %19, %24, %29, %34, %39, %44 in 2 : vector<32x16x3xbf16>, vector<32x16x3xbf16>, vector<32x16x3xbf16>, vector<32x16x3xbf16>, vector<32x16x3xbf16>, vector<32x16x3xbf16>, vector<32x16x3xbf16>, vector<32x16x3xbf16>, vector<32x16x3xbf16> -> vector<32x16x27xbf16>
    %46 = vector.shape_cast %45 : vector<32x16x27xbf16> to vector<512x27xbf16>
    %c0_69 = arith.constant 0 : index
    %c0_70 = arith.constant 0 : index
    %c0_71 = arith.constant 0 : index
    %c0_72 = arith.constant 0 : index
    %47 = vector.load %arg3[%c0_69, %c0_70, %c0_71, %c0_72] : memref<3x3x3x64xbf16, #tpu.memory_space<vmem>>, vector<3x3x3x64xbf16>
    %48 = vector.shape_cast %47 : vector<3x3x3x64xbf16> to vector<27x64xbf16>
    %cst = arith.constant dense<0.000000e+00> : vector<512x64xf32>
    %49 = tpu.matmul %46, %48, %cst {dimension_numbers = #tpu.dot_dimension_numbers<[1], [0], [0], [1], [0, 0, 1, 1], [], []>} : vector<512x27xbf16>, vector<27x64xbf16>, vector<512x64xf32> -> vector<512x64xf32>
    %cst_73 = arith.constant dense<0.000000e+00> : vector<64xf32>
    %50 = vector.multi_reduction <add>, %49, %cst_73 [0] : vector<512x64xf32> to vector<64xf32>
    %51 = vector.shape_cast %50 : vector<64xf32> to vector<1x64xf32>
    %cst_74 = arith.constant 0.001953125 : f32
    %52 = vector.broadcast %cst_74 : f32 to vector<1x64xf32>
    %53 = arith.mulf %51, %52 : vector<1x64xf32>
    %54 = vector.broadcast %53 : vector<1x64xf32> to vector<512x64xf32>
    %55 = arith.subf %49, %54 : vector<512x64xf32>
    %56 = arith.mulf %55, %55 : vector<512x64xf32>
    %cst_75 = arith.constant dense<0.000000e+00> : vector<64xf32>
    %57 = vector.multi_reduction <add>, %56, %cst_75 [0] : vector<512x64xf32> to vector<64xf32>
    %58 = vector.shape_cast %57 : vector<64xf32> to vector<1x64xf32>
    %cst_76 = arith.constant 0.001953125 : f32
    %59 = vector.broadcast %cst_76 : f32 to vector<1x64xf32>
    %60 = arith.mulf %58, %59 : vector<1x64xf32>
    %c0_77 = arith.constant 0 : index
    %c0_78 = arith.constant 0 : index
    %61 = vector.load %arg4[%c0_77, %c0_78] : memref<1x64xf32, #tpu.memory_space<vmem>>, vector<1x64xf32>
    %cst_79 = arith.constant 9.99999974E-6 : f32
    %62 = vector.broadcast %cst_79 : f32 to vector<1x64xf32>
    %63 = arith.addf %60, %62 : vector<1x64xf32>
    %64 = math.rsqrt %63 : vector<1x64xf32>
    %65 = arith.mulf %61, %64 : vector<1x64xf32>
    %66 = vector.broadcast %65 : vector<1x64xf32> to vector<512x64xf32>
    %67 = arith.mulf %55, %66 : vector<512x64xf32>
    %c0_80 = arith.constant 0 : index
    %c0_81 = arith.constant 0 : index
    %68 = vector.load %arg5[%c0_80, %c0_81] : memref<1x64xf32, #tpu.memory_space<vmem>>, vector<1x64xf32>
    %69 = vector.broadcast %68 : vector<1x64xf32> to vector<512x64xf32>
    %70 = arith.addf %67, %69 : vector<512x64xf32>
    %cst_82 = arith.constant 0.000000e+00 : f32
    %71 = vector.broadcast %cst_82 : f32 to vector<512x64xf32>
    %72 = arith.maximumf %70, %71 : vector<512x64xf32>
    %73 = vector.shape_cast %72 : vector<512x64xf32> to vector<2x16x16x64xf32>
    %74 = arith.truncf %73 : vector<2x16x16x64xf32> to vector<2x16x16x64xbf16>
    %c0_83 = arith.constant 0 : index
    %c0_84 = arith.constant 0 : index
    %c0_85 = arith.constant 0 : index
    %c0_86 = arith.constant 0 : index
    %75 = vector.load %arg6[%c0_83, %c0_84, %c0_85, %c0_86] : memref<2x16x16x64xbf16, #tpu.memory_space<vmem>>, vector<2x16x16x64xbf16>
    tpu.vector_store %arg6[%c0_83, %c0_84, %c0_85, %c0_86], %74 {strides = array<i32>} : memref<2x16x16x64xbf16, #tpu.memory_space<vmem>>, vector<2x16x16x64xbf16>,
    return
  }
  func.func @transform_0(%arg0: i32, %arg1: i32) -> (i32, i32, i32, i32) {
    %c0_i32 = arith.constant 0 : i32
    %c0_i32_0 = arith.constant 0 : i32
    %c0_i32_1 = arith.constant 0 : i32
    %c0_i32_2 = arith.constant 0 : i32
    %c0_i32_3 = arith.constant 0 : i32
    return %c0_i32, %c0_i32_0, %c0_i32_1, %c0_i32_2 : i32, i32, i32, i32
  }
  func.func @transform_1(%arg0: i32, %arg1: i32) -> (i32, i32, i32, i32) {
    %c0_i32 = arith.constant 0 : i32
    %c0_i32_0 = arith.constant 0 : i32
    %c0_i32_1 = arith.constant 0 : i32
    %c0_i32_2 = arith.constant 0 : i32
    return %c0_i32, %c0_i32_0, %c0_i32_1, %arg0 : i32, i32, i32, i32
  }
  func.func @transform_2(%arg0: i32, %arg1: i32) -> (i32, i32) {
    %c0_i32 = arith.constant 0 : i32
    %c0_i32_0 = arith.constant 0 : i32
    return %c0_i32, %arg0 : i32, i32
  }
  func.func @transform_3(%arg0: i32, %arg1: i32) -> (i32, i32) {
    %c0_i32 = arith.constant 0 : i32
    %c0_i32_0 = arith.constant 0 : i32
    return %c0_i32, %arg0 : i32, i32
  }
  func.func @transform_4(%arg0: i32, %arg1: i32) -> (i32, i32, i32, i32) {
    %c0_i32 = arith.constant 0 : i32
    %c0_i32_0 = arith.constant 0 : i32
    %c0_i32_1 = arith.constant 0 : i32
    %c0_i32_2 = arith.constant 0 : i32
    return %c0_i32, %c0_i32_0, %c0_i32_1, %arg0 : i32, i32, i32, i32
  }
}

</mosaic_0001>

<bundles_post_ra>
// kernel: tpu_custom_call.1
= control target key start
LH: loop header
LB: loop body
LE: loop exit
PB: predicated region body
PF: predicated region fallthrough
CT: control target
= control target key end

     0   :  { %s6682_s25 = smov 9   ;;  %vm1209_vm0 = vcmask 1046528   ;;  %vm664_vm1 = vsmask.f32 7424  ;;  %s6683_s16 = smov 6   ;;  %vm4224_vm2 = vcmask 1044480   ;;  %s11546_s0 = inlined_call_operand.vmem [shape: bf16[2,18,18,3], index: 0, kind: input, shape index: {}]   ;;  %s11547_s1 = inlined_call_operand.vmem [shape: bf16[3,3,3,64], index: 1, kind: input, shape index: {}]   ;;  %s11548_s2 = inlined_call_operand.vmem [shape: f32[1,64], index: 2, kind: input, shape index: {}]   ;;  %s11549_s3 = inlined_call_operand.vmem [shape: f32[1,64], index: 3, kind: input, shape index: {}]   ;;  %s11550_s4 = inlined_call_operand.hbm [shape: bf16[2,16,16,64], index: 4, kind: output, shape index: {}]  }
   0x1   :  { %v5527_v0 = vld [vmem:[%s11546_s0 + $0xc] sm:$0xf]  ;;  %v6726_v1 = vld [vmem:[%s11546_s0 + $0x10] sm:$0xf]  ;;  %v20_v3 = vld [vmem:[%s11546_s0 + $0x4] sm:$0xf] }
   0x2   :  { %v6729_v2 = vcombine.low %v5527_v0, %v6726_v1  ;;  %v116_v4 = vld [vmem:[%s11546_s0] sm:$0xe]  ;;  %v6370_v5 = vld [vmem:[%s11546_s0 + $0x8] ss:$0 sps:$4 sm:$0x11]   ;;  %s6684_s28 = smov 3  }
   0x3   :  { %v5847_v6 = vcombine.low %v116_v4, %v20_v3  ;;  %v19_v7 = vld [vmem:[%s11546_s0] sm:$0xf]  ;;  %v21_v8 = vld [vmem:[%s11546_s0 + $0xc] sm:$0xf]  ;;  %v1211_v9 = vrot.slane %v6370_v5, 1  ;;  %v673_v12 = vshll.u32 %v6370_v5, 16 }
   0x4   :  { %1530 = vrot.lane.b32.xlu0 %v6729_v2, %s6682_s25  ;;  %v6748_v10 = vcombine.low %v19_v7, %v20_v3  ;;  %v22_v11 = vld [vmem:[%s11546_s0 + $0x10] sm:$0xf]  ;;  %v117_v14 = vld [vmem:[%s11546_s0 + $0xc] sm:$0xe]  ;;  %v1693_v17 = vshll.u32 %v6729_v2, 16  ;;  %v1691_v47 = vshrl.u32 %v6729_v2, 16 }
   0x5   :  { %v1210_v13 = vrot.slane %v5847_v6, 1  ;;  %v6756_v15 = vcombine.low %v21_v8, %v22_v11  ;;  %v6374_v16 = vld [vmem:[%s11546_s0 + $0x14] ss:$0 sps:$4 sm:$0x11]   ;;  %v5848_v18 = vcombine.low %v117_v14, %v22_v11  ;;  %v5529_v21 = vld [vmem:[%s11546_s0 + $0x18] sm:$0xf] }
   0x6   :  { %v666_v19 = vshrl.u32 %v6748_v10, 16  ;;  %v668_v20 = vshll.u32 %v6748_v10, 16  ;;  %v1214_v23 = vrot.slane %v6374_v16, 1  ;;  %v675_v24 = vrot.slane %v673_v12, 1  ;;  %v5530_v25 = vld [vmem:[%s11546_s0 + $0x1c] sm:$0xf] }
   0x7   :  { %v1212_v22 = vsel %vm1209_vm0, %v1210_v13, %v1211_v9  ;;  %v5623_v26 = vld [vmem:[%s11546_s0 + $0xc] sm:$0xe]  ;;  %v1213_v27 = vrot.slane %v5848_v18, 1  ;;  %v5624_v29 = vld [vmem:[%s11546_s0 + $0x18] sm:$0xe]  ;;  %v5880_v30 = vcombine.low %v5529_v21, %v5530_v25  ;;  %v678_v31 = vshrl.u32 %v6756_v15, 16 }
   0x8   :  { %1306 = vrot.lane.b32.xlu1 %v1212_v22, %s6683_s16  ;;  %v670_v28 = vrot.slane %v668_v20, 1  ;;  %v680_v32 = vshll.u32 %v6756_v15, 16  ;;  %v685_v33 = vshll.u32 %v6374_v16, 16  ;;  %v6378_v34 = vld [vmem:[%s11546_s0 + $0x20] ss:$0 sps:$4 sm:$0x11]   ;;  %v5944_v40 = vcombine.low %v5624_v29, %v5530_v25 }
   0x9   :  { %v1215_v35 = vsel %vm1209_vm0, %v1213_v27, %v1214_v23  ;;  %v1705_v37 = vshll.u32 %v5880_v30, 16  ;;  %v1703_v38 = vshrl.u32 %v5880_v30, 16  ;;  %v5657_v39 = vld [vmem:[%s11546_s0 + $0x24] sm:$0xf]  ;;  %v1710_v43 = vshll.u32 %v6378_v34, 16  ;;  %s6685_s15 = smov 12  }
   0xa   :  { %v671_v36 = vor.u32 %v670_v28, %v666_v19  ;;  %v682_v41 = vrot.slane %v680_v32, 1  ;;  %v687_v42 = vrot.slane %v685_v33, 1  ;;  %v6379_v44 = vld [vmem:[%s11546_s0 + $0x14] ss:$0 sps:$4 sm:$0x11]   ;;  %v1695_v48 = vrot.slane %v1693_v17, 1 }
   0xb   :  { %v1707_v46 = vrot.slane %v1705_v37, 1  ;;  %v6796_v49 = vld [vmem:[%s11546_s0 + $0x28] sm:$0xf]  ;;  %v5943_v50 = vcombine.low %v5623_v26, %v6726_v1  ;;  %v1712_v52 = vrot.slane %v1710_v43, 1  ;;  %v1698_v53 = vshll.u32 %v6379_v44, 16  ;;  %s6686_s26 = smov 15  }
   0xc   :  { %1308 = vrot.lane.b32.xlu1 %v1215_v35, %s6683_s16  ;;  %v676_v45 = vsel %vm664_vm1, %v671_v36, %v675_v24  ;;  %v683_v51 = vor.u32 %v682_v41, %v678_v31  ;;  %v1696_v55 = vor.u32 %v1695_v48, %v1691_v47  ;;  %v5655_v56 = vld [vmem:[%s11546_s0 + $0x18] sm:$0xf]  ;;  %v5656_v57 = vld [vmem:[%s11546_s0 + $0x1c] sm:$0xf]  ;;  %v2237_v60 = vrot.slane %v5944_v40, 1  ;;  %s6687_s6 = smov 18  }
   0xd   :  { %1049 = vrot.lane.b32.xlu0 %v676_v45, %s6684_s28  ;;  %v1708_v54 = vor.u32 %v1707_v46, %v1703_v38  ;;  %v1700_v59 = vrot.slane %v1698_v53, 1  ;;  %v5976_v61 = vcombine.low %v5657_v39, %v6796_v49  ;;  %v2238_v62 = vrot.slane %v6378_v34, 1  ;;  %v6812_v0 = vld [vmem:[%s11546_s0 + $0x2c] ss:$0 sps:$4 sm:$0x11]   ;;  %s6688_s21 = smov 21  }
   0xe   :  { %v688_v58 = vsel %vm664_vm1, %v683_v51, %v687_v42  ;;  %v5975_v63 = vcombine.low %v5655_v56, %v5656_v57  ;;  %v2234_v2 = vrot.slane %v5943_v50, 1  ;;  %v2235_v3 = vrot.slane %v6379_v44, 1  ;;  %v23_v5 = vld [vmem:[%s11546_s0 + $0x18] sm:$0xf]  ;;  %v6826_v9 = vld [vmem:[%s11546_s0 + $0x1c] sm:$0xf] }
   0xf   :  { %v1713_v1 = vsel %vm664_vm1, %v1708_v54, %v1712_v52  ;;  %v2729_v4 = vshll.u32 %v5976_v61, 16  ;;  %v1701_v6 = vsel %vm664_vm1, %v1696_v55, %v1700_v59  ;;  %v6385_v8 = vld [vmem:[%s11546_s0 + $0x20] ss:$0 sps:$4 sm:$0x11]   ;;  %v6829_v11 = vcombine.low %v23_v5, %v6826_v9  ;;  %v5751_v18 = vld [vmem:[%s11546_s0 + $0x18] sm:$0xe] }
  0x10   :  { %1532 = vrot.lane.b32.xlu1 %v5880_v30, %s6682_s25  ;;  %v2717_v7 = vshll.u32 %v5975_v63, 16  ;;  %v2727_v12 = vshrl.u32 %v5976_v61, 16  ;;  %v2734_v14 = vshll.u32 %v6812_v0, 16  ;;  %v6836_v16 = vld [vmem:[%s11546_s0 + $0x20] ss:$0 sps:$4 sm:$0x11]   ;;  %v2239_v17 = vsel %vm1209_vm0, %v2237_v60, %v2238_v62 }
  0x11   :  { %1051 = vrot.lane.b32.xlu0 %v688_v58, %s6684_s28  ;;  %v2731_v13 = vrot.slane %v2729_v4, 1  ;;  %v2715_v19 = vshrl.u32 %v5975_v63, 16  ;;  %v692_v20 = vshll.u32 %v6829_v11, 16  ;;  %v25_v21 = vld [vmem:[%s11546_s0 + $0x24] sm:$0xf]  ;;  %v2236_v22 = vsel %vm1209_vm0, %v2234_v2, %v2235_v3  ;;  %s6689_s22 = smov 24  }
  0x12   :  { %v2719_v23 = vrot.slane %v2717_v7, 1  ;;  %v2722_v24 = vshll.u32 %v6385_v8, 16  ;;  %v26_v25 = vld [vmem:[%s11546_s0 + $0x28] sm:$0xf]  ;;  %v6039_v27 = vcombine.low %v5751_v18, %v5656_v57  ;;  %v2736_v29 = vrot.slane %v2734_v14, 1 }
  0x13   :  { %v6851_v26 = vcombine.low %v25_v21, %v26_v25  ;;  %v2732_v28 = vor.u32 %v2731_v13, %v2727_v12  ;;  %v697_v30 = vshll.u32 %v6836_v16, 16  ;;  %v690_v31 = vshrl.u32 %v6829_v11, 16  ;;  %v6389_v33 = vld [vmem:[%s11546_s0 + $0x2c] ss:$0 sps:$4 sm:$0x11]  }
  0x14   :  { %2076 = vrot.lane.b32.xlu1 %v1713_v1, %s6685_s15  ;;  %v694_v32 = vrot.slane %v692_v20, 1  ;;  %v2720_v35 = vor.u32 %v2719_v23, %v2715_v19  ;;  %v2724_v36 = vrot.slane %v2722_v24, 1  ;;  %v5752_v37 = vld [vmem:[%s11546_s0 + $0x24] sm:$0xe]  ;;  %v3258_v40 = vrot.slane %v6039_v27, 1 }
  0x15   :  { %2074 = vrot.lane.b32.xlu0 %v1701_v6, %s6685_s15  ;;  %v704_v34 = vshll.u32 %v6851_v26, 16  ;;  %v2737_v38 = vsel %vm664_vm1, %v2732_v28, %v2736_v29  ;;  %v699_v39 = vrot.slane %v697_v30, 1  ;;  %v3259_v41 = vrot.slane %v6385_v8, 1  ;;  %v119_v46 = vld [vmem:[%s11546_s0 + $0x24] sm:$0xe] }
  0x16   :  { %v695_v42 = vor.u32 %v694_v32, %v690_v31  ;;  %v702_v43 = vshrl.u32 %v6851_v26, 16  ;;  %v709_v45 = vshll.u32 %v6389_v33, 16  ;;  %v6040_v47 = vcombine.low %v5752_v37, %v6796_v49  ;;  %v5533_v50 = vld [vmem:[%s11546_s0 + $0x30] sm:$0xf]  ;;  %v5534_v51 = vld [vmem:[%s11546_s0 + $0x34] sm:$0xf] }
  0x17   :  { %v706_v44 = vrot.slane %v704_v34, 1  ;;  %v2725_v48 = vsel %vm664_vm1, %v2720_v35, %v2724_v36  ;;  %v118_v52 = vld [vmem:[%s11546_s0 + $0x18] sm:$0xe]  ;;  %v5531_v53 = vld [vmem:[%s11546_s0 + $0x24] sm:$0xf]  ;;  %v3260_v54 = vsel %vm1209_vm0, %v3258_v40, %v3259_v41  ;;  %v5850_v55 = vcombine.low %v119_v46, %v26_v25 }
  0x18   :  { %2332 = vrot.lane.b32.xlu1 %v2239_v17, %s6686_s26  ;;  %v5532_v49 = vld [vmem:[%s11546_s0 + $0x28] sm:$0xf]  ;;  %v700_v56 = vsel %vm664_vm1, %v695_v42, %v699_v39  ;;  %v711_v58 = vrot.slane %v709_v45, 1  ;;  %v5882_v59 = vcombine.low %v5533_v50, %v5534_v51  ;;  %v3261_v60 = vrot.slane %v6040_v47, 1  ;;  %v5626_v12 = vld [vmem:[%s11546_s0 + $0x30] sm:$0xe] }
  0x19   :  { %2330 = vrot.lane.b32.xlu0 %v2236_v22, %s6686_s26  ;;  %v707_v57 = vor.u32 %v706_v44, %v702_v43  ;;  %v5849_v62 = vcombine.low %v118_v52, %v6826_v9  ;;  %v1219_v2 = vrot.slane %v5850_v55, 1  ;;  %v1220_v3 = vrot.slane %v6389_v33, 1  ;;  %v6396_v5 = vld [vmem:[%s11546_s0 + $0x38] ss:$0 sps:$4 sm:$0x11]  }
  0x1a   :  { %v1729_v4 = vshll.u32 %v5882_v59, 16  ;;  %v1217_v7 = vrot.slane %v6836_v16, 1  ;;  %v6397_v9 = vld [vmem:[%s11546_s0 + $0x2c] ss:$0 sps:$4 sm:$0x11]   ;;  %v1727_v14 = vshrl.u32 %v5882_v59, 16  ;;  %v5946_v28 = vcombine.low %v5626_v12, %v5534_v51 }
  0x1b   :  { %v712_v1 = vsel %vm664_vm1, %v707_v57, %v711_v58  ;;  %v5625_v13 = vld [vmem:[%s11546_s0 + $0x24] sm:$0xe]  ;;  %v1221_v16 = vsel %vm1209_vm0, %v1219_v2, %v1220_v3  ;;  %v1734_v18 = vshll.u32 %v6396_v5, 16  ;;  %v5661_v20 = vld [vmem:[%s11546_s0 + $0x3c] sm:$0xf]  ;;  %v1722_v23 = vshll.u32 %v6397_v9, 16 }
  0x1c   :  { %2556 = vrot.lane.b32.xlu1 %v5976_v61, %s6687_s6  ;;  %v3262_v61 = vrot.slane %v6812_v0, 1  ;;  %v1216_v0 = vrot.slane %v5849_v62, 1  ;;  %v1731_v17 = vrot.slane %v1729_v4, 1  ;;  %v6921_v24 = vld [vmem:[%s11546_s0 + $0x40] sm:$0xf]  ;;  %v5945_v29 = vcombine.low %v5625_v13, %v5532_v49 }
  0x1d   :  { %2554 = vrot.lane.b32.xlu0 %v5975_v63, %s6687_s6  ;;  %v5881_v63 = vcombine.low %v5531_v53, %v5532_v49  ;;  %v5659_v25 = vld [vmem:[%s11546_s0 + $0x30] sm:$0xf]  ;;  %v6929_v27 = vld [vmem:[%s11546_s0 + $0x34] sm:$0xf]  ;;  %v1736_v31 = vrot.slane %v1734_v18, 1  ;;  %v5978_v32 = vcombine.low %v5661_v20, %v6921_v24  ;;  %v1724_v34 = vrot.slane %v1722_v23, 1 }
  0x1e   :  { %v3263_v6 = vsel %vm1209_vm0, %v3261_v60, %v3262_v61  ;;  %v1218_v21 = vsel %vm1209_vm0, %v1216_v0, %v1217_v7  ;;  %v1732_v30 = vor.u32 %v1731_v17, %v1727_v14  ;;  %v5977_v35 = vcombine.low %v5659_v25, %v6929_v27  ;;  %v27_v36 = vld [vmem:[%s11546_s0 + $0x30] sm:$0xf]  ;;  %v6941_v37 = vld [vmem:[%s11546_s0 + $0x34] sm:$0xf]  ;;  %v29_v50 = vld [vmem:[%s11546_s0 + $0x3c] sm:$0xf] }
  0x1f   :  { %v1717_v8 = vshll.u32 %v5881_v63, 16  ;;  %v1715_v19 = vshrl.u32 %v5881_v63, 16  ;;  %v2243_v39 = vrot.slane %v5946_v28, 1  ;;  %v2244_v40 = vrot.slane %v6396_v5, 1  ;;  %v30_v51 = vld [vmem:[%s11546_s0 + $0x40] sm:$0xf] }
  0x20   :  { %3100 = vrot.lane.b32.xlu1 %v2737_v38, %s6688_s21  ;;  %v6946_v38 = vld [vmem:[%s11546_s0 + $0x44] ss:$0 sps:$4 sm:$0x11]   ;;  %v1737_v41 = vsel %vm664_vm1, %v1732_v30, %v1736_v31  ;;  %v2240_v42 = vrot.slane %v5945_v29, 1  ;;  %v2753_v43 = vshll.u32 %v5978_v32, 16  ;;  %v6955_v45 = vcombine.low %v27_v36, %v6941_v37 }
  0x21   :  { %3098 = vrot.lane.b32.xlu0 %v2725_v48, %s6688_s21  ;;  %v1719_v22 = vrot.slane %v1717_v8, 1  ;;  %v6403_v44 = vld [vmem:[%s11546_s0 + $0x38] ss:$0 sps:$4 sm:$0x11]   ;;  %v2241_v47 = vrot.slane %v6397_v9, 1  ;;  %v2741_v48 = vshll.u32 %v5977_v35, 16  ;;  %v2245_v52 = vsel %vm1209_vm0, %v2243_v39, %v2244_v40 }
  0x22   :  { %v2758_v53 = vshll.u32 %v6946_v38, 16  ;;  %v6970_v49 = vld [vmem:[%s11546_s0 + $0x38] ss:$0 sps:$4 sm:$0x11]   ;;  %v2755_v55 = vrot.slane %v2753_v43, 1  ;;  %v6974_v57 = vcombine.low %v29_v50, %v30_v51  ;;  %v2746_v61 = vshll.u32 %v6403_v44, 16 }
  0x23   :  { %v1720_v33 = vor.u32 %v1719_v22, %v1715_v19  ;;  %v2242_v58 = vsel %vm1209_vm0, %v2240_v42, %v2241_v47  ;;  %v2743_v60 = vrot.slane %v2741_v48, 1  ;;  %v5753_v62 = vld [vmem:[%s11546_s0 + $0x30] sm:$0xe]  ;;  %v714_v3 = vshrl.u32 %v6955_v45, 16  ;;  %v5754_v9 = vld [vmem:[%s11546_s0 + $0x3c] sm:$0xe] }
  0x24   :  { %1053 = vrot.lane.b32.xlu1 %v700_v56, %s6684_s28  ;;  %v716_v56 = vshll.u32 %v6955_v45, 16  ;;  %v6407_v5 = vld [vmem:[%s11546_s0 + $0x44] ss:$0 sps:$4 sm:$0x11]   ;;  %v6041_v0 = vcombine.low %v5753_v62, %v6929_v27  ;;  %v2748_v8 = vrot.slane %v2746_v61, 1  ;;  %v726_v13 = vshrl.u32 %v6974_v57, 16 }
  0x25   :  { %3354 = vrot.lane.b32.xlu0 %v3260_v54, %s6689_s22  ;;  %v1725_v46 = vsel %vm664_vm1, %v1720_v33, %v1724_v34  ;;  %v2751_v54 = vshrl.u32 %v5978_v32, 16  ;;  %v121_v14 = vld [vmem:[%s11546_s0 + $0x3c] sm:$0xe]  ;;  %v733_v20 = vshll.u32 %v6407_v5, 16  ;;  %v6042_v22 = vcombine.low %v5754_v9, %v6921_v24  ;;  %v7015_v29 = vld [vmem:[%s11546_s0 + $0x40] sm:$0xf] }
  0x26   :  { %v718_v4 = vrot.slane %v716_v56, 1  ;;  %v3264_v25 = vrot.slane %v6041_v0, 1  ;;  %v3265_v27 = vrot.slane %v6403_v44, 1  ;;  %v5535_v28 = vld [vmem:[%s11546_s0 + $0x3c] sm:$0xf]  ;;  %v5852_v30 = vcombine.low %v121_v14, %v30_v51 }
  0x27   :  { %v2756_v2 = vor.u32 %v2755_v55, %v2751_v54  ;;  %v120_v31 = vld [vmem:[%s11546_s0 + $0x30] sm:$0xe]  ;;  %v735_v34 = vrot.slane %v733_v20, 1  ;;  %v3267_v39 = vrot.slane %v6042_v22, 1  ;;  %v3268_v40 = vrot.slane %v6946_v38, 1 }
  0x28   :  { %1055 = vrot.lane.b32.xlu1 %v712_v1, %s6684_s28  ;;  %v721_v1 = vshll.u32 %v6970_v49, 16  ;;  %v719_v18 = vor.u32 %v718_v4, %v714_v3  ;;  %v3266_v36 = vsel %vm1209_vm0, %v3264_v25, %v3265_v27  ;;  %v1225_v42 = vrot.slane %v5852_v30, 1  ;;  %v7031_v43 = vld [vmem:[%s11546_s0 + $0x50] ss:$0 sps:$4 sm:$0x11]  }
  0x29   :  { %3356 = vrot.lane.b32.xlu0 %v3263_v6, %s6689_s22  ;;  %v728_v6 = vshll.u32 %v6974_v57, 16  ;;  %v7036_v44 = vld [vmem:[%s11546_s0 + $0x44] ss:$0 sps:$4 sm:$0x11]   ;;  %v5665_v38 = vld [vmem:[%s11546_s0 + $0x54] sm:$0xf] }
  0x2a   :  { %v723_v12 = vrot.slane %v721_v1, 1  ;;  %v5663_v51 = vld [vmem:[%s11546_s0 + $0x48] sm:$0xf]  ;;  %v1223_v55 = vrot.slane %v6970_v49, 1  ;;  %v1758_v49 = vshll.u32 %v7031_v43, 16  ;;  %vm4225_vm3 = vcmask 1045504  }
  0x2b   :  { %v730_v19 = vrot.slane %v728_v6, 1  ;;  %v31_v4 = vld [vmem:[%s11546_s0 + $0x48] sm:$0xf]  ;;  %v5627_v6 = vld [vmem:[%s11546_s0 + $0x3c] sm:$0xe]  ;;  %vm3418_vm4 = vcmask 23552  }
  0x2c   :  { %1312 = vrot.lane.b32.xlu1 %v1221_v16, %s6683_s16  ;;  %v5537_v16 = vld [vmem:[%s11546_s0 + $0x48] sm:$0xf]  ;;  %v1760_v14 = vrot.slane %v1758_v49, 1  ;;  %v7109_v22 = vld [vmem:[%s11546_s0 + $0x50] ss:$0 sps:$4 sm:$0x11]  }
  0x2d   :  { %1310 = vrot.lane.b32.xlu0 %v1218_v21, %s6683_s16  ;;  %v7005_v21 = vld [vmem:[%s11546_s0 + $0x4c] sm:$0xf]  ;;  %v731_v33 = vor.u32 %v730_v19, %v726_v13  ;;  %v5947_v19 = vcombine.low %v5627_v6, %v7015_v29  ;;  %v33_v27 = vld [vmem:[%s11546_s0 + $0x54] sm:$0xf]  ;;  %vm3483_vm5 = vcmask 48128   ;;  %vm3548_vm6 = vcmask 72704  }
  0x2e   :  { %v5884_v24 = vcombine.low %v5537_v16, %v7005_v21  ;;  %vm3613_vm7 = vcmask 97280   ;;  %vm3678_vm8 = vcmask 121856   ;;  %vm3743_vm9 = vcmask 146432  }
  0x2f   :  { %v736_v48 = vsel %vm664_vm1, %v731_v33, %v735_v34  ;;  %vm3808_vm10 = vcmask 171008   ;;  %vm3873_vm11 = vcmask 195584   ;;  %vm4159_vm12 = vcmask 220160  }
  0x30   :  { %1536 = vrot.lane.b32.xlu1 %v5882_v59, %s6682_s25  ;;  %v2739_v59 = vshrl.u32 %v5977_v35, 16  ;;  %v1753_v47 = vshll.u32 %v5884_v24, 16 }
  0x31   :  { %1534 = vrot.lane.b32.xlu0 %v5881_v63, %s6682_s25  ;;  %v2760_v63 = vrot.slane %v2758_v53, 1  ;;  %v3269_v53 = vsel %vm1209_vm0, %v3267_v39, %v3268_v40  ;;  %v2250_v39 = vrot.slane %v7031_v43, 1 }
  0x32   :  { %v2744_v7 = vor.u32 %v2743_v60, %v2739_v59  ;;  %v5628_v59 = vld [vmem:[%s11546_s0 + $0x48] sm:$0xe]  ;;  %v1751_v60 = vshrl.u32 %v5884_v24, 16  ;;  %v1755_v61 = vrot.slane %v1753_v47, 1  ;;  %v123_v47 = vld [vmem:[%s11546_s0 + $0x54] sm:$0xe] }
  0x33   :  { %v2761_v17 = vsel %vm664_vm1, %v2756_v2, %v2760_v63  ;;  %v1746_v2 = vshll.u32 %v7036_v44, 16 }
  0x34   :  { %2080 = vrot.lane.b32.xlu1 %v1737_v41, %s6685_s15  ;;  %v2749_v23 = vsel %vm664_vm1, %v2744_v7, %v2748_v8  ;;  %v5851_v41 = vcombine.low %v120_v31, %v6941_v37  ;;  %v7045_v37 = vld [vmem:[%s11546_s0 + $0x58] sm:$0xf]  ;;  %v7089_v7 = vld [vmem:[%s11546_s0 + $0x5c] ss:$0 sps:$4 sm:$0x11]   ;;  %v5948_v8 = vcombine.low %v5628_v59, %v7005_v21  ;;  %v1756_v13 = vor.u32 %v1755_v61, %v1751_v60 }
  0x35   :  { %2078 = vrot.lane.b32.xlu0 %v1725_v46, %s6685_s15  ;;  %v1226_v46 = vrot.slane %v6407_v5, 1  ;;  %v7060_v56 = vcombine.low %v5665_v38, %v7045_v37  ;;  %v7080_v5 = vld [vmem:[%s11546_s0 + $0x4c] sm:$0xf]  ;;  %v1748_v16 = vrot.slane %v1746_v2, 1  ;;  %v2782_v25 = vshll.u32 %v7089_v7, 16 }
  0x36   :  { %v1222_v54 = vrot.slane %v5851_v41, 1  ;;  %v1761_v34 = vsel %vm664_vm1, %v1756_v13, %v1760_v14  ;;  %v2246_v41 = vrot.slane %v5947_v19, 1  ;;  %v4076_v61 = vlaneseq  ;;  %v6072_v14 = vld.sshfl [vmem:[%s11547_s1 + $0x2] sm:$0x11 pattern:$0x75316420] }
  0x37   :  { %v2777_v0 = vshll.u32 %v7060_v56, 16  ;;  %v2775_v21 = vshrl.u32 %v7060_v56, 16  ;;  %v3274_v2 = vrot.slane %v7089_v7, 1  ;;  %v5541_v19 = vld [vmem:[%s11546_s0 + $0x60] sm:$0xf] }
  0x38   :  { %2336 = vrot.lane.b32.xlu1 %v2245_v52, %s6686_s26  ;;  %v7055_v52 = vld [vmem:[%s11546_s0 + $0x4c] sm:$0xf]  ;;  %v1224_v3 = vsel %vm1209_vm0, %v1222_v54, %v1223_v55 }
  0x39   :  { %2334 = vrot.lane.b32.xlu0 %v2242_v58, %s6686_s26  ;;  %v1227_v58 = vsel %vm1209_vm0, %v1225_v42, %v1226_v46  ;;  %v7068_v62 = vcombine.low %v5663_v51, %v7055_v52  ;;  %v2247_v42 = vrot.slane %v7036_v44, 1  ;;  %v7141_v44 = vld [vmem:[%s11546_s0 + $0x5c] ss:$0 sps:$4 sm:$0x11]  }
  0x3a   :  { %v1232_v13 = vrot.slane %v7141_v44, 1 }
  0x3b   :  { %v2765_v9 = vshll.u32 %v7068_v62, 16  ;;  %v2763_v31 = vshrl.u32 %v7068_v62, 16  ;;  %v2248_v59 = vsel %vm1209_vm0, %v2246_v41, %v2247_v42  ;;  %v6076_v42 = vld.sshfl [vmem:[%s11547_s1 + $0xa] sm:$0x11 pattern:$0x75316420] }
  0x3c   :  { %2560 = vrot.lane.b32.xlu1 %v5978_v32, %s6687_s6  ;;  %v724_v32 = vsel %vm664_vm1, %v719_v18, %v723_v12  ;;  %v6421_v12 = vld [vmem:[%s11546_s0 + $0x50] ss:$0 sps:$4 sm:$0x11]   ;;  %v7102_v18 = vcombine.low %v31_v4, %v7080_v5 }
  0x3d   :  { %2558 = vrot.lane.b32.xlu0 %v5977_v35, %s6687_s6  ;;  %v5883_v35 = vcombine.low %v5535_v28, %v7015_v29  ;;  %v34_v28 = vld [vmem:[%s11546_s0 + $0x58] sm:$0xf]  ;;  %v5756_v29 = vld [vmem:[%s11546_s0 + $0x54] sm:$0xe]  ;;  %v2770_v33 = vshll.u32 %v6421_v12, 16 }
  0x3e   :  { %v740_v40 = vshll.u32 %v7102_v18, 16  ;;  %v7130_v46 = vcombine.low %v33_v27, %v34_v28  ;;  %v7179_v27 = vshrl.u32 %v4076_v61, 7 }
  0x3f   :  { %v1741_v50 = vshll.u32 %v5883_v35, 16  ;;  %v1739_v63 = vshrl.u32 %v5883_v35, 16  ;;  %v2772_v51 = vrot.slane %v2770_v33, 1 }
  0x40   :  { %3104 = vrot.lane.b32.xlu1 %v2761_v17, %s6688_s21  ;;  %v5755_v17 = vld [vmem:[%s11546_s0 + $0x48] sm:$0xe]  ;;  %v742_v55 = vrot.slane %v740_v40, 1  ;;  %v752_v60 = vshll.u32 %v7130_v46, 16  ;;  %v750_v6 = vshrl.u32 %v7130_v46, 16  ;;  %11608 = vst [vmem:[#allocation5_spill] sm:$0xff] %v7179_v27 }
  0x41   :  { %3102 = vrot.lane.b32.xlu0 %v2749_v23, %s6688_s21  ;;  %v1743_v1 = vrot.slane %v1741_v50, 1  ;;  %v2779_v23 = vrot.slane %v2777_v0, 1  ;;  %v6043_v30 = vcombine.low %v5755_v17, %v7055_v52  ;;  %v745_v50 = vshll.u32 %v7109_v22, 16 }
  0x42   :  { %v757_v0 = vshll.u32 %v7141_v44, 16  ;;  %v754_v17 = vrot.slane %v752_v60, 1  ;;  %v6075_v33 = vld.sshfl [vmem:[%s11547_s1 + $0x8] sm:$0x11 pattern:$0x75316420] }
  0x43   :  { %v1744_v20 = vor.u32 %v1743_v1, %v1739_v63  ;;  %v2780_v38 = vor.u32 %v2779_v23, %v2775_v21  ;;  %v3270_v52 = vrot.slane %v6043_v30, 1  ;;  %v747_v63 = vrot.slane %v745_v50, 1  ;;  %v6073_v21 = vld.sshfl [vmem:[%s11547_s1 + $0x4] sm:$0x11 pattern:$0x75316420] }
  0x44   :  { %1057 = vrot.lane.b32.xlu1 %v724_v32, %s6684_s28  ;;  %v2767_v32 = vrot.slane %v2765_v9, 1  ;;  %v6071_v9 = vld.sshfl [vmem:[%s11547_s1] sm:$0x11 pattern:$0x75316420]  ;;  %v3971_v23 = vcombine.high %v6072_v14, %v6072_v14  ;;  %v3979_v30 = vcombine.high %v6073_v21, %v6073_v21  ;;  %v759_v41 = vrot.slane %v757_v0, 1 }
  0x45   :  { %3358 = vrot.lane.b32.xlu0 %v3266_v36, %s6689_s22  ;;  %v2249_v36 = vrot.slane %v5948_v8, 1  ;;  %v122_v8 = vld [vmem:[%s11546_s0 + $0x48] sm:$0xe]  ;;  %v6690_v40 = vmov 1966171168   ;;  %v4003_v0 = vcombine.high %v6076_v42, %v6076_v42 }
  0x46   :  { %v2768_v43 = vor.u32 %v2767_v32, %v2763_v31  ;;  %v7192_v32 = vld [vmem:[%s11546_s0 + $0x60] sm:$0xe] }
  0x47   :  { %v2251_v54 = vsel %vm1209_vm0, %v2249_v36, %v2250_v39 }
  0x48   :  { %1059 = vrot.lane.b32.xlu1 %v736_v48, %s6684_s28  ;;  %v2784_v48 = vrot.slane %v2782_v25, 1  ;;  %v4032_v25 = vunpack.i.h.s16 %v6072_v14 }
  0x49   :  { %3360 = vrot.lane.b32.xlu0 %v3269_v53, %s6689_s22  ;;  %v3271_v53 = vrot.slane %v6421_v12, 1 }
  0x4a   :  { %v2785_v49 = vsel %vm664_vm1, %v2780_v38, %v2784_v48  ;;  %v6081_v39 = vpack.i.b16 %v3971_v23, %v4032_v25  ;;  %v5539_v38 = vld [vmem:[%s11546_s0 + $0x54] sm:$0xf]  ;;  %v7209_v48 = vld [vmem:[%s11546_s0 + $0x58] sm:$0xf] }
  0x4b   :  { %v7153_v4 = vsel %vm1209_vm0, %v3270_v52, %v3271_v53  ;;  %v1229_v52 = vrot.slane %v7109_v22, 1  ;;  %v7228_v61 = vcombine.low %v5539_v38, %v7209_v48 }
  0x4c   :  { %1316 = vrot.lane.b32.xlu1 %v1227_v58, %s6683_s16  ;;  %v5854_v58 = vcombine.low %v123_v47, %v34_v28  ;;  %v3995_v47 = vcombine.high %v6075_v33, %v6075_v33 }
  0x4d   :  { %1314 = vrot.lane.b32.xlu0 %v1224_v3, %s6683_s16  ;;  %v2773_v3 = vsel %vm664_vm1, %v2768_v43, %v2772_v51  ;;  %v4070_v43 = vcombine.low %v6081_v39, %v6073_v21  ;;  %v4044_v21 = vunpack.i.h.s16 %v6076_v42  ;;  %v1765_v23 = vshll.u32 %v7228_v61, 16 }
  0x4e   :  { %v1231_v12 = vrot.slane %v5854_v58, 1  ;;  %v6084_v44 = vpack.i.b16 %v6076_v42, %v3995_v47  ;;  %v1763_v47 = vshrl.u32 %v7228_v61, 16 }
  0x50   :  { %1540 = vrot.lane.b32.xlu1 %v5884_v24, %s6682_s25  ;;  %v1749_v24 = vsel %vm664_vm1, %v1744_v20, %v1748_v16  ;;  %v3963_v16 = vcombine.high %v6071_v9, %v6071_v9  ;;  %v7174_v20 = vld [vmem:[%s11546_s0 + $0x64] sm:$0xf] }
  0x51   :  { %1538 = vrot.lane.b32.xlu0 %v5883_v35, %s6682_s25  ;;  %v6044_v35 = vcombine.low %v5756_v29, %v7045_v37  ;;  %v738_v37 = vshrl.u32 %v7102_v18, 16  ;;  %v6074_v29 = vld.sshfl [vmem:[%s11547_s1 + $0x6] sm:$0x11 pattern:$0x75316420]  ;;  %v7214_v53 = vcombine.low %v5541_v19, %v7174_v20  ;;  %v5950_v60 = vcombine.low %v7192_v32, %v7174_v20 }
  0x52   :  { %v6080_v31 = vpack.i.b16 %v6072_v14, %v3963_v16  ;;  %v4038_v36 = vunpack.i.h.s16 %v6074_v29  ;;  %v7251_v16 = vld [vmem:[%s11546_s0 + $0x5c] ss:$0 sps:$4 sm:$0x11]   ;;  %v7319_v32 = vld [vmem:[%s11546_s0 + $0x74] ss:$0 sps:$4 sm:$0x11]  }
  0x53   :  { %v3273_v1 = vrot.slane %v6044_v35, 1  ;;  %v743_v7 = vor.u32 %v742_v55, %v738_v37  ;;  %v6082_v35 = vpack.i.b16 %v6074_v29, %v3979_v30  ;;  %v1233_v37 = vsel %vm1209_vm0, %v1231_v12, %v1232_v13 }
  0x54   :  { %2084 = vrot.lane.b32.xlu1 %v1761_v34, %s6685_s15  ;;  %v3987_v34 = vcombine.high %v6074_v29, %v6074_v29 }
  0x55   :  { %2082 = vrot.lane.b32.xlu0 %v1749_v24, %s6685_s15  ;;  %v7182_v28 = vsel %vm1209_vm0, %v3273_v1, %v3274_v2  ;;  %v4074_v24 = vunpack.c.l.s4 %v6690_v40  ;;  %v5629_v40 = vld [vmem:[%s11546_s0 + $0x54] sm:$0xe] }
  0x56   :  { %v6083_v50 = vpack.i.b16 %v3987_v34, %v4038_v36  ;;  %v6085_v36 = vpack.i.b16 %v4003_v0, %v4044_v21 }
  0x57   :  { %v4075_v51 = vunpack.c.0.s8 %v4074_v24 }
  0x58   :  { %2340 = vrot.lane.b32.xlu1 %v2251_v54, %s6686_s26  ;;  %v755_v54 = vor.u32 %v754_v17, %v750_v6  ;;  %v4071_v55 = vcombine.low %v6082_v35, %v6083_v50  ;;  %v7272_v35 = vld [vmem:[%s11546_s0 + $0x70] sm:$0xf] }
  0x59   :  { %2338 = vrot.lane.b32.xlu0 %v2248_v59, %s6686_s26  ;;  %v7219_v58 = vsub.s32 %v4075_v51, %v7179_v27  ;;  %v6077_v59 = vld.sshfl [vmem:[%s11547_s1 + $0xc] sm:$0x11 pattern:$0x75316420]  ;;  %v5667_v51 = vld [vmem:[%s11546_s0 + $0x60] sm:$0xf] }
  0x5a   :  { %v4011_v12 = vcombine.high %v6077_v59, %v6077_v59  ;;  %v760_v14 = vsel %vm664_vm1, %v755_v54, %v759_v41  ;;  %v4118_v38 = vcombine.low %v6085_v36, %v6077_v59 }
  0x5b   :  { %v4086_v2 = vrot.slane %v4070_v43, %v7219_v58  ;;  %v4093_v6 = vrot.slane %v4071_v55, %v7219_v58  ;;  %v1770_v43 = vshll.u32 %v7251_v16, 16 }
  0x5c   :  { %2564 = vrot.lane.b32.xlu1 %v7060_v56, %s6687_s6  ;;  %v5853_v56 = vcombine.low %v122_v8, %v7080_v5  ;;  %v748_v5 = vsel %vm664_vm1, %v743_v7, %v747_v63  ;;  %v6078_v63 = vld.sshfl [vmem:[%s11547_s1 + $0xe] sm:$0x11 pattern:$0x75316420]  ;;  %v1777_v8 = vshll.u32 %v7214_v53, 16  ;;  %v4127_v54 = vrot.slane %v4118_v38, %v7219_v58 }
  0x5d   :  { %2562 = vrot.lane.b32.xlu0 %v7068_v62, %s6687_s6  ;;  %v4069_v62 = vcombine.low %v6071_v9, %v6080_v31  ;;  %v7243_v9 = vld [vmem:[%s11546_s0 + $0x68] ss:$0 sps:$4 sm:$0x11]   ;;  %v4019_v13 = vcombine.high %v6078_v63, %v6078_v63  ;;  %v4050_v29 = vunpack.i.h.s16 %v6078_v63  ;;  %v6086_v30 = vpack.i.b16 %v6078_v63, %v4011_v12  ;;  %v7308_v12 = vld [vmem:[%s11546_s0 + $0x64] sm:$0xf] }
  0x5e   :  { %v1228_v22 = vrot.slane %v5853_v56, 1  ;;  %v1775_v31 = vshrl.u32 %v7214_v53, 16  ;;  %v1782_v24 = vshll.u32 %v7243_v9, 16  ;;  %v1779_v42 = vrot.slane %v1777_v8, 1 }
  0x5f   :  { %v4079_v1 = vrot.slane %v4069_v62, %v7219_v58  ;;  %v6087_v56 = vpack.i.b16 %v4019_v13, %v4050_v29  ;;  %v1767_v62 = vrot.slane %v1765_v23, 1  ;;  %v2255_v8 = vrot.slane %v5950_v60, 1 }
  0x60   :  { %3108 = vrot.lane.b32.xlu1 %v2785_v49, %s6688_s21  ;;  %v4072_v49 = vcombine.low %v6075_v33, %v6084_v44  ;;  %v1230_v39 = vsel %vm1209_vm0, %v1228_v22, %v1229_v52  ;;  %v1780_v22 = vor.u32 %v1779_v42, %v1775_v31  ;;  %v2256_v13 = vrot.slane %v7243_v9, 1  ;;  %v5757_v31 = vld [vmem:[%s11546_s0 + $0x60] sm:$0xe] }
  0x61   :  { %3106 = vrot.lane.b32.xlu0 %v2773_v3, %s6688_s21  ;;  %v6079_v3 = vld.sshfl [vmem:[%s11547_s1 + $0x10] sm:$0x11 pattern:$0x75316420]  ;;  %v4101_v17 = vcombine.low %v4079_v1, %v4086_v2  ;;  %v4119_v44 = vcombine.low %v6086_v30, %v6087_v56  ;;  %v1768_v0 = vor.u32 %v1767_v62, %v1763_v47 }
  0x62   :  { %v4100_v7 = vrot.slane %v4072_v49, %v7219_v58  ;;  %v4027_v19 = vcombine.high %v6079_v3, %v6079_v3  ;;  %v1784_v49 = vrot.slane %v1782_v24, 1  ;;  %v2257_v30 = vsel %vm1209_vm0, %v2255_v8, %v2256_v13 }
  0x63   :  { %v4109_v33 = vrot.slane %v4101_v17, %v7219_v58  ;;  %v4134_v59 = vrot.slane %v4119_v44, %v7219_v58  ;;  %v2253_v17 = vrot.slane %v7251_v16, 1  ;;  %v7373_v44 = vld [vmem:[%s11546_s0 + $0x74] ss:$0 sps:$4 sm:$0x11]  }
  0x64   :  { %1061 = vrot.lane.b32.xlu1 %v748_v5, %s6684_s28  ;;  %v4102_v25 = vcombine.low %v4093_v6, %v4100_v7  ;;  %v4054_v34 = vunpack.i.l.s16 %v4027_v19  ;;  %v7283_v5 = vld [vmem:[%s11546_s0 + $0x64] sm:$0xf]  ;;  %v6691_v6 = vmov 65535   ;;  %v35_v7 = vld [vmem:[%s11546_s0 + $0x60] sm:$0xf]  ;;  %v1785_v20 = vsel %vm664_vm1, %v1780_v22, %v1784_v49 }
  0x65   :  { %3362 = vrot.lane.b32.xlu0 %v7153_v4, %s6689_s22  ;;  %v5669_v4 = vld [vmem:[%s11546_s0 + $0x6c] sm:$0xf]  ;;  %v7294_v1 = vcombine.low %v5667_v51, %v7283_v5  ;;  %v4142_v2 = vcombine.low %v4127_v54, %v4134_v59  ;;  %v6045_v47 = vcombine.low %v5757_v31, %v7283_v5 }
  0x66   :  { %v4116_v41 = vrot.slane %v4102_v25, %v7219_v58  ;;  %v4120_v50 = vcombine.low %v6079_v3, %v4054_v34  ;;  %v7291_v63 = vcombine.low %v5669_v4, %v7272_v35  ;;  %v4226_v3 = vsel %vm4224_vm2, 4294967295, %v6691_v6  ;;  %v37_v25 = vld [vmem:[%s11546_s0 + $0x6c] sm:$0xf]  ;;  %v7352_v34 = vld [vmem:[%s11546_s0 + $0x68] ss:$0 sps:$4 sm:$0x11]  }
  0x67   :  { %v4149_v19 = vrot.slane %v4142_v2, %v7219_v58  ;;  %v4227_v60 = vsel %vm4225_vm3, %v4226_v3, 0  ;;  %v2789_v16 = vshll.u32 %v7294_v1, 16  ;;  %v5758_v59 = vld [vmem:[%s11546_s0 + $0x6c] sm:$0xe]  ;;  %v3276_v22 = vrot.slane %v6045_v47, 1 }
  0x68   :  { %1063 = vrot.lane.b32.xlu1 %v760_v14, %s6684_s28  ;;  %v4117_v52 = vcombine.low %v4109_v33, %v4116_v41  ;;  %v4141_v55 = vrot.slane %v4120_v50, %v7219_v58  ;;  %v2801_v9 = vshll.u32 %v7291_v63, 16  ;;  %v2806_v33 = vshll.u32 %v7319_v32, 16  ;;  %v125_v6 = vld [vmem:[%s11546_s0 + $0x6c] sm:$0xe]  ;;  %v5545_v3 = vld [vmem:[%s11546_s0 + $0x78] sm:$0xf] }
  0x69   :  { %3364 = vrot.lane.b32.xlu0 %v7182_v28, %s6689_s22  ;;  %v5949_v28 = vcombine.low %v5629_v40, %v7209_v48  ;;  %v2799_v36 = vshrl.u32 %v7291_v63, 16  ;;  %v2787_v41 = vshrl.u32 %v7294_v1, 16  ;;  %v2791_v56 = vrot.slane %v2789_v16, 1 }
  0x6a   :  { %6283 = vmatprep.subr.bf16.mxu0 %v4117_v52  ;;  %6351 = vmatprep.subr.bf16.mxu1 %v4117_v52  ;;  %v4156_v48 = vrot.slane %v4141_v55, %v7219_v58  ;;  %v7332_v58 = vcombine.low %v35_v7, %v7308_v12  ;;  %v2808_v38 = vrot.slane %v2806_v33, 1  ;;  %v769_v50 = vshll.u32 %v7352_v34, 16  ;;  %v7398_v7 = vld [vmem:[%s11546_s0 + $0x7c] sm:$0xf] }
  0x6b   :  { %6284 = vmatpush3.bf16.msra.mxu0 %v4117_v52  ;;  %6353 = vmatpush3.bf16.msra.mxu1 %v4117_v52  ;;  %v2252_v14 = vrot.slane %v5949_v28, 1  ;;  %v2792_v55 = vor.u32 %v2791_v56, %v2787_v41  ;;  %v6046_v13 = vcombine.low %v5758_v59, %v7272_v35  ;;  %v1235_v47 = vrot.slane %v7352_v34, 1  ;;  %v7470_v59 = vld [vmem:[%s11546_s0 + $0x88] sm:$0xf] }
  0x6c   :  { %1320 = vrot.lane.b32.xlu1 %v1233_v37, %s6683_s16  ;;  %v1772_v37 = vrot.slane %v1770_v43, 1  ;;  %v4157_v21 = vcombine.low %v4149_v19, %v4156_v48  ;;  %v764_v40 = vshll.u32 %v7332_v58, 16  ;;  %v762_v51 = vshrl.u32 %v7332_v58, 16 }
  0x6d   :  { %1318 = vrot.lane.b32.xlu0 %v1230_v39, %s6683_s16  ;;  %v2803_v39 = vrot.slane %v2801_v9, 1  ;;  %v2254_v4 = vsel %vm1209_vm0, %v2252_v14, %v2253_v17  ;;  %v771_v2 = vrot.slane %v769_v50, 1  ;;  %v7418_v9 = vcombine.low %v5545_v3, %v7398_v7 }
  0x6e   :  { %v1773_v23 = vsel %vm664_vm1, %v1768_v0, %v1772_v37  ;;  %v4229_v29 = vand.u32 %v4227_v60, %v4157_v21  ;;  %v766_v52 = vrot.slane %v764_v40, 1  ;;  %v7413_v60 = vld [vmem:[%s11546_s0 + $0x70] sm:$0xf] }
  0x6f   :  { %v2804_v43 = vor.u32 %v2803_v39, %v2799_v36  ;;  %v1238_v39 = vrot.slane %v7373_v44, 1  ;;  %v1801_v40 = vshll.u32 %v7418_v9, 16 }
  0x70   :  { %1544 = vrot.lane.b32.xlu1 %v7214_v53, %s6682_s25  ;;  %v7329_v53 = vld [vmem:[%s11546_s0 + $0x68] ss:$0 sps:$4 sm:$0x11]   ;;  %6285 = vmatprep.subr.bf16.mxu0 %v4229_v29  ;;  %v767_v37 = vor.u32 %v766_v52, %v762_v51  ;;  %v5631_v51 = vld [vmem:[%s11546_s0 + $0x6c] sm:$0xe]  ;;  %v1799_v52 = vshrl.u32 %v7418_v9, 16 }
  0x71   :  { %1542 = vrot.lane.b32.xlu0 %v7228_v61, %s6682_s25  ;;  %v7341_v61 = vld [vmem:[%s11546_s0 + $0x70] sm:$0xf]  ;;  %v2794_v42 = vshll.u32 %v7329_v53, 16  ;;  %6286 = vmatpush3.bf16.msra.mxu0 %v4229_v29  ;;  %v3277_v49 = vrot.slane %v7329_v53, 1  ;;  %v2809_v0 = vsel %vm664_vm1, %v2804_v43, %v2808_v38  ;;  %v5632_v43 = vld [vmem:[%s11546_s0 + $0x78] sm:$0xe] }
  0x72   :  { %v7358_v24 = vcombine.low %v37_v25, %v7341_v61  ;;  %6352 = vmatprep.subr.bf16.mxu1 %v4229_v29  ;;  %v5856_v35 = vcombine.low %v125_v6, %v7341_v61  ;;  %v772_v16 = vsel %vm664_vm1, %v767_v37, %v771_v2  ;;  %v5952_v2 = vcombine.low %v5632_v43, %v7398_v7  ;;  %v7483_v37 = vld [vmem:[%s11546_s0 + $0x7c] sm:$0xf] }
  0x73   :  { %6354 = vmatpush3.bf16.msra.mxu1 %v4229_v29  ;;  %v2796_v28 = vrot.slane %v2794_v42, 1  ;;  %v3278_v53 = vsel %vm1209_vm0, %v3276_v22, %v3277_v49  ;;  %v3279_v29 = vrot.slane %v6046_v13, 1 }
  0x74   :  { %2088 = vrot.lane.b32.xlu1 %v1785_v20, %s6685_s15  ;;  %v776_v5 = vshll.u32 %v7358_v24, 16  ;;  %v774_v48 = vshrl.u32 %v7358_v24, 16  ;;  %v5543_v20 = vld [vmem:[%s11546_s0 + $0x6c] sm:$0xf]  ;;  %v1237_v36 = vrot.slane %v5856_v35, 1 }
  0x75   :  { %2086 = vrot.lane.b32.xlu0 %v1773_v23, %s6685_s15  ;;  %v2797_v17 = vsel %vm664_vm1, %v2792_v55, %v2796_v28  ;;  %v7428_v61 = vcombine.low %v5543_v20, %v7413_v60  ;;  %v5673_v28 = vld [vmem:[%s11546_s0 + $0x84] sm:$0xf] }
  0x76   :  { %v7367_v62 = vpop.permute.xlu0 %1530  ;;  %v778_v8 = vrot.slane %v776_v5, 1  ;;  %v1239_v34 = vsel %vm1209_vm0, %v1237_v36, %v1238_v39  ;;  %v7526_v39 = vld [vmem:[%s11546_s0 + $0x80] ss:$0 sps:$4 sm:$0x11]  }
  0x77   :  { %v1789_v38 = vshll.u32 %v7428_v61, 16 }
  0x78   :  { %2344 = vrot.lane.b32.xlu1 %v2257_v30, %s6686_s26  ;;  %v779_v21 = vor.u32 %v778_v8, %v774_v48  ;;  %v3280_v30 = vrot.slane %v7319_v32, 1  ;;  %v7438_v32 = vld [vmem:[%s11546_s0 + $0x80] ss:$0 sps:$4 sm:$0x11]   ;;  %v1787_v48 = vshrl.u32 %v7428_v61, 16  ;;  %v5951_v8 = vcombine.low %v5631_v51, %v7413_v60 }
  0x79   :  { %2342 = vrot.lane.b32.xlu0 %v2254_v4, %s6686_s26  ;;  %v1806_v5 = vshll.u32 %v7438_v32, 16  ;;  %v1791_v6 = vrot.slane %v1789_v38, 1  ;;  %v39_v60 = vld [vmem:[%s11546_s0 + $0x78] sm:$0xf] }
  0x7a   :  { %v7376_v54 = vpop.permute.xlu1 %1306  ;;  %v3281_v56 = vsel %vm1209_vm0, %v3279_v29, %v3280_v30  ;;  %v7512_v29 = vld [vmem:[%s11546_s0 + $0x8c] ss:$0 sps:$4 sm:$0x11]  }
  0x7b   :  { %v1792_v35 = vor.u32 %v1791_v6, %v1787_v48  ;;  %v2830_v38 = vshll.u32 %v7512_v29, 16  ;;  %v2818_v6 = vshll.u32 %v7526_v39, 16 }
  0x7c   :  { %2568 = vrot.lane.b32.xlu1 %v7291_v63, %s6687_s6  ;;  %v781_v63 = vshll.u32 %v7373_v44, 16  ;;  %v1803_v44 = vrot.slane %v1801_v40, 1 }
  0x7d   :  { %2566 = vrot.lane.b32.xlu0 %v7294_v1, %s6687_s6  ;;  %v124_v1 = vld [vmem:[%s11546_s0 + $0x60] sm:$0xe] }
  0x7e   :  { %v7401_v14 = vpop.permute.xlu1 %1308  ;;  %v783_v23 = vrot.slane %v781_v63, 1  ;;  %v5855_v31 = vcombine.low %v124_v1, %v7308_v12  ;;  %v7443_v12 = vld [vmem:[%s11546_s0 + $0x74] ss:$0 sps:$4 sm:$0x11]   ;;  %v7488_v63 = vcombine.low %v5673_v28, %v7470_v59  ;;  %v1804_v13 = vor.u32 %v1803_v44, %v1799_v52  ;;  %v5759_v52 = vld [vmem:[%s11546_s0 + $0x78] sm:$0xe] }
  0x7f   :  { %v1050_v19 = vpop.permute.xlu0 %1049  ;;  %v1794_v55 = vshll.u32 %v7443_v12, 16  ;;  %v2259_v36 = vrot.slane %v7443_v12, 1  ;;  %v7539_v12 = vld [vmem:[%s11546_s0 + $0x80] ss:$0 sps:$4 sm:$0x11]  }
  0x80   :  { %3112 = vrot.lane.b32.xlu1 %v2809_v0, %s6688_s21  ;;  %v784_v4 = vsel %vm664_vm1, %v779_v21, %v783_v23  ;;  %v1234_v42 = vrot.slane %v5855_v31, 1  ;;  %v5671_v0 = vld [vmem:[%s11546_s0 + $0x78] sm:$0xf]  ;;  %v3420_v7 = vsel %vm3418_vm4, %v6748_v10, %v1050_v19  ;;  %v7505_v10 = vld [vmem:[%s11546_s0 + $0x7c] sm:$0xf]  ;;  %v2258_v31 = vrot.slane %v5951_v8, 1 }
  0x81   :  { %3110 = vrot.lane.b32.xlu0 %v2797_v17, %s6688_s21  ;;  %v1808_v17 = vrot.slane %v1806_v5, 1  ;;  %v1796_v1 = vrot.slane %v1794_v55, 1  ;;  %v7497_v21 = vcombine.low %v5671_v0, %v7483_v37  ;;  %v3485_v30 = vsel %vm3483_vm5, %v3420_v7, %v7376_v54 }
  0x82   :  { %v7423_v25 = vpop.permute.xlu1 %1532  ;;  %v1236_v49 = vsel %vm1209_vm0, %v1234_v42, %v1235_v47  ;;  %v7529_v54 = vcombine.low %v39_v60, %v7505_v10  ;;  %v3550_v42 = vsel %vm3548_vm6, %v3485_v30, %v7367_v62  ;;  %v2260_v51 = vsel %vm1209_vm0, %v2258_v31, %v2259_v36 }
  0x83   :  { %v1052_v33 = vpop.permute.xlu0 %1051  ;;  %v2823_v44 = vshrl.u32 %v7488_v63, 16  ;;  %v2832_v8 = vrot.slane %v2830_v38, 1  ;;  %v2820_v30 = vrot.slane %v2818_v6, 1  ;;  %v7622_v38 = vld [vmem:[%s11546_s0 + $0x94] sm:$0xf]  ;;  %v3286_v6 = vrot.slane %v7512_v29, 1 }
  0x84   :  { %1065 = vrot.lane.b32.xlu1 %v772_v16, %s6684_s28  ;;  %v2261_v16 = vrot.slane %v5952_v2, 1  ;;  %v3422_v19 = vsel %vm3418_vm4, %v6756_v15, %v1052_v33  ;;  %v2825_v15 = vshll.u32 %v7488_v63, 16  ;;  %v1809_v33 = vsel %vm664_vm1, %v1804_v13, %v1808_v17 }
  0x85   :  { %3366 = vrot.lane.b32.xlu0 %v3278_v53, %s6689_s22  ;;  %v2262_v53 = vrot.slane %v7438_v32, 1  ;;  %v2811_v2 = vshrl.u32 %v7497_v21, 16  ;;  %v786_v17 = vshrl.u32 %v7529_v54, 16 }
  0x86   :  { %v7445_v41 = vpop.permute.xlu1 %2076 }
  0x87   :  { %v7450_v50 = vpop.permute.xlu0 %2074  ;;  %v2263_v32 = vsel %vm1209_vm0, %v2261_v16, %v2262_v53 }
  0x88   :  { %1067 = vrot.lane.b32.xlu1 %v784_v4, %s6684_s28  ;;  %v1797_v4 = vsel %vm664_vm1, %v1792_v35, %v1796_v1  ;;  %v3615_v43 = vsel %vm3613_vm7, %v3550_v42, %v7450_v50  ;;  %v788_v50 = vshll.u32 %v7529_v54, 16  ;;  %v793_v1 = vshll.u32 %v7539_v12, 16  ;;  %v7584_v35 = vld [vmem:[%s11546_s0 + $0x8c] ss:$0 sps:$4 sm:$0x11]  }
  0x89   :  { %3368 = vrot.lane.b32.xlu0 %v3281_v56, %s6689_s22  ;;  %v41_v56 = vld [vmem:[%s11546_s0 + $0x84] sm:$0xf]  ;;  %v1244_v29 = vrot.slane %v7584_v35, 1 }
  0x8a   :  { %v7472_v22 = vpop.permute.xlu1 %2332  ;;  %v790_v16 = vrot.slane %v788_v50, 1 }
  0x8b   :  { %v2331_v3 = vpop.permute.xlu0 %2330 }
  0x8c   :  { %1324 = vrot.lane.b32.xlu1 %v1239_v34, %s6683_s16  ;;  %v2827_v34 = vrot.slane %v2825_v15, 1  ;;  %v3680_v5 = vsel %vm3678_vm8, %v3615_v43, %v2331_v3  ;;  %v6047_v3 = vcombine.low %v5759_v52, %v7483_v37  ;;  %v7635_v52 = vld [vmem:[%s11546_s0 + $0x88] sm:$0xf] }
  0x8d   :  { %1322 = vrot.lane.b32.xlu0 %v1236_v49, %s6683_s16 }
  0x8e   :  { %v7493_v20 = vpop.permute.xlu1 %2556  ;;  %v3282_v15 = vrot.slane %v6047_v3, 1 }
  0x8f   :  { %v2555_v23 = vpop.permute.xlu0 %2554 }
  0x90   :  { %1548 = vrot.lane.b32.xlu1 %v7418_v9, %s6682_s25  ;;  %v3487_v9 = vsel %vm3483_vm5, %v3422_v19, %v7401_v14  ;;  %v7547_v14 = vld [vmem:[%s11546_s0 + $0x88] sm:$0xf]  ;;  %v3745_v28 = vsel %vm3743_vm9, %v3680_v5, %v2555_v23 }
  0x91   :  { %1546 = vrot.lane.b32.xlu0 %v7428_v61, %s6682_s25  ;;  %v2813_v61 = vshll.u32 %v7497_v21, 16  ;;  %v3552_v62 = vsel %vm3548_vm6, %v3487_v9, %v7423_v25  ;;  %v7566_v55 = vcombine.low %v41_v56, %v7547_v14  ;;  %v795_v9 = vrot.slane %v793_v1, 1 }
  0x92   :  { %v3101_v40 = vpop.permute.xlu1 %3100  ;;  %v3617_v7 = vsel %vm3613_vm7, %v3552_v62, %v7445_v41  ;;  %v2828_v41 = vor.u32 %v2827_v34, %v2823_v44 }
  0x93   :  { %v3099_v47 = vpop.permute.xlu0 %3098  ;;  %v2815_v48 = vrot.slane %v2813_v61, 1  ;;  %v3682_v37 = vsel %vm3678_vm8, %v3617_v7, %v7472_v22  ;;  %v800_v53 = vshll.u32 %v7566_v55, 16  ;;  %v5760_v22 = vld [vmem:[%s11546_s0 + $0x84] sm:$0xe]  ;;  %v798_v61 = vshrl.u32 %v7566_v55, 16 }
  0x94   :  { %2092 = vrot.lane.b32.xlu1 %v1809_v33, %s6685_s15  ;;  %v3810_v25 = vsel %vm3808_vm10, %v3745_v28, %v3099_v47  ;;  %v3747_v60 = vsel %vm3743_vm9, %v3682_v37, %v7493_v20  ;;  %v3283_v20 = vrot.slane %v7526_v39, 1  ;;  %v6048_v42 = vcombine.low %v5760_v22, %v7470_v59  ;;  %v127_v39 = vld [vmem:[%s11546_s0 + $0x84] sm:$0xe]  ;;  %v126_v59 = vld [vmem:[%s11546_s0 + $0x78] sm:$0xe] }
  0x95   :  { %2090 = vrot.lane.b32.xlu0 %v1797_v4, %s6685_s15  ;;  %v2816_v23 = vor.u32 %v2815_v48, %v2811_v2  ;;  %v3812_v31 = vsel %vm3808_vm10, %v3747_v60, %v3101_v40  ;;  %v805_v4 = vshll.u32 %v7584_v35, 16  ;;  %v2833_v40 = vsel %vm664_vm1, %v2828_v41, %v2832_v8  ;;  %v7654_v8 = vld [vmem:[%s11546_s0 + $0x98] ss:$0 sps:$4 sm:$0x11]   ;;  %v5634_v35 = vld [vmem:[%s11546_s0 + $0x90] sm:$0xe] }
  0x96   :  { %v7569_v49 = vpop.permute.xlu1 %1053  ;;  %v802_v56 = vrot.slane %v800_v53, 1  ;;  %v3284_v44 = vsel %vm1209_vm0, %v3282_v15, %v3283_v20  ;;  %v5858_v50 = vcombine.low %v127_v39, %v7547_v14  ;;  %v3285_v48 = vrot.slane %v6048_v42, 1  ;;  %v5633_v60 = vld [vmem:[%s11546_s0 + $0x84] sm:$0xe]  ;;  %v7682_v22 = vld [vmem:[%s11546_s0 + $0xa0] sm:$0xf] }
  0x97   :  { %v3355_v0 = vpop.permute.xlu0 %3354  ;;  %v807_v34 = vrot.slane %v805_v4, 1  ;;  %v1241_v37 = vrot.slane %v7539_v12, 1  ;;  %v5677_v12 = vld [vmem:[%s11546_s0 + $0x9c] sm:$0xf]  ;;  %v7695_v42 = vld [vmem:[%s11546_s0 + $0x94] sm:$0xf] }
  0x98   :  { %2348 = vrot.lane.b32.xlu1 %v2263_v32, %s6686_s26  ;;  %v3875_v13 = vsel %vm3873_vm11, %v3810_v25, %v3355_v0  ;;  %v791_v32 = vor.u32 %v790_v16, %v786_v17  ;;  %v803_v5 = vor.u32 %v802_v56, %v798_v61  ;;  %v5857_v25 = vcombine.low %v126_v59, %v7505_v10  ;;  %v6469_v16 = vld [vmem:[%s11546_s0 + $0x8c] ss:$0 sps:$4 sm:$0x11]   ;;  %v5675_v56 = vld [vmem:[%s11546_s0 + $0x90] sm:$0xf] }
  0x99   :  { %2346 = vrot.lane.b32.xlu0 %v2260_v51, %s6686_s26  ;;  %6287 = vmatprep.mubr.msk.bf16.mxu0 %vm4159_vm12, %v3875_v13  ;;  %v5547_v51 = vld [vmem:[%s11546_s0 + $0x84] sm:$0xf]  ;;  %v1243_v7 = vrot.slane %v5858_v50, 1  ;;  %v3287_v17 = vsel %vm1209_vm0, %v3285_v48, %v3286_v6  ;;  %v1818_v4 = vshll.u32 %v6469_v16, 16  ;;  %v5953_v61 = vcombine.low %v5633_v60, %v7635_v52 }
  0x9a   :  { %v7593_v19 = vpop.permute.xlu1 %1055  ;;  %v796_v62 = vsel %vm664_vm1, %v791_v32, %v795_v9  ;;  %v5889_v0 = vcombine.low %v5547_v51, %v7635_v52  ;;  %v808_v14 = vsel %vm664_vm1, %v803_v5, %v807_v34  ;;  %v1240_v1 = vrot.slane %v5857_v25, 1  ;;  %v43_v34 = vld [vmem:[%s11546_s0 + $0x90] sm:$0xf] }
  0x9b   :  { %v3357_v36 = vpop.permute.xlu0 %3356  ;;  %v5954_v32 = vcombine.low %v5634_v35, %v7622_v38  ;;  %v1820_v52 = vrot.slane %v1818_v4, 1  ;;  %v2268_v48 = vrot.slane %v7654_v8, 1  ;;  %v2264_v6 = vrot.slane %v5953_v61, 1  ;;  %v5761_v35 = vld [vmem:[%s11546_s0 + $0x90] sm:$0xe] }
  0x9c   :  { %v3877_v33 = vsel %vm3873_vm11, %v3812_v31, %v3357_v36  ;;  %2572 = vrot.lane.b32.xlu1 %v7488_v63, %s6687_s6  ;;  %v2821_v63 = vsel %vm664_vm1, %v2816_v23, %v2820_v30  ;;  %v1813_v41 = vshll.u32 %v5889_v0, 16  ;;  %v1245_v23 = vsel %vm1209_vm0, %v1243_v7, %v1244_v29 }
  0x9d   :  { %2570 = vrot.lane.b32.xlu0 %v7497_v21, %s6687_s6  ;;  %6288 = vmatmul.mubr.msk.bf16.vlgmr.msra.gmra.mrb[0].mxu0 %vm4159_vm12, %v3877_v33  ;;  %v5549_v21 = vld [vmem:[%s11546_s0 + $0x90] sm:$0xf]  ;;  %v1830_v36 = vshll.u32 %v7654_v8, 16  ;;  %v1242_v33 = vsel %vm1209_vm0, %v1240_v1, %v1241_v37  ;;  %v1811_v9 = vshrl.u32 %v5889_v0, 16  ;;  %v2267_v50 = vrot.slane %v5954_v32, 1 }
  0x9e   :  { %v7610_v47 = vpop.permute.xlu1 %1312  ;;  %v5890_v28 = vcombine.low %v5549_v21, %v7622_v38  ;;  %v1815_v20 = vrot.slane %v1813_v41, 1  ;;  %v7705_v38 = vld [vmem:[%s11546_s0 + $0xa4] ss:$0 sps:$4 sm:$0x11]   ;;  %v2265_v25 = vrot.slane %v6469_v16, 1  ;;  %v3424_v7 = vsel %vm3418_vm4, %v6829_v11, %v7569_v49 }
  0x9f   :  { %v7624_v43 = vpop.permute.xlu0 %1310  ;;  %v1832_v21 = vrot.slane %v1830_v36, 1  ;;  %v45_v49 = vld [vmem:[%s11546_s0 + $0x9c] sm:$0xf]  ;;  %v2854_v60 = vshll.u32 %v7705_v38, 16  ;;  %v3426_v36 = vsel %vm3418_vm4, %v6851_v26, %v7593_v19 }
  0xa0   :  { %3116 = vrot.lane.b32.xlu1 %v2833_v40, %s6688_s21  ;;  %v1825_v13 = vshll.u32 %v5890_v28, 16  ;;  %v1823_v30 = vshrl.u32 %v5890_v28, 16  ;;  %v1816_v51 = vor.u32 %v1815_v20, %v1811_v9  ;;  %v2266_v16 = vsel %vm1209_vm0, %v2264_v6, %v2265_v25 }
  0xa1   :  { %3114 = vrot.lane.b32.xlu0 %v2821_v63, %s6688_s21  ;;  %v7699_v63 = vcombine.low %v5677_v12, %v7682_v22  ;;  %v3491_v20 = vsel %vm3483_vm5, %v3426_v36, %v7610_v47 }
  0xa2   :  { %v7643_v2 = vpop.permute.xlu1 %1536  ;;  %v1827_v31 = vrot.slane %v1825_v13, 1  ;;  %v7731_v13 = vld [vmem:[%s11546_s0 + $0x98] ss:$0 sps:$4 sm:$0x11]   ;;  %v1821_v1 = vsel %vm664_vm1, %v1816_v51, %v1820_v52 }
  0xa3   :  { %v7648_v3 = vpop.permute.xlu0 %1534  ;;  %v3556_v26 = vsel %vm3548_vm6, %v3491_v20, %v7643_v2  ;;  %v7792_v2 = vld [vmem:[%s11546_s0 + $0xa4] ss:$0 sps:$4 sm:$0x11]  }
  0xa4   :  { %1069 = vrot.lane.b32.xlu1 %v796_v62, %s6684_s28  ;;  %v1828_v39 = vor.u32 %v1827_v31, %v1823_v30  ;;  %v7718_v62 = vld [vmem:[%s11546_s0 + $0x94] sm:$0xf]  ;;  %v7763_v31 = vld [vmem:[%s11546_s0 + $0x98] ss:$0 sps:$4 sm:$0x11]  }
  0xa5   :  { %3370 = vrot.lane.b32.xlu0 %v3284_v44, %s6689_s22  ;;  %v7710_v44 = vcombine.low %v5675_v56, %v7695_v42  ;;  %v7734_v8 = vcombine.low %v43_v34, %v7718_v62  ;;  %v2842_v56 = vshll.u32 %v7731_v13, 16  ;;  %v817_v34 = vshll.u32 %v7763_v31, 16 }
  0xa6   :  { %v7659_v10 = vpop.permute.xlu1 %2080  ;;  %v1833_v29 = vsel %vm664_vm1, %v1828_v39, %v1832_v21  ;;  %v6049_v39 = vcombine.low %v5761_v35, %v7695_v42  ;;  %v2856_v21 = vrot.slane %v2854_v60, 1  ;;  %v128_v60 = vld [vmem:[%s11546_s0 + $0x90] sm:$0xe] }
  0xa7   :  { %v2079_v53 = vpop.permute.xlu0 %2078  ;;  %v2837_v11 = vshll.u32 %v7710_v44, 16  ;;  %v3621_v51 = vsel %vm3613_vm7, %v3556_v26, %v7659_v10  ;;  %v810_v10 = vshrl.u32 %v7734_v8, 16  ;;  %v3292_v26 = vrot.slane %v7705_v38, 1 }
  0xa8   :  { %1071 = vrot.lane.b32.xlu1 %v808_v14, %s6684_s28  ;;  %v2849_v14 = vshll.u32 %v7699_v63, 16 }
  0xa9   :  { %3372 = vrot.lane.b32.xlu0 %v3287_v17, %s6689_s22  ;;  %v2839_v61 = vrot.slane %v2837_v11, 1 }
  0xaa   :  { %v7684_v15 = vpop.permute.xlu1 %2336  ;;  %v2851_v30 = vrot.slane %v2849_v14, 1  ;;  %v2844_v14 = vrot.slane %v2842_v56, 1 }
  0xab   :  { %v2335_v40 = vpop.permute.xlu0 %2334 }
  0xac   :  { %1328 = vrot.lane.b32.xlu1 %v1245_v23, %s6683_s16  ;;  %v2847_v23 = vshrl.u32 %v7699_v63, 16 }
  0xad   :  { %1326 = vrot.lane.b32.xlu0 %v1242_v33, %s6683_s16 }
  0xae   :  { %v7707_v59 = vpop.permute.xlu1 %2560  ;;  %v2852_v52 = vor.u32 %v2851_v30, %v2847_v23  ;;  %v7844_v30 = vld [vmem:[%s11546_s0 + $0xa0] sm:$0xf] }
  0xaf   :  { %v2559_v5 = vpop.permute.xlu0 %2558 }
  0xb0   :  { %1552 = vrot.lane.b32.xlu1 %v5890_v28, %s6682_s25  ;;  %v3489_v28 = vsel %vm3483_vm5, %v3424_v7, %v7624_v43  ;;  %v2269_v43 = vsel %vm1209_vm0, %v2267_v50, %v2268_v48  ;;  %v2857_v11 = vsel %vm664_vm1, %v2852_v52, %v2856_v21  ;;  %v7863_v21 = vld [vmem:[%s11546_s0 + $0xb0] ss:$0 sps:$4 sm:$0x11]  }
  0xb1   :  { %1550 = vrot.lane.b32.xlu0 %v5889_v0, %s6682_s25  ;;  %v7746_v0 = vld [vmem:[%s11546_s0 + $0xa0] sm:$0xf]  ;;  %v3554_v37 = vsel %vm3548_vm6, %v3489_v28, %v7648_v3  ;;  %v2835_v3 = vshrl.u32 %v7710_v44, 16  ;;  %v3288_v28 = vrot.slane %v6049_v39, 1 }
  0xb2   :  { %v3105_v17 = vpop.permute.xlu1 %3104  ;;  %v3619_v12 = vsel %vm3613_vm7, %v3554_v37, %v2079_v53  ;;  %v812_v53 = vshll.u32 %v7734_v8, 16  ;;  %v7772_v9 = vcombine.low %v45_v49, %v7746_v0  ;;  %v829_v49 = vshll.u32 %v7792_v2, 16 }
  0xb3   :  { %v3103_v41 = vpop.permute.xlu0 %3102  ;;  %v3684_v33 = vsel %vm3678_vm8, %v3619_v12, %v2335_v40  ;;  %v2840_v25 = vor.u32 %v2839_v61, %v2835_v3  ;;  %v7834_v12 = vld [vmem:[%s11546_s0 + $0xac] sm:$0xf] }
  0xb4   :  { %2096 = vrot.lane.b32.xlu1 %v1833_v29, %s6685_s15  ;;  %v3749_v4 = vsel %vm3743_vm9, %v3684_v33, %v2559_v5  ;;  %v3686_v5 = vsel %vm3678_vm8, %v3621_v51, %v7684_v15  ;;  %v814_v42 = vrot.slane %v812_v53, 1  ;;  %v824_v50 = vshll.u32 %v7772_v9, 16  ;;  %v5762_v15 = vld [vmem:[%s11546_s0 + $0x9c] sm:$0xe] }
  0xb5   :  { %2094 = vrot.lane.b32.xlu0 %v1821_v1, %s6685_s15  ;;  %v3814_v19 = vsel %vm3808_vm10, %v3749_v4, %v3103_v41  ;;  %v3751_v48 = vsel %vm3743_vm9, %v3686_v5, %v7707_v59  ;;  %v3289_v59 = vrot.slane %v7731_v13, 1  ;;  %v819_v41 = vrot.slane %v817_v34, 1 }
  0xb6   :  { %v7777_v32 = vpop.permute.xlu1 %1057  ;;  %v3816_v7 = vsel %vm3808_vm10, %v3751_v48, %v3105_v17  ;;  %v129_v17 = vld [vmem:[%s11546_s0 + $0x9c] sm:$0xe]  ;;  %v815_v37 = vor.u32 %v814_v42, %v810_v10  ;;  %v2845_v13 = vsel %vm664_vm1, %v2840_v25, %v2844_v14  ;;  %v831_v36 = vrot.slane %v829_v49, 1  ;;  %v7889_v14 = vld [vmem:[%s11546_s0 + $0xb8] sm:$0xf] }
  0xb7   :  { %v3359_v40 = vpop.permute.xlu0 %3358  ;;  %v3290_v3 = vsel %vm1209_vm0, %v3288_v28, %v3289_v59  ;;  %v5860_v20 = vcombine.low %v129_v17, %v7746_v0  ;;  %v7868_v0 = vld [vmem:[%s11546_s0 + $0xa4] ss:$0 sps:$4 sm:$0x11]   ;;  %v1250_v51 = vrot.slane %v7792_v2, 1  ;;  %v1247_v10 = vrot.slane %v7763_v31, 1 }
  0xb8   :  { %v3879_v47 = vsel %vm3873_vm11, %v3814_v19, %v3359_v40  ;;  %2352 = vrot.lane.b32.xlu1 %v2269_v43, %s6686_s26  ;;  %v822_v43 = vshrl.u32 %v7772_v9, 16  ;;  %v820_v33 = vsel %vm664_vm1, %v815_v37, %v819_v41  ;;  %v5859_v19 = vcombine.low %v128_v60, %v7718_v62  ;;  %v5635_v25 = vld [vmem:[%s11546_s0 + $0x9c] sm:$0xe]  ;;  %v5681_v2 = vld [vmem:[%s11546_s0 + $0xb4] sm:$0xf] }
  0xb9   :  { %2350 = vrot.lane.b32.xlu0 %v2266_v16, %s6686_s26  ;;  %6291 = vmatprep.mubr.msk.bf16.mxu0 %vm4159_vm12, %v3879_v47  ;;  %v6050_v16 = vcombine.low %v5762_v15, %v7682_v22  ;;  %v5551_v22 = vld [vmem:[%s11546_s0 + $0x9c] sm:$0xf]  ;;  %v1249_v62 = vrot.slane %v5860_v20, 1  ;;  %v1854_v31 = vshll.u32 %v7863_v21, 16  ;;  %v5679_v41 = vld [vmem:[%s11546_s0 + $0xa8] sm:$0xf] }
  0xba   :  { %v7802_v6 = vpop.permute.xlu1 %1059  ;;  %v5891_v40 = vcombine.low %v5551_v22, %v7844_v30  ;;  %v1246_v5 = vrot.slane %v5859_v19, 1  ;;  %v2274_v20 = vrot.slane %v7863_v21, 1  ;;  %v49_v21 = vld [vmem:[%s11546_s0 + $0xb4] sm:$0xf] }
  0xbb   :  { %v3361_v29 = vpop.permute.xlu0 %3360  ;;  %v3291_v56 = vrot.slane %v6050_v16, 1  ;;  %v7911_v16 = vcombine.low %v5681_v2, %v7889_v14  ;;  %v1856_v60 = vrot.slane %v1854_v31, 1  ;;  %v7969_v2 = vld [vmem:[%s11546_s0 + $0xb0] ss:$0 sps:$4 sm:$0x11]  }
  0xbc   :  { %v3881_v1 = vsel %vm3873_vm11, %v3816_v7, %v3361_v29  ;;  %2576 = vrot.lane.b32.xlu1 %v7699_v63, %s6687_s6  ;;  %v826_v63 = vrot.slane %v824_v50, 1  ;;  %v1837_v42 = vshll.u32 %v5891_v40, 16  ;;  %v5636_v50 = vld [vmem:[%s11546_s0 + $0xa8] sm:$0xe]  ;;  %v1842_v7 = vshll.u32 %v7868_v0, 16 }
  0xbd   :  { %2574 = vrot.lane.b32.xlu0 %v7710_v44, %s6687_s6  ;;  %6292 = vmatmul.mubr.msk.bf16.gmra.mrb[4].mxu0 %vm4159_vm12, %v3881_v1  ;;  %v5553_v44 = vld [vmem:[%s11546_s0 + $0xa8] sm:$0xf]  ;;  %v3293_v34 = vsel %vm1209_vm0, %v3291_v56, %v3292_v26  ;;  %v1251_v29 = vsel %vm1209_vm0, %v1249_v62, %v1250_v51  ;;  %v1835_v59 = vshrl.u32 %v5891_v40, 16  ;;  %v5956_v37 = vcombine.low %v5636_v50, %v7834_v12  ;;  %v7932_v26 = vld [vmem:[%s11546_s0 + $0xbc] ss:$0 sps:$4 sm:$0x11]  }
  0xbe   :  { %v7822_v35 = vpop.permute.xlu1 %1316  ;;  %v827_v53 = vor.u32 %v826_v63, %v822_v43  ;;  %v5892_v4 = vcombine.low %v5553_v44, %v7834_v12  ;;  %v1839_v49 = vrot.slane %v1837_v42, 1  ;;  %v7906_v43 = vld [vmem:[%s11546_s0 + $0xac] sm:$0xf]  ;;  %v5955_v63 = vcombine.low %v5635_v25, %v7844_v30  ;;  %v7939_v62 = vld [vmem:[%s11546_s0 + $0xb0] ss:$0 sps:$4 sm:$0x11]  }
  0xbf   :  { %v7836_v23 = vpop.permute.xlu0 %1314  ;;  %v1844_v22 = vrot.slane %v1842_v7, 1  ;;  %v7925_v30 = vld [vmem:[%s11546_s0 + $0xac] sm:$0xf]  ;;  %v2271_v56 = vrot.slane %v7868_v0, 1  ;;  %v3428_v0 = vsel %vm3418_vm4, %v6955_v45, %v7777_v32  ;;  %v2871_v50 = vshrl.u32 %v7911_v16, 16 }
  0xc0   :  { %3120 = vrot.lane.b32.xlu1 %v2857_v11, %s6688_s21  ;;  %v832_v38 = vsel %vm664_vm1, %v827_v53, %v831_v36  ;;  %v1849_v47 = vshll.u32 %v5892_v4, 16  ;;  %v1847_v15 = vshrl.u32 %v5892_v4, 16  ;;  %v1248_v11 = vsel %vm1209_vm0, %v1246_v5, %v1247_v10  ;;  %v47_v36 = vld [vmem:[%s11546_s0 + $0xa8] sm:$0xf] }
  0xc1   :  { %3118 = vrot.lane.b32.xlu0 %v2845_v13, %s6688_s21  ;;  %v1840_v12 = vor.u32 %v1839_v49, %v1835_v59  ;;  %v2273_v53 = vrot.slane %v5956_v37, 1  ;;  %v2270_v19 = vrot.slane %v5955_v63, 1  ;;  %v7950_v51 = vcombine.low %v47_v36, %v7925_v30 }
  0xc2   :  { %v7852_v61 = vpop.permute.xlu1 %1540  ;;  %v1851_v28 = vrot.slane %v1849_v47, 1  ;;  %v7955_v47 = vld [vmem:[%s11546_s0 + $0xb8] sm:$0xf]  ;;  %v2878_v25 = vshll.u32 %v7932_v26, 16 }
  0xc3   :  { %v7857_v39 = vpop.permute.xlu0 %1538  ;;  %v1845_v10 = vsel %vm664_vm1, %v1840_v12, %v1844_v22  ;;  %v2275_v42 = vsel %vm1209_vm0, %v2273_v53, %v2274_v20  ;;  %v2272_v31 = vsel %vm1209_vm0, %v2270_v19, %v2271_v56 }
  0xc4   :  { %1073 = vrot.lane.b32.xlu1 %v820_v33, %s6684_s28  ;;  %v1852_v13 = vor.u32 %v1851_v28, %v1847_v15  ;;  %v836_v28 = vshll.u32 %v7950_v51, 16 }
  0xc5   :  { %3374 = vrot.lane.b32.xlu0 %v3290_v3, %s6689_s22  ;;  %v7917_v3 = vcombine.low %v5679_v41, %v7906_v43 }
  0xc6   :  { %v7873_v52 = vpop.permute.xlu1 %2084  ;;  %v838_v53 = vrot.slane %v836_v28, 1 }
  0xc7   :  { %v2083_v48 = vpop.permute.xlu0 %2082  ;;  %v2861_v45 = vshll.u32 %v7917_v3, 16 }
  0xc8   :  { %1075 = vrot.lane.b32.xlu1 %v832_v38, %s6684_s28  ;;  %v2873_v38 = vshll.u32 %v7911_v16, 16 }
  0xc9   :  { %3376 = vrot.lane.b32.xlu0 %v3293_v34, %s6689_s22  ;;  %v3493_v34 = vsel %vm3483_vm5, %v3428_v0, %v7836_v23 }
  0xca   :  { %v7896_v1 = vpop.permute.xlu1 %2340  ;;  %v3558_v32 = vsel %vm3548_vm6, %v3493_v34, %v7857_v39  ;;  %v2875_v7 = vrot.slane %v2873_v38, 1  ;;  %v2859_v39 = vshrl.u32 %v7917_v3, 16 }
  0xcb   :  { %v2339_v17 = vpop.permute.xlu0 %2338  ;;  %v3623_v23 = vsel %vm3613_vm7, %v3558_v32, %v2083_v48  ;;  %v5763_v48 = vld [vmem:[%s11546_s0 + $0xa8] sm:$0xe] }
  0xcc   :  { %1332 = vrot.lane.b32.xlu1 %v1251_v29, %s6683_s16  ;;  %v3430_v29 = vsel %vm3418_vm4, %v6974_v57, %v7802_v6  ;;  %v3688_v15 = vsel %vm3678_vm8, %v3623_v23, %v2339_v17  ;;  %v2863_v57 = vrot.slane %v2861_v45, 1  ;;  %v2866_v6 = vshll.u32 %v7939_v62, 16  ;;  %v5557_v23 = vld [vmem:[%s11546_s0 + $0xc0] sm:$0xf] }
  0xcd   :  { %1330 = vrot.lane.b32.xlu0 %v1248_v11, %s6683_s16  ;;  %v7985_v11 = vcombine.low %v49_v21, %v7955_v47  ;;  %v3495_v59 = vsel %vm3483_vm5, %v3430_v29, %v7822_v35  ;;  %v2876_v22 = vor.u32 %v2875_v7, %v2871_v50  ;;  %v6051_v36 = vcombine.low %v5763_v48, %v7906_v43  ;;  %v130_v7 = vld [vmem:[%s11546_s0 + $0xa8] sm:$0xe] }
  0xce   :  { %v7914_v44 = vpop.permute.xlu1 %2564  ;;  %v3560_v17 = vsel %vm3548_vm6, %v3495_v59, %v7852_v61  ;;  %v834_v61 = vshrl.u32 %v7950_v51, 16  ;;  %v2868_v19 = vrot.slane %v2866_v6, 1 }
  0xcf   :  { %v2563_v33 = vpop.permute.xlu0 %2562  ;;  %v3625_v12 = vsel %vm3613_vm7, %v3560_v17, %v7873_v52  ;;  %v8010_v52 = vld [vmem:[%s11546_s0 + $0xbc] ss:$0 sps:$4 sm:$0x11]   ;;  %v848_v20 = vshll.u32 %v7985_v11, 16  ;;  %v846_v45 = vshrl.u32 %v7985_v11, 16  ;;  %v3298_v17 = vrot.slane %v7932_v26, 1 }
  0xd0   :  { %1556 = vrot.lane.b32.xlu1 %v5892_v4, %s6682_s25  ;;  %v1857_v4 = vsel %vm664_vm1, %v1852_v13, %v1856_v60  ;;  %v3753_v49 = vsel %vm3743_vm9, %v3688_v15, %v2563_v33  ;;  %v2880_v13 = vrot.slane %v2878_v25, 1  ;;  %v841_v60 = vshll.u32 %v7969_v2, 16  ;;  %v8082_v26 = vld [vmem:[%s11546_s0 + $0xbc] ss:$0 sps:$4 sm:$0x11]  }
  0xd1   :  { %1554 = vrot.lane.b32.xlu0 %v5891_v40, %s6682_s25  ;;  %v3690_v33 = vsel %vm3678_vm8, %v3625_v12, %v7896_v1  ;;  %v2864_v1 = vor.u32 %v2863_v57, %v2859_v39  ;;  %v5555_v39 = vld [vmem:[%s11546_s0 + $0xb4] sm:$0xf]  ;;  %v1256_v12 = vrot.slane %v8010_v52, 1 }
  0xd2   :  { %v3109_v5 = vpop.permute.xlu1 %3108  ;;  %v3755_v43 = vsel %vm3743_vm9, %v3690_v33, %v7914_v44  ;;  %v843_v0 = vrot.slane %v841_v60, 1  ;;  %v3295_v44 = vrot.slane %v7939_v62, 1  ;;  %v2881_v32 = vsel %vm664_vm1, %v2876_v22, %v2880_v13 }
  0xd3   :  { %v3107_v40 = vpop.permute.xlu0 %3106  ;;  %v3820_v38 = vsel %vm3808_vm10, %v3755_v43, %v3109_v5  ;;  %v131_v5 = vld [vmem:[%s11546_s0 + $0xb4] sm:$0xe]  ;;  %v2869_v62 = vsel %vm664_vm1, %v2864_v1, %v2868_v19  ;;  %v8104_v19 = vld [vmem:[%s11546_s0 + $0xd0] sm:$0xf] }
  0xd4   :  { %2100 = vrot.lane.b32.xlu1 %v1857_v4, %s6685_s15  ;;  %v3818_v41 = vsel %vm3808_vm10, %v3753_v49, %v3107_v40  ;;  %v5764_v4 = vld [vmem:[%s11546_s0 + $0xb4] sm:$0xe]  ;;  %v839_v40 = vor.u32 %v838_v53, %v834_v61  ;;  %v5862_v15 = vcombine.low %v131_v5, %v7955_v47  ;;  %v8075_v47 = vld [vmem:[%s11546_s0 + $0xc8] ss:$0 sps:$4 sm:$0x11]  }
  0xd5   :  { %2098 = vrot.lane.b32.xlu0 %v1845_v10, %s6685_s15  ;;  %v3294_v10 = vrot.slane %v6051_v36, 1  ;;  %v6052_v25 = vcombine.low %v5764_v4, %v7889_v14  ;;  %v8057_v14 = vld [vmem:[%s11546_s0 + $0xb8] sm:$0xf]  ;;  %v5637_v43 = vld [vmem:[%s11546_s0 + $0xb4] sm:$0xe]  ;;  %v1878_v1 = vshll.u32 %v8075_v47, 16 }
  0xd6   :  { %v7990_v37 = vpop.permute.xlu1 %1061  ;;  %v844_v28 = vsel %vm664_vm1, %v839_v40, %v843_v0  ;;  %v1255_v60 = vrot.slane %v5862_v15, 1  ;;  %v5683_v40 = vld [vmem:[%s11546_s0 + $0xc0] sm:$0xf] }
  0xd7   :  { %v3363_v63 = vpop.permute.xlu0 %3362  ;;  %v3296_v29 = vsel %vm1209_vm0, %v3294_v10, %v3295_v44  ;;  %v3297_v6 = vrot.slane %v6052_v25, 1 }
  0xd8   :  { %v3883_v35 = vsel %vm3873_vm11, %v3818_v41, %v3363_v63  ;;  %2356 = vrot.lane.b32.xlu1 %v2275_v42, %s6686_s26  ;;  %v850_v42 = vrot.slane %v848_v20, 1  ;;  %v5861_v41 = vcombine.low %v130_v7, %v7925_v30  ;;  %v5893_v63 = vcombine.low %v5555_v39, %v8057_v14 }
  0xd9   :  { %2354 = vrot.lane.b32.xlu0 %v2272_v31, %s6686_s26  ;;  %6295 = vmatprep.mubr.msk.bf16.mxu0 %vm4159_vm12, %v3883_v35  ;;  %v1253_v35 = vrot.slane %v7969_v2, 1  ;;  %v3299_v33 = vsel %vm1209_vm0, %v3297_v6, %v3298_v17  ;;  %v5685_v2 = vld [vmem:[%s11546_s0 + $0xcc] sm:$0xf]  ;;  %v2280_v6 = vrot.slane %v8075_v47, 1 }
  0xda   :  { %v8015_v56 = vpop.permute.xlu1 %1063  ;;  %v851_v48 = vor.u32 %v850_v42, %v846_v45  ;;  %v1252_v61 = vrot.slane %v5861_v41, 1  ;;  %v1861_v53 = vshll.u32 %v5893_v63, 16  ;;  %v1859_v10 = vshrl.u32 %v5893_v63, 16  ;;  %v8119_v42 = vld [vmem:[%s11546_s0 + $0xc4] sm:$0xf] }
  0xdb   :  { %v3365_v21 = vpop.permute.xlu0 %3364  ;;  %v1866_v45 = vshll.u32 %v8082_v26, 16  ;;  %v8135_v15 = vcombine.low %v5683_v40, %v8119_v42  ;;  %v2277_v41 = vrot.slane %v8082_v26, 1 }
  0xdc   :  { %v3885_v34 = vsel %vm3873_vm11, %v3820_v38, %v3365_v21  ;;  %2580 = vrot.lane.b32.xlu1 %v7911_v16, %s6687_s6  ;;  %v853_v16 = vshll.u32 %v8010_v52, 16  ;;  %v5638_v52 = vld [vmem:[%s11546_s0 + $0xc0] sm:$0xe]  ;;  %v1257_v38 = vsel %vm1209_vm0, %v1255_v60, %v1256_v12  ;;  %v1863_v44 = vrot.slane %v1861_v53, 1 }
  0xdd   :  { %2578 = vrot.lane.b32.xlu0 %v7917_v3, %s6687_s6  ;;  %6296 = vmatmul.mubr.msk.bf16.gmra.mrb[8].mxu0 %vm4159_vm12, %v3885_v34  ;;  %v8044_v3 = vld [vmem:[%s11546_s0 + $0xc4] sm:$0xf]  ;;  %v1254_v34 = vsel %vm1209_vm0, %v1252_v61, %v1253_v35 }
  0xde   :  { %v8034_v50 = vpop.permute.xlu1 %1320  ;;  %v855_v59 = vrot.slane %v853_v16, 1  ;;  %v5894_v49 = vcombine.low %v5557_v23, %v8044_v3  ;;  %v5957_v16 = vcombine.low %v5637_v43, %v8057_v14  ;;  %v1880_v23 = vrot.slane %v1878_v1, 1  ;;  %v5463_v14 = vld [vmem:[%s11546_s0 + $0xd8] sm:$0xf] }
  0xdf   :  { %v8046_v31 = vpop.permute.xlu0 %1318  ;;  %v1864_v39 = vor.u32 %v1863_v44, %v1859_v10 }
  0xe0   :  { %3124 = vrot.lane.b32.xlu1 %v2881_v32, %s6688_s21  ;;  %v856_v30 = vsel %vm664_vm1, %v851_v48, %v855_v59  ;;  %v1873_v22 = vshll.u32 %v5894_v49, 16  ;;  %v1871_v21 = vshrl.u32 %v5894_v49, 16  ;;  %v5958_v32 = vcombine.low %v5638_v52, %v8044_v3  ;;  %v8130_v3 = vld [vmem:[%s11546_s0 + $0xd4] ss:$0 sps:$4 sm:$0x11]  }
  0xe1   :  { %3122 = vrot.lane.b32.xlu0 %v2869_v62, %s6688_s21  ;;  %v8124_v62 = vcombine.low %v5685_v2, %v8104_v19  ;;  %v2276_v17 = vrot.slane %v5957_v16, 1 }
  0xe2   :  { %v8065_v57 = vpop.permute.xlu1 %1544  ;;  %v1875_v0 = vrot.slane %v1873_v22, 1  ;;  %v2279_v59 = vrot.slane %v5958_v32, 1 }
  0xe3   :  { %v8070_v13 = vpop.permute.xlu0 %1542  ;;  %v2897_v60 = vshll.u32 %v8124_v62, 16 }
  0xe4   :  { %1077 = vrot.lane.b32.xlu1 %v844_v28, %s6684_s28  ;;  %v1876_v25 = vor.u32 %v1875_v0, %v1871_v21  ;;  %v8143_v28 = vld [vmem:[%s11546_s0 + $0xdc] sm:$0xf] }
  0xe5   :  { %3378 = vrot.lane.b32.xlu0 %v3296_v29, %s6689_s22  ;;  %v1868_v29 = vrot.slane %v1866_v45, 1 }
  0xe6   :  { %v8087_v36 = vpop.permute.xlu1 %2088 }
  0xe7   :  { %v2087_v20 = vpop.permute.xlu0 %2086 }
  0xe8   :  { %1079 = vrot.lane.b32.xlu1 %v856_v30, %s6684_s28 }
  0xe9   :  { %3380 = vrot.lane.b32.xlu0 %v3299_v33, %s6689_s22 }
  0xea   :  { %v8108_v4 = vpop.permute.xlu1 %2344 }
  0xeb   :  { %v2343_v5 = vpop.permute.xlu0 %2342 }
  0xec   :  { %1336 = vrot.lane.b32.xlu1 %v1257_v38, %s6683_s16 }
  0xed   :  { %1334 = vrot.lane.b32.xlu0 %v1254_v34, %s6683_s16 }
  0xee   :  { %v8132_v7 = vpop.permute.xlu1 %2568 }
  0xef   :  { %v2567_v48 = vpop.permute.xlu0 %2566 }
  0xf0   :  { %1560 = vrot.lane.b32.xlu1 %v5894_v49, %s6682_s25 }
  0xf1   :  { %9 = vsyncpa [#allocation3], 0  ;;  %v3432_v12 = vsel %vm3418_vm4, %v7102_v18, %v7990_v37  ;;  %1558 = vrot.lane.b32.xlu0 %v5893_v63, %s6682_s25  ;;  %v1881_v30 = vsel %vm664_vm1, %v1876_v25, %v1880_v23  ;;  %v8157_v47 = vld [vmem:[%s11546_s0 + $0xc8] ss:$0 sps:$4 sm:$0x11]   ;;  %v8160_v49 = vcombine.low %v5463_v14, %v8143_v28  ;;  %v1869_v22 = vsel %vm664_vm1, %v1864_v39, %v1868_v29 }
  0xf2   :  { %v3497_v26 = vsel %vm3483_vm5, %v3432_v12, %v8046_v31  ;;  %v3113_v35 = vpop.permute.xlu1 %3112  ;;  %v2885_v18 = vshll.u32 %v8135_v15, 16  ;;  %v5465_v37 = vld [vmem:[%s11546_s0 + $0xe4] sm:$0xf]  ;;  %v8172_v63 = vld [vmem:[%s11546_s0 + $0xe8] sm:$0xf]  ;;  %v2281_v31 = vsel %vm1209_vm0, %v2279_v59, %v2280_v6  ;;  %v2895_v53 = vshrl.u32 %v8124_v62, 16 }
  0xf3   :  { %v3562_v33 = vsel %vm3548_vm6, %v3497_v26, %v8070_v13  ;;  %v3111_v61 = vpop.permute.xlu0 %3110  ;;  %v2902_v52 = vshll.u32 %v8130_v3, 16  ;;  %v8182_v43 = vld [vmem:[%s11546_s0 + $0xe0] ss:$0 sps:$4 sm:$0x11]   ;;  %v2278_v1 = vsel %vm1209_vm0, %v2276_v17, %v2277_v41  ;;  %v2899_v38 = vrot.slane %v2897_v60, 1 }
  0xf4   :  { %v3627_v2 = vsel %vm3613_vm7, %v3562_v33, %v2087_v20  ;;  %2104 = vrot.lane.b32.xlu1 %v1881_v30, %s6685_s15  ;;  %v2883_v13 = vshrl.u32 %v8135_v15, 16  ;;  %v3434_v21 = vsel %vm3418_vm4, %v7130_v46, %v8015_v56  ;;  %v860_v34 = vshll.u32 %v8160_v49, 16  ;;  %v5765_v20 = vld [vmem:[%s11546_s0 + $0xc0] sm:$0xe]  ;;  %v5766_v26 = vld [vmem:[%s11546_s0 + $0xcc] sm:$0xe] }
  0xf5   :  { %v3692_v0 = vsel %vm3678_vm8, %v3627_v2, %v2343_v5  ;;  %2102 = vrot.lane.b32.xlu0 %v1869_v22, %s6685_s15  ;;  %v8198_v10 = vcombine.low %v5465_v37, %v8172_v63  ;;  %v3499_v44 = vsel %vm3483_vm5, %v3434_v21, %v8034_v50  ;;  %v2887_v46 = vrot.slane %v2885_v18, 1  ;;  %v8257_v2 = vld [vmem:[%s11546_s0 + $0xf4] sm:$0xf] }
  0xf6   :  { %v3757_v45 = vsel %vm3743_vm9, %v3692_v0, %v2567_v48  ;;  %v8203_v32 = vpop.permute.xlu1 %1065  ;;  %v2890_v56 = vshll.u32 %v8157_v47, 16  ;;  %v3564_v5 = vsel %vm3548_vm6, %v3499_v44, %v8065_v57  ;;  %v2904_v25 = vrot.slane %v2902_v52, 1  ;;  %v8218_v57 = vld [vmem:[%s11546_s0 + $0xec] ss:$0 sps:$4 sm:$0x11]  }
  0xf7   :  { %v3822_v40 = vsel %vm3808_vm10, %v3757_v45, %v3111_v61  ;;  %v3367_v16 = vpop.permute.xlu0 %3366  ;;  %v865_v23 = vshll.u32 %v8182_v43, 16  ;;  %v3629_v39 = vsel %vm3613_vm7, %v3564_v5, %v8087_v36  ;;  %v2900_v29 = vor.u32 %v2899_v38, %v2895_v53  ;;  %v5511_v38 = vld [vmem:[%s11546_s0 + $0xd8] sm:$0xe] }
  0xf8   :  { %v3887_v50 = vsel %vm3873_vm11, %v3822_v40, %v3367_v16  ;;  %2360 = vrot.lane.b32.xlu1 %v2281_v31, %s6686_s26  ;;  %v6053_v14 = vcombine.low %v5765_v20, %v8119_v42  ;;  %v3694_v48 = vsel %vm3678_vm8, %v3629_v39, %v8108_v4  ;;  %v858_v36 = vshrl.u32 %v8160_v49, 16 }
  0xf9   :  { %2358 = vrot.lane.b32.xlu0 %v2278_v1, %s6686_s26  ;;  %6299 = vmatprep.mubr.msk.bf16.mxu0 %vm4159_vm12, %v3887_v50  ;;  %v862_v59 = vrot.slane %v860_v34, 1  ;;  %v872_v6 = vshll.u32 %v8198_v10, 16  ;;  %v3759_v42 = vsel %vm3743_vm9, %v3694_v48, %v8132_v7  ;;  %v2888_v41 = vor.u32 %v2887_v46, %v2883_v13  ;;  %v8270_v13 = vld [vmem:[%s11546_s0 + $0xe8] sm:$0xf] }
  0xfa   :  { %v8228_v17 = vpop.permute.xlu1 %1067  ;;  %v2892_v60 = vrot.slane %v2890_v56, 1  ;;  %v3824_v12 = vsel %vm3808_vm10, %v3759_v42, %v3113_v35  ;;  %v867_v4 = vrot.slane %v865_v23, 1  ;;  %v3300_v18 = vrot.slane %v6053_v14, 1  ;;  %v8292_v50 = vld [vmem:[%s11546_s0 + $0xf8] ss:$0 sps:$4 sm:$0x11]  }
  0xfb   :  { %v3369_v30 = vpop.permute.xlu0 %3368  ;;  %v3301_v7 = vrot.slane %v8157_v47, 1  ;;  %v877_v37 = vshll.u32 %v8218_v57, 16  ;;  %v2905_v35 = vsel %vm664_vm1, %v2900_v29, %v2904_v25  ;;  %v863_v33 = vor.u32 %v862_v59, %v858_v36  ;;  %v5512_v47 = vld [vmem:[%s11546_s0 + $0xe4] sm:$0xe] }
  0xfc   :  { %v3889_v22 = vsel %vm3873_vm11, %v3824_v12, %v3369_v30  ;;  %2584 = vrot.lane.b32.xlu1 %v8124_v62, %s6687_s6  ;;  %v870_v61 = vshrl.u32 %v8198_v10, 16  ;;  %v874_v31 = vrot.slane %v872_v6, 1  ;;  %v2893_v62 = vsel %vm664_vm1, %v2888_v41, %v2892_v60  ;;  %v6521_v36 = vld [vmem:[%s11546_s0 + $0xec] ss:$0 sps:$4 sm:$0x11]  }
  0xfd   :  { %2582 = vrot.lane.b32.xlu0 %v8135_v15, %s6687_s6  ;;  %6300 = vmatmul.mubr.msk.bf16.gmra.mrb[12].mxu0 %vm4159_vm12, %v3889_v22  ;;  %v6054_v52 = vcombine.low %v5766_v26, %v8104_v19  ;;  %v5561_v15 = vld [vmem:[%s11546_s0 + $0xf0] sm:$0xf]  ;;  %v5559_v19 = vld [vmem:[%s11546_s0 + $0xe4] sm:$0xf]  ;;  %v3302_v21 = vsel %vm1209_vm0, %v3300_v18, %v3301_v7  ;;  %v879_v0 = vrot.slane %v877_v37, 1  ;;  %v868_v34 = vsel %vm664_vm1, %v863_v33, %v867_v4 }
  0xfe   :  { %v8244_v53 = vpop.permute.xlu1 %1324  ;;  %v875_v20 = vor.u32 %v874_v31, %v870_v61  ;;  %v5864_v44 = vcombine.low %v5512_v47, %v8172_v63  ;;  %v5896_v45 = vcombine.low %v5561_v15, %v8257_v2  ;;  %v3304_v5 = vrot.slane %v8130_v3, 1  ;;  %v5639_v42 = vld [vmem:[%s11546_s0 + $0xe4] sm:$0xe]  ;;  %v8317_v4 = vld [vmem:[%s11546_s0 + $0x100] sm:$0xf] }
  0xff   :  { %v8259_v1 = vpop.permute.xlu0 %1322  ;;  %v3303_v56 = vrot.slane %v6054_v52, 1  ;;  %v5863_v40 = vcombine.low %v5511_v38, %v8143_v28  ;;  %v5895_v16 = vcombine.low %v5559_v19, %v8270_v13  ;;  %v1262_v39 = vrot.slane %v8218_v57, 1  ;;  %v5640_v57 = vld [vmem:[%s11546_s0 + $0xf0] sm:$0xe] }
 0x100   :  { %3128 = vrot.lane.b32.xlu1 %v2905_v35, %s6688_s21  ;;  %v880_v23 = vsel %vm664_vm1, %v875_v20, %v879_v0  ;;  %v1261_v63 = vrot.slane %v5864_v44, 1  ;;  %v1897_v3 = vshll.u32 %v5896_v45, 16  ;;  %v1259_v48 = vrot.slane %v8182_v43, 1  ;;  %v5689_v43 = vld [vmem:[%s11546_s0 + $0xfc] sm:$0xf] }
 0x101   :  { %3126 = vrot.lane.b32.xlu0 %v2893_v62, %s6688_s21  ;;  %v3305_v29 = vsel %vm1209_vm0, %v3303_v56, %v3304_v5  ;;  %v1258_v14 = vrot.slane %v5863_v40, 1  ;;  %v1885_v59 = vshll.u32 %v5895_v16, 16  ;;  %v1895_v60 = vshrl.u32 %v5896_v45, 16  ;;  %v5687_v31 = vld [vmem:[%s11546_s0 + $0xf0] sm:$0xf] }
 0x102   :  { %v8278_v46 = vpop.permute.xlu1 %1548  ;;  %v1263_v41 = vsel %vm1209_vm0, %v1261_v63, %v1262_v39  ;;  %v1899_v12 = vrot.slane %v1897_v3, 1  ;;  %v1902_v30 = vshll.u32 %v8292_v50, 16  ;;  %v1883_v18 = vshrl.u32 %v5895_v16, 16  ;;  %v8330_v62 = vld [vmem:[%s11546_s0 + $0xf4] sm:$0xf] }
 0x103   :  { %v8283_v25 = vpop.permute.xlu0 %1546  ;;  %v1260_v22 = vsel %vm1209_vm0, %v1258_v14, %v1259_v48  ;;  %v1887_v7 = vrot.slane %v1885_v59, 1  ;;  %v1890_v37 = vshll.u32 %v6521_v36, 16  ;;  %v5960_v33 = vcombine.low %v5640_v57, %v8257_v2  ;;  %v8340_v2 = vld [vmem:[%s11546_s0 + $0x104] ss:$0 sps:$4 sm:$0x11]  }
 0x104   :  { %1081 = vrot.lane.b32.xlu1 %v868_v34, %s6684_s28  ;;  %v5959_v61 = vcombine.low %v5639_v42, %v8270_v13  ;;  %v8334_v52 = vcombine.low %v5689_v43, %v8317_v4  ;;  %v1900_v47 = vor.u32 %v1899_v12, %v1895_v60  ;;  %v1904_v15 = vrot.slane %v1902_v30, 1  ;;  %v5467_v0 = vld [vmem:[%s11546_s0 + $0xf0] sm:$0xf]  ;;  %v8353_v34 = vld [vmem:[%s11546_s0 + $0xf4] sm:$0xf] }
 0x105   :  { %3382 = vrot.lane.b32.xlu0 %v3302_v21, %s6689_s22  ;;  %v1888_v19 = vor.u32 %v1887_v7, %v1883_v18  ;;  %v1892_v13 = vrot.slane %v1890_v37, 1  ;;  %v8345_v21 = vcombine.low %v5687_v31, %v8330_v62  ;;  %v2285_v44 = vrot.slane %v5960_v33, 1  ;;  %v8366_v3 = vld [vmem:[%s11546_s0 + $0xf8] ss:$0 sps:$4 sm:$0x11]  }
 0x106   :  { %v8294_v28 = vpop.permute.xlu1 %2092  ;;  %v2286_v56 = vrot.slane %v8292_v50, 1  ;;  %v2282_v5 = vrot.slane %v5959_v61, 1  ;;  %v2283_v40 = vrot.slane %v6521_v36, 1  ;;  %v3436_v63 = vsel %vm3418_vm4, %v7332_v58, %v8203_v32  ;;  %v5469_v32 = vld [vmem:[%s11546_s0 + $0xfc] sm:$0xf] }
 0x107   :  { %v2091_v6 = vpop.permute.xlu0 %2090  ;;  %v1905_v39 = vsel %vm664_vm1, %v1900_v47, %v1904_v15  ;;  %v8369_v50 = vcombine.low %v5467_v0, %v8353_v34  ;;  %v1893_v14 = vsel %vm664_vm1, %v1888_v19, %v1892_v13  ;;  %v2909_v58 = vshll.u32 %v8345_v21, 16  ;;  %v8391_v42 = vld [vmem:[%s11546_s0 + $0xf8] ss:$0 sps:$4 sm:$0x11]  }
 0x108   :  { %1083 = vrot.lane.b32.xlu1 %v880_v23, %s6684_s28  ;;  %v2921_v23 = vshll.u32 %v8334_v52, 16  ;;  %v2284_v59 = vsel %vm1209_vm0, %v2282_v5, %v2283_v40  ;;  %v2926_v57 = vshll.u32 %v8340_v2, 16  ;;  %v3438_v12 = vsel %vm3418_vm4, %v7358_v24, %v8228_v17 }
 0x109   :  { %3384 = vrot.lane.b32.xlu0 %v3305_v29, %s6689_s22  ;;  %v3503_v7 = vsel %vm3483_vm5, %v3438_v12, %v8244_v53  ;;  %v2911_v24 = vrot.slane %v2909_v58, 1  ;;  %v2914_v17 = vshll.u32 %v8366_v3, 16  ;;  %v889_v15 = vshll.u32 %v8391_v42, 16 }
 0x10a   :  { %v8319_v26 = vpop.permute.xlu1 %2348  ;;  %v2923_v60 = vrot.slane %v2921_v23, 1  ;;  %v2928_v47 = vrot.slane %v2926_v57, 1  ;;  %v5514_v57 = vld [vmem:[%s11546_s0 + $0xfc] sm:$0xe]  ;;  %vm4520_vm13 = vcmask 523264   ;;  %vm5382_vm14 = vcmask 519168  }
 0x10b   :  { %v2347_v35 = vpop.permute.xlu0 %2346  ;;  %v2916_v23 = vrot.slane %v2914_v17, 1  ;;  %v891_v58 = vrot.slane %v889_v15, 1 }
 0x10c   :  { %1340 = vrot.lane.b32.xlu1 %v1263_v41, %s6683_s16  ;;  %v2919_v41 = vshrl.u32 %v8334_v52, 16 }
 0x10d   :  { %1338 = vrot.lane.b32.xlu0 %v1260_v22, %s6683_s16  ;;  %v884_v22 = vshll.u32 %v8369_v50, 16 }
 0x10e   :  { %v8342_v38 = vpop.permute.xlu1 %2572  ;;  %v2924_v13 = vor.u32 %v2923_v60, %v2919_v41  ;;  %v5513_v60 = vld [vmem:[%s11546_s0 + $0xf0] sm:$0xe] }
 0x10f   :  { %v2571_v20 = vpop.permute.xlu0 %2570 }
 0x110   :  { %1564 = vrot.lane.b32.xlu1 %v5896_v45, %s6682_s25  ;;  %v3501_v45 = vsel %vm3483_vm5, %v3436_v63, %v8259_v1  ;;  %v2287_v1 = vsel %vm1209_vm0, %v2285_v44, %v2286_v56  ;;  %v886_v44 = vrot.slane %v884_v22, 1 }
 0x111   :  { %1562 = vrot.lane.b32.xlu0 %v5895_v16, %s6682_s25  ;;  %v8381_v16 = vld [vmem:[%s11546_s0 + $0x100] sm:$0xf]  ;;  %v3566_v48 = vsel %vm3548_vm6, %v3501_v45, %v8283_v25  ;;  %v2907_v25 = vshrl.u32 %v8345_v21, 16  ;;  %v5768_v45 = vld [vmem:[%s11546_s0 + $0xfc] sm:$0xe] }
 0x112   :  { %v3117_v29 = vpop.permute.xlu1 %3116  ;;  %v3631_v43 = vsel %vm3613_vm7, %v3566_v48, %v2091_v6  ;;  %v5767_v6 = vld [vmem:[%s11546_s0 + $0xf0] sm:$0xe]  ;;  %v8407_v18 = vcombine.low %v5469_v32, %v8381_v16 }
 0x113   :  { %v3115_v36 = vpop.permute.xlu0 %3114  ;;  %v3696_v30 = vsel %vm3678_vm8, %v3631_v43, %v2347_v35  ;;  %v3568_v35 = vsel %vm3548_vm6, %v3503_v7, %v8278_v46  ;;  %v6055_v0 = vcombine.low %v5767_v6, %v8330_v62  ;;  %v8427_v46 = vld [vmem:[%s11546_s0 + $0x104] ss:$0 sps:$4 sm:$0x11]   ;;  %v2912_v40 = vor.u32 %v2911_v24, %v2907_v25  ;;  %v8466_v43 = vld [vmem:[%s11546_s0 + $0x10c] sm:$0xf] }
 0x114   :  { %2108 = vrot.lane.b32.xlu1 %v1905_v39, %s6685_s15  ;;  %v3761_v37 = vsel %vm3743_vm9, %v3696_v30, %v2571_v20  ;;  %v3633_v19 = vsel %vm3613_vm7, %v3568_v35, %v8294_v28  ;;  %v882_v28 = vshrl.u32 %v8369_v50, 16  ;;  %v896_v56 = vshll.u32 %v8407_v18, 16  ;;  %v8479_v25 = vld [vmem:[%s11546_s0 + $0x100] sm:$0xf] }
 0x115   :  { %2106 = vrot.lane.b32.xlu0 %v1893_v14, %s6685_s15  ;;  %v3826_v61 = vsel %vm3808_vm10, %v3761_v37, %v3115_v36  ;;  %v3698_v20 = vsel %vm3678_vm8, %v3633_v19, %v8319_v26  ;;  %v3307_v26 = vrot.slane %v8366_v3, 1  ;;  %v901_v32 = vshll.u32 %v8427_v46, 16 }
 0x116   :  { %v8412_v33 = vpop.permute.xlu1 %1069  ;;  %v3763_v62 = vsel %vm3743_vm9, %v3698_v20, %v8342_v38  ;;  %v3306_v38 = vrot.slane %v6055_v0, 1  ;;  %v2929_v3 = vsel %vm664_vm1, %v2924_v13, %v2928_v47  ;;  %v894_v48 = vshrl.u32 %v8407_v18, 16 }
 0x117   :  { %v3371_v31 = vpop.permute.xlu0 %3370  ;;  %v3828_v63 = vsel %vm3808_vm10, %v3763_v62, %v3117_v29  ;;  %v887_v29 = vor.u32 %v886_v44, %v882_v28  ;;  %v898_v36 = vrot.slane %v896_v56, 1  ;;  %v903_v30 = vrot.slane %v901_v32, 1  ;;  %v8510_v28 = vld [vmem:[%s11546_s0 + $0x104] ss:$0 sps:$4 sm:$0x11]  }
 0x118   :  { %v3891_v53 = vsel %vm3873_vm11, %v3826_v61, %v3371_v31  ;;  %2364 = vrot.lane.b32.xlu1 %v2287_v1, %s6686_s26  ;;  %v3308_v12 = vsel %vm1209_vm0, %v3306_v38, %v3307_v26  ;;  %v5866_v7 = vcombine.low %v5514_v57, %v8381_v16  ;;  %v3310_v35 = vrot.slane %v8340_v2, 1  ;;  %v5642_v56 = vld [vmem:[%s11546_s0 + $0x108] sm:$0xe]  ;;  %v5641_v62 = vld [vmem:[%s11546_s0 + $0xfc] sm:$0xe] }
 0x119   :  { %2362 = vrot.lane.b32.xlu0 %v2284_v59, %s6686_s26  ;;  %6303 = vmatprep.mubr.msk.bf16.mxu0 %vm4159_vm12, %v3891_v53  ;;  %v2917_v59 = vsel %vm664_vm1, %v2912_v40, %v2916_v23  ;;  %v892_v22 = vsel %vm664_vm1, %v887_v29, %v891_v58  ;;  %v899_v6 = vor.u32 %v898_v36, %v894_v48  ;;  %v1268_v19 = vrot.slane %v8427_v46, 1  ;;  %v8501_v53 = vld [vmem:[%s11546_s0 + $0x110] ss:$0 sps:$4 sm:$0x11]   ;;  %v8528_v26 = vld [vmem:[%s11546_s0 + $0x118] sm:$0xf] }
 0x11a   :  { %v8437_v5 = vpop.permute.xlu1 %1071  ;;  %v5865_v61 = vcombine.low %v5513_v60, %v8353_v34  ;;  %v1267_v16 = vrot.slane %v5866_v7, 1  ;;  %v1265_v20 = vrot.slane %v8391_v42, 1  ;;  %v5693_v42 = vld [vmem:[%s11546_s0 + $0x114] sm:$0xf]  ;;  %v1914_v32 = vshll.u32 %v8510_v28, 16 }
 0x11b   :  { %v3373_v39 = vpop.permute.xlu0 %3372  ;;  %v904_v15 = vsel %vm664_vm1, %v899_v6, %v903_v30  ;;  %v5962_v29 = vcombine.low %v5642_v56, %v8466_v43  ;;  %v5691_v48 = vld [vmem:[%s11546_s0 + $0x108] sm:$0xf]  ;;  %v8541_v36 = vld [vmem:[%s11546_s0 + $0x10c] sm:$0xf] }
 0x11c   :  { %v3893_v14 = vsel %vm3873_vm11, %v3828_v63, %v3373_v39  ;;  %2588 = vrot.lane.b32.xlu1 %v8334_v52, %s6687_s6  ;;  %v6056_v52 = vcombine.low %v5768_v45, %v8317_v4  ;;  %v5563_v4 = vld [vmem:[%s11546_s0 + $0xfc] sm:$0xf]  ;;  %v1264_v0 = vrot.slane %v5865_v61, 1  ;;  %v1269_v40 = vsel %vm1209_vm0, %v1267_v16, %v1268_v19 }
 0x11d   :  { %2586 = vrot.lane.b32.xlu0 %v8345_v21, %s6687_s6  ;;  %6304 = vmatmul.mubr.msk.bf16.gmra.mrb[16].mxu0 %vm4159_vm12, %v3893_v14  ;;  %v5565_v21 = vld [vmem:[%s11546_s0 + $0x108] sm:$0xf]  ;;  %v5897_v31 = vcombine.low %v5563_v4, %v8479_v25  ;;  %v1926_v39 = vshll.u32 %v8501_v53, 16  ;;  %v8557_v30 = vcombine.low %v5691_v48, %v8541_v36  ;;  %v2291_v7 = vrot.slane %v5962_v29, 1 }
 0x11e   :  { %v8453_v1 = vpop.permute.xlu1 %1328  ;;  %v5898_v37 = vcombine.low %v5565_v21, %v8466_v43  ;;  %v3309_v17 = vrot.slane %v6056_v52, 1  ;;  %v1266_v14 = vsel %vm1209_vm0, %v1264_v0, %v1265_v20  ;;  %v8546_v52 = vcombine.low %v5693_v42, %v8528_v26  ;;  %v8552_v43 = vld [vmem:[%s11546_s0 + $0x11c] ss:$0 sps:$4 sm:$0x11]  }
 0x11f   :  { %v8468_v41 = vpop.permute.xlu0 %1326  ;;  %v1909_v44 = vshll.u32 %v5897_v31, 16  ;;  %v1907_v58 = vshrl.u32 %v5897_v31, 16  ;;  %v1928_v21 = vrot.slane %v1926_v39, 1  ;;  %v3440_v19 = vsel %vm3418_vm4, %v7529_v54, %v8412_v33  ;;  %v8594_v54 = vld [vmem:[%s11546_s0 + $0x118] sm:$0xf] }
 0x120   :  { %3132 = vrot.lane.b32.xlu1 %v2929_v3, %s6688_s21  ;;  %v1921_v2 = vshll.u32 %v5898_v37, 16  ;;  %v3311_v13 = vsel %vm1209_vm0, %v3309_v17, %v3310_v35  ;;  %v1919_v23 = vshrl.u32 %v5898_v37, 16  ;;  %v2292_v17 = vrot.slane %v8501_v53, 1  ;;  %v8571_v35 = vld [vmem:[%s11546_s0 + $0x110] ss:$0 sps:$4 sm:$0x11]  }
 0x121   :  { %3130 = vrot.lane.b32.xlu0 %v2917_v59, %s6688_s21  ;;  %v1911_v38 = vrot.slane %v1909_v44, 1  ;;  %v5961_v59 = vcombine.low %v5641_v62, %v8479_v25  ;;  %v5471_v25 = vld [vmem:[%s11546_s0 + $0x108] sm:$0xf]  ;;  %v2945_v16 = vshll.u32 %v8546_v52, 16  ;;  %v2933_v20 = vshll.u32 %v8557_v30, 16 }
 0x122   :  { %v8487_v24 = vpop.permute.xlu1 %1552  ;;  %v1923_v63 = vrot.slane %v1921_v2, 1  ;;  %v2950_v44 = vshll.u32 %v8552_v43, 16  ;;  %v2938_v56 = vshll.u32 %v8571_v35, 16  ;;  %v8604_v62 = vld [vmem:[%s11546_s0 + $0x110] ss:$0 sps:$4 sm:$0x11]  }
 0x123   :  { %v8492_v47 = vpop.permute.xlu0 %1550  ;;  %v1912_v4 = vor.u32 %v1911_v38, %v1907_v58  ;;  %v2288_v61 = vrot.slane %v5961_v59, 1 }
 0x124   :  { %1085 = vrot.lane.b32.xlu1 %v892_v22, %s6684_s28  ;;  %v1924_v57 = vor.u32 %v1923_v63, %v1919_v23  ;;  %v8565_v22 = vld [vmem:[%s11546_s0 + $0x10c] sm:$0xf]  ;;  %v2947_v23 = vrot.slane %v2945_v16, 1  ;;  %v3442_v63 = vsel %vm3418_vm4, %v7566_v55, %v8437_v5  ;;  %v2931_v55 = vshrl.u32 %v8557_v30, 16 }
 0x125   :  { %3386 = vrot.lane.b32.xlu0 %v3308_v12, %s6689_s22  ;;  %v1916_v12 = vrot.slane %v1914_v32, 1  ;;  %v8582_v2 = vcombine.low %v5471_v25, %v8565_v22  ;;  %v3507_v38 = vsel %vm3483_vm5, %v3442_v63, %v8453_v1  ;;  %v2935_v5 = vrot.slane %v2933_v20, 1 }
 0x126   :  { %v8503_v34 = vpop.permute.xlu1 %2096  ;;  %v1929_v53 = vsel %vm664_vm1, %v1924_v57, %v1928_v21  ;;  %v2952_v57 = vrot.slane %v2950_v44, 1  ;;  %v913_v21 = vshll.u32 %v8604_v62, 16  ;;  %v2940_v16 = vrot.slane %v2938_v56, 1  ;;  %v5516_v56 = vld [vmem:[%s11546_s0 + $0x114] sm:$0xe] }
 0x127   :  { %v2095_v46 = vpop.permute.xlu0 %2094  ;;  %v1917_v0 = vsel %vm664_vm1, %v1912_v4, %v1916_v12  ;;  %v906_v12 = vshrl.u32 %v8582_v2, 16 }
 0x128   :  { %1087 = vrot.lane.b32.xlu1 %v904_v15, %s6684_s28  ;;  %v2289_v15 = vrot.slane %v8510_v28, 1  ;;  %v5473_v28 = vld [vmem:[%s11546_s0 + $0x114] sm:$0xf]  ;;  %v915_v20 = vrot.slane %v913_v21, 1 }
 0x129   :  { %3388 = vrot.lane.b32.xlu0 %v3311_v13, %s6689_s22  ;;  %v3505_v13 = vsel %vm3483_vm5, %v3440_v19, %v8468_v41  ;;  %v2293_v41 = vsel %vm1209_vm0, %v2291_v7, %v2292_v17  ;;  %v8620_v58 = vcombine.low %v5473_v28, %v8594_v54 }
 0x12a   :  { %v8530_v45 = vpop.permute.xlu1 %2352  ;;  %v3570_v33 = vsel %vm3548_vm6, %v3505_v13, %v8492_v47  ;;  %v2943_v47 = vshrl.u32 %v8546_v52, 16  ;;  %v5770_v13 = vld [vmem:[%s11546_s0 + $0x114] sm:$0xe] }
 0x12b   :  { %v2351_v3 = vpop.permute.xlu0 %2350  ;;  %v3635_v42 = vsel %vm3613_vm7, %v3570_v33, %v2095_v46  ;;  %v5769_v46 = vld [vmem:[%s11546_s0 + $0x108] sm:$0xe]  ;;  %v920_v17 = vshll.u32 %v8620_v58, 16  ;;  %v918_v33 = vshrl.u32 %v8620_v58, 16 }
 0x12c   :  { %1344 = vrot.lane.b32.xlu1 %v1269_v40, %s6683_s16  ;;  %v2290_v40 = vsel %vm1209_vm0, %v2288_v61, %v2289_v15  ;;  %v3700_v39 = vsel %vm3678_vm8, %v3635_v42, %v2351_v3  ;;  %v3572_v3 = vsel %vm3548_vm6, %v3507_v38, %v8487_v24  ;;  %v6057_v25 = vcombine.low %v5769_v46, %v8541_v36  ;;  %v8641_v24 = vld [vmem:[%s11546_s0 + $0x11c] ss:$0 sps:$4 sm:$0x11]   ;;  %v8679_v42 = vld [vmem:[%s11546_s0 + $0x124] sm:$0xf] }
 0x12d   :  { %1342 = vrot.lane.b32.xlu0 %v1266_v14, %s6683_s16  ;;  %v908_v14 = vshll.u32 %v8582_v2, 16  ;;  %v3637_v4 = vsel %vm3613_vm7, %v3572_v3, %v8503_v34  ;;  %v2948_v34 = vor.u32 %v2947_v23, %v2943_v47  ;;  %v2936_v15 = vor.u32 %v2935_v5, %v2931_v55  ;;  %v5515_v47 = vld [vmem:[%s11546_s0 + $0x108] sm:$0xe]  ;;  %v8692_v23 = vld [vmem:[%s11546_s0 + $0x118] sm:$0xf] }
 0x12e   :  { %v8554_v60 = vpop.permute.xlu1 %2576  ;;  %v925_v28 = vshll.u32 %v8641_v24, 16  ;;  %v5868_v38 = vcombine.low %v5516_v56, %v8594_v54  ;;  %v3316_v3 = vrot.slane %v8552_v43, 1 }
 0x12f   :  { %v2575_v6 = vpop.permute.xlu0 %2574  ;;  %v910_v7 = vrot.slane %v908_v14, 1  ;;  %v2941_v44 = vsel %vm664_vm1, %v2936_v15, %v2940_v16 }
 0x130   :  { %1568 = vrot.lane.b32.xlu1 %v5898_v37, %s6682_s25  ;;  %v3765_v32 = vsel %vm3743_vm9, %v3700_v39, %v2575_v6  ;;  %v3702_v6 = vsel %vm3678_vm8, %v3637_v4, %v8530_v45  ;;  %v3313_v45 = vrot.slane %v8571_v35, 1  ;;  %v2953_v35 = vsel %vm664_vm1, %v2948_v34, %v2952_v57  ;;  %v6557_v34 = vld [vmem:[%s11546_s0 + $0x11c] ss:$0 sps:$4 sm:$0x11]  }
 0x131   :  { %1566 = vrot.lane.b32.xlu0 %v5897_v31, %s6682_s25  ;;  %v3767_v61 = vsel %vm3743_vm9, %v3702_v6, %v8554_v60  ;;  %v3312_v60 = vrot.slane %v6057_v25, 1  ;;  %v927_v39 = vrot.slane %v925_v28, 1  ;;  %v1273_v54 = vrot.slane %v5868_v38, 1 }
 0x132   :  { %v3121_v37 = vpop.permute.xlu1 %3120  ;;  %v1274_v4 = vrot.slane %v8641_v24, 1  ;;  %v1271_v6 = vrot.slane %v8604_v62, 1  ;;  %v5644_v24 = vld [vmem:[%s11546_s0 + $0x120] sm:$0xe]  ;;  %v5697_v62 = vld [vmem:[%s11546_s0 + $0x12c] sm:$0xf] }
 0x133   :  { %v3119_v31 = vpop.permute.xlu0 %3118  ;;  %v3832_v19 = vsel %vm3808_vm10, %v3767_v61, %v3121_v37  ;;  %v911_v37 = vor.u32 %v910_v7, %v906_v12  ;;  %v3314_v63 = vsel %vm1209_vm0, %v3312_v60, %v3313_v45  ;;  %v5643_v61 = vld [vmem:[%s11546_s0 + $0x114] sm:$0xe]  ;;  %v8739_v45 = vld [vmem:[%s11546_s0 + $0x130] sm:$0xf]  ;;  %v1938_v28 = vshll.u32 %v6557_v34, 16 }
 0x134   :  { %2112 = vrot.lane.b32.xlu1 %v1929_v53, %s6685_s15  ;;  %v3830_v48 = vsel %vm3808_vm10, %v3765_v32, %v3119_v31  ;;  %v922_v31 = vrot.slane %v920_v17, 1  ;;  %v1275_v15 = vsel %vm1209_vm0, %v1273_v54, %v1274_v4 }
 0x135   :  { %2110 = vrot.lane.b32.xlu0 %v1917_v0, %s6685_s15  ;;  %v916_v14 = vsel %vm664_vm1, %v911_v37, %v915_v20  ;;  %v5964_v37 = vcombine.low %v5644_v24, %v8679_v42 }
 0x136   :  { %v8625_v29 = vpop.permute.xlu1 %1073  ;;  %v923_v46 = vor.u32 %v922_v31, %v918_v33  ;;  %v5695_v33 = vld [vmem:[%s11546_s0 + $0x120] sm:$0xf]  ;;  %v8751_v31 = vld [vmem:[%s11546_s0 + $0x124] sm:$0xf] }
 0x137   :  { %v3375_v59 = vpop.permute.xlu0 %3374  ;;  %v3444_v54 = vsel %vm3418_vm4, %v7734_v8, %v8625_v29  ;;  %v5477_v29 = vld [vmem:[%s11546_s0 + $0x12c] sm:$0xf] }
 0x138   :  { %v3895_v1 = vsel %vm3873_vm11, %v3830_v48, %v3375_v59  ;;  %2368 = vrot.lane.b32.xlu1 %v2293_v41, %s6686_s26  ;;  %v5867_v48 = vcombine.low %v5515_v47, %v8565_v22  ;;  %v928_v21 = vsel %vm664_vm1, %v923_v46, %v927_v39  ;;  %v5475_v39 = vld [vmem:[%s11546_s0 + $0x120] sm:$0xf]  ;;  %v2297_v46 = vrot.slane %v5964_v37, 1 }
 0x139   :  { %2366 = vrot.lane.b32.xlu0 %v2290_v40, %s6686_s26  ;;  %6307 = vmatprep.mubr.msk.bf16.mxu0 %vm4159_vm12, %v3895_v1  ;;  %v8714_v1 = vld [vmem:[%s11546_s0 + $0x128] ss:$0 sps:$4 sm:$0x11]  }
 0x13a   :  { %v8650_v36 = vpop.permute.xlu1 %1075  ;;  %v1270_v25 = vrot.slane %v5867_v48, 1  ;;  %v2298_v38 = vrot.slane %v8714_v1, 1  ;;  %v2295_v48 = vrot.slane %v6557_v34, 1 }
 0x13b   :  { %v3377_v53 = vpop.permute.xlu0 %3376 }
 0x13c   :  { %v3897_v0 = vsel %vm3873_vm11, %v3832_v19, %v3377_v53  ;;  %2592 = vrot.lane.b32.xlu1 %v8546_v52, %s6687_s6  ;;  %v6058_v52 = vcombine.low %v5770_v13, %v8528_v26  ;;  %v5567_v26 = vld [vmem:[%s11546_s0 + $0x114] sm:$0xf]  ;;  %v1950_v53 = vshll.u32 %v8714_v1, 16  ;;  %v8788_v1 = vld [vmem:[%s11546_s0 + $0x128] ss:$0 sps:$4 sm:$0x11]  }
 0x13d   :  { %2590 = vrot.lane.b32.xlu0 %v8557_v30, %s6687_s6  ;;  %6308 = vmatmul.mubr.msk.bf16.gmra.mrb[20].mxu0 %vm4159_vm12, %v3897_v0  ;;  %v5569_v30 = vld [vmem:[%s11546_s0 + $0x120] sm:$0xf]  ;;  %v5899_v59 = vcombine.low %v5567_v26, %v8692_v23  ;;  %v1272_v0 = vsel %vm1209_vm0, %v1270_v25, %v1271_v6  ;;  %v1940_v26 = vrot.slane %v1938_v28, 1 }
 0x13e   :  { %v8666_v41 = vpop.permute.xlu1 %1332  ;;  %v5900_v32 = vcombine.low %v5569_v30, %v8679_v42  ;;  %v3315_v5 = vrot.slane %v6058_v52, 1  ;;  %v8756_v52 = vcombine.low %v5697_v62, %v8739_v45  ;;  %v1952_v30 = vrot.slane %v1950_v53, 1 }
 0x13f   :  { %v8681_v40 = vpop.permute.xlu0 %1330  ;;  %v1933_v7 = vshll.u32 %v5899_v59, 16  ;;  %v1931_v20 = vshrl.u32 %v5899_v59, 16 }
 0x140   :  { %3136 = vrot.lane.b32.xlu1 %v2953_v35, %s6688_s21  ;;  %v1945_v43 = vshll.u32 %v5900_v32, 16  ;;  %v3317_v12 = vsel %vm1209_vm0, %v3315_v5, %v3316_v3  ;;  %v1943_v16 = vshrl.u32 %v5900_v32, 16  ;;  %v8776_v5 = vld [vmem:[%s11546_s0 + $0x134] ss:$0 sps:$4 sm:$0x11]  }
 0x141   :  { %3134 = vrot.lane.b32.xlu0 %v2941_v44, %s6688_s21  ;;  %v1935_v60 = vrot.slane %v1933_v7, 1  ;;  %v5963_v44 = vcombine.low %v5643_v61, %v8692_v23  ;;  %v8770_v23 = vld [vmem:[%s11546_s0 + $0x124] sm:$0xf]  ;;  %v2967_v7 = vshrl.u32 %v8756_v52, 16  ;;  %v2974_v24 = vshll.u32 %v8776_v5, 16 }
 0x142   :  { %v8700_v55 = vpop.permute.xlu1 %1556  ;;  %v1947_v19 = vrot.slane %v1945_v43, 1  ;;  %v8791_v43 = vcombine.low %v5475_v39, %v8770_v23 }
 0x143   :  { %v8705_v57 = vpop.permute.xlu0 %1554  ;;  %v1936_v47 = vor.u32 %v1935_v60, %v1931_v20  ;;  %v2294_v3 = vrot.slane %v5963_v44, 1  ;;  %v2976_v44 = vrot.slane %v2974_v24, 1 }
 0x144   :  { %1089 = vrot.lane.b32.xlu1 %v916_v14, %s6684_s28  ;;  %v1948_v56 = vor.u32 %v1947_v19, %v1943_v16  ;;  %v3446_v19 = vsel %vm3418_vm4, %v7772_v9, %v8650_v36 }
 0x145   :  { %3390 = vrot.lane.b32.xlu0 %v3314_v63, %s6689_s22  ;;  %v8762_v63 = vcombine.low %v5695_v33, %v8751_v31  ;;  %v1941_v25 = vsel %vm664_vm1, %v1936_v47, %v1940_v26  ;;  %v2296_v62 = vsel %vm1209_vm0, %v2294_v3, %v2295_v48  ;;  %v3511_v20 = vsel %vm3483_vm5, %v3446_v19, %v8666_v41 }
 0x146   :  { %v8716_v22 = vpop.permute.xlu1 %2100  ;;  %v1953_v4 = vsel %vm664_vm1, %v1948_v56, %v1952_v30  ;;  %v2962_v33 = vshll.u32 %v8788_v1, 16  ;;  %v3576_v9 = vsel %vm3548_vm6, %v3511_v20, %v8700_v55  ;;  %v5771_v56 = vld [vmem:[%s11546_s0 + $0x120] sm:$0xe]  ;;  %v930_v47 = vshrl.u32 %v8791_v43, 16 }
 0x147   :  { %v2099_v17 = vpop.permute.xlu0 %2098  ;;  %v2957_v8 = vshll.u32 %v8762_v63, 16  ;;  %v2955_v16 = vshrl.u32 %v8762_v63, 16  ;;  %v3641_v41 = vsel %vm3613_vm7, %v3576_v9, %v8716_v22  ;;  %v8849_v55 = vld [vmem:[%s11546_s0 + $0x134] ss:$0 sps:$4 sm:$0x11]  }
 0x148   :  { %1091 = vrot.lane.b32.xlu1 %v928_v21, %s6684_s28  ;;  %v2969_v21 = vshll.u32 %v8756_v52, 16 }
 0x149   :  { %3392 = vrot.lane.b32.xlu0 %v3317_v12, %s6689_s22  ;;  %v2959_v37 = vrot.slane %v2957_v8, 1 }
 0x14a   :  { %v8741_v13 = vpop.permute.xlu1 %2356 }
 0x14b   :  { %v2355_v35 = vpop.permute.xlu0 %2354  ;;  %v3706_v39 = vsel %vm3678_vm8, %v3641_v41, %v8741_v13  ;;  %v2960_v48 = vor.u32 %v2959_v37, %v2955_v16  ;;  %v8896_v16 = vld [vmem:[%s11546_s0 + $0x130] sm:$0xf]  ;;  %v6574_v41 = vld [vmem:[%s11546_s0 + $0x140] ss:$0 sps:$4 sm:$0x11]  }
 0x14c   :  { %1348 = vrot.lane.b32.xlu1 %v1275_v15, %s6683_s16  ;;  %v2971_v15 = vrot.slane %v2969_v21, 1  ;;  %v2964_v21 = vrot.slane %v2962_v33, 1 }
 0x14d   :  { %1346 = vrot.lane.b32.xlu0 %v1272_v0, %s6683_s16 }
 0x14e   :  { %v8759_v42 = vpop.permute.xlu1 %2580  ;;  %v2972_v22 = vor.u32 %v2971_v15, %v2967_v7  ;;  %v2965_v24 = vsel %vm664_vm1, %v2960_v48, %v2964_v21  ;;  %v5571_v15 = vld [vmem:[%s11546_s0 + $0x12c] sm:$0xf] }
 0x14f   :  { %v2579_v14 = vpop.permute.xlu0 %2578  ;;  %v8911_v37 = vcombine.low %v5571_v15, %v8896_v16  ;;  %v5645_v48 = vld [vmem:[%s11546_s0 + $0x12c] sm:$0xe] }
 0x150   :  { %1572 = vrot.lane.b32.xlu1 %v5900_v32, %s6682_s25  ;;  %v3509_v32 = vsel %vm3483_vm5, %v3444_v54, %v8681_v40  ;;  %v2299_v40 = vsel %vm1209_vm0, %v2297_v46, %v2298_v38  ;;  %v3771_v38 = vsel %vm3743_vm9, %v3706_v39, %v8759_v42  ;;  %v6059_v54 = vcombine.low %v5771_v56, %v8751_v31  ;;  %v8875_v31 = vld [vmem:[%s11546_s0 + $0x13c] sm:$0xf]  ;;  %v5646_v39 = vld [vmem:[%s11546_s0 + $0x138] sm:$0xe] }
 0x151   :  { %1570 = vrot.lane.b32.xlu0 %v5899_v59, %s6682_s25  ;;  %v8803_v59 = vld [vmem:[%s11546_s0 + $0x130] sm:$0xf]  ;;  %v3574_v6 = vsel %vm3548_vm6, %v3509_v32, %v8705_v57  ;;  %v8817_v57 = vld [vmem:[%s11546_s0 + $0x128] ss:$0 sps:$4 sm:$0x11]   ;;  %v949_v42 = vshll.u32 %v8849_v55, 16 }
 0x152   :  { %v3125_v12 = vpop.permute.xlu1 %3124  ;;  %v3639_v61 = vsel %vm3613_vm7, %v3574_v6, %v2099_v17  ;;  %v932_v17 = vshll.u32 %v8791_v43, 16  ;;  %v8826_v0 = vcombine.low %v5477_v29, %v8803_v59  ;;  %v937_v26 = vshll.u32 %v8817_v57, 16  ;;  %v5772_v32 = vld [vmem:[%s11546_s0 + $0x12c] sm:$0xe]  ;;  %v5573_v29 = vld [vmem:[%s11546_s0 + $0x138] sm:$0xf] }
 0x153   :  { %v3123_v34 = vpop.permute.xlu0 %3122  ;;  %v3704_v53 = vsel %vm3678_vm8, %v3639_v61, %v2355_v35  ;;  %v3318_v61 = vrot.slane %v6059_v54, 1 }
 0x154   :  { %2116 = vrot.lane.b32.xlu1 %v1953_v4, %s6685_s15  ;;  %v3769_v60 = vsel %vm3743_vm9, %v3704_v53, %v2579_v14  ;;  %v934_v14 = vrot.slane %v932_v17, 1  ;;  %v944_v46 = vshll.u32 %v8826_v0, 16  ;;  %v3836_v4 = vsel %vm3808_vm10, %v3771_v38, %v3125_v12  ;;  %v5517_v53 = vld [vmem:[%s11546_s0 + $0x120] sm:$0xe] }
 0x155   :  { %2114 = vrot.lane.b32.xlu0 %v1941_v25, %s6685_s15  ;;  %v3834_v36 = vsel %vm3808_vm10, %v3769_v60, %v3123_v34  ;;  %v939_v8 = vrot.slane %v937_v26, 1  ;;  %v2977_v12 = vsel %vm664_vm1, %v2972_v22, %v2976_v44  ;;  %v942_v6 = vshrl.u32 %v8826_v0, 16 }
 0x156   :  { %v8831_v28 = vpop.permute.xlu1 %1077  ;;  %v946_v34 = vrot.slane %v944_v46, 1  ;;  %v8904_v17 = vcombine.low %v5573_v29, %v8875_v31  ;;  %v5869_v44 = vcombine.low %v5517_v53, %v8770_v23  ;;  %v1957_v26 = vshll.u32 %v8911_v37, 16 }
 0x157   :  { %v3379_v35 = vpop.permute.xlu0 %3378  ;;  %v1277_v38 = vrot.slane %v8817_v57, 1  ;;  %v8955_v57 = vld [vmem:[%s11546_s0 + $0x148] sm:$0xf]  ;;  %v1955_v29 = vshrl.u32 %v8911_v37, 16 }
 0x158   :  { %v3899_v30 = vsel %vm3873_vm11, %v3834_v36, %v3379_v35  ;;  %2372 = vrot.lane.b32.xlu1 %v2299_v40, %s6686_s26  ;;  %v5518_v40 = vld [vmem:[%s11546_s0 + $0x12c] sm:$0xe]  ;;  %v947_v20 = vor.u32 %v946_v34, %v942_v6  ;;  %v3322_v35 = vrot.slane %v8776_v5, 1  ;;  %v1276_v46 = vrot.slane %v5869_v44, 1  ;;  %v9000_v44 = vld [vmem:[%s11546_s0 + $0x13c] sm:$0xf] }
 0x159   :  { %2370 = vrot.lane.b32.xlu0 %v2296_v62, %s6686_s26  ;;  %6311 = vmatprep.mubr.msk.bf16.mxu0 %vm4159_vm12, %v3899_v30  ;;  %v3319_v62 = vrot.slane %v8788_v1, 1  ;;  %v5870_v60 = vcombine.low %v5518_v40, %v8803_v59  ;;  %v1969_v59 = vshll.u32 %v8904_v17, 16  ;;  %v8928_v30 = vld [vmem:[%s11546_s0 + $0x134] ss:$0 sps:$4 sm:$0x11]   ;;  %v5965_v34 = vcombine.low %v5645_v48, %v8896_v16 }
 0x15a   :  { %v8858_v3 = vpop.permute.xlu1 %1079  ;;  %v1278_v6 = vsel %vm1209_vm0, %v1276_v46, %v1277_v38 }
 0x15b   :  { %v3381_v13 = vpop.permute.xlu0 %3380  ;;  %v3320_v9 = vsel %vm1209_vm0, %v3318_v61, %v3319_v62  ;;  %v1279_v23 = vrot.slane %v5870_v60, 1  ;;  %v1971_v54 = vrot.slane %v1969_v59, 1  ;;  %v8982_v62 = vld [vmem:[%s11546_s0 + $0x14c] ss:$0 sps:$4 sm:$0x11]  }
 0x15c   :  { %v3901_v25 = vsel %vm3873_vm11, %v3836_v4, %v3381_v13  ;;  %2596 = vrot.lane.b32.xlu1 %v8756_v52, %s6687_s6  ;;  %v935_v52 = vor.u32 %v934_v14, %v930_v47  ;;  %v1280_v47 = vrot.slane %v8849_v55, 1  ;;  %v1967_v55 = vshrl.u32 %v8904_v17, 16  ;;  %v5701_v13 = vld [vmem:[%s11546_s0 + $0x144] sm:$0xf] }
 0x15d   :  { %2594 = vrot.lane.b32.xlu0 %v8762_v63, %s6687_s6  ;;  %6312 = vmatmul.mubr.msk.bf16.gmra.mrb[24].mxu0 %vm4159_vm12, %v3901_v25  ;;  %v6060_v63 = vcombine.low %v5772_v32, %v8739_v45  ;;  %v951_v45 = vrot.slane %v949_v42, 1  ;;  %v1974_v4 = vshll.u32 %v6574_v41, 16  ;;  %v5966_v32 = vcombine.low %v5646_v39, %v8875_v31  ;;  %v5699_v25 = vld [vmem:[%s11546_s0 + $0x138] sm:$0xf] }
 0x15e   :  { %v8885_v7 = vpop.permute.xlu1 %1336  ;;  %v940_v1 = vsel %vm664_vm1, %v935_v52, %v939_v8  ;;  %v8963_v8 = vld [vmem:[%s11546_s0 + $0x13c] sm:$0xf]  ;;  %v1281_v42 = vsel %vm1209_vm0, %v1279_v23, %v1280_v47  ;;  %v1959_v31 = vrot.slane %v1957_v26, 1  ;;  %v3448_v39 = vsel %vm3418_vm4, %v7950_v51, %v8831_v28  ;;  %v9029_v51 = vld [vmem:[%s11546_s0 + $0x148] sm:$0xf] }
 0x15f   :  { %v8898_v19 = vpop.permute.xlu0 %1334  ;;  %v3321_v36 = vrot.slane %v6060_v63, 1  ;;  %v952_v5 = vsel %vm664_vm1, %v947_v20, %v951_v45  ;;  %v8977_v61 = vcombine.low %v5699_v25, %v8963_v8  ;;  %v1972_v63 = vor.u32 %v1971_v54, %v1967_v55  ;;  %v8989_v20 = vld [vmem:[%s11546_s0 + $0x140] ss:$0 sps:$4 sm:$0x11]  }
 0x160   :  { %3140 = vrot.lane.b32.xlu1 %v2977_v12, %s6688_s21  ;;  %v1962_v12 = vshll.u32 %v8928_v30, 16  ;;  %v1976_v15 = vrot.slane %v1974_v4, 1  ;;  %v2303_v53 = vrot.slane %v5966_v32, 1  ;;  %v2304_v45 = vrot.slane %v6574_v41, 1 }
 0x161   :  { %3138 = vrot.lane.b32.xlu0 %v2965_v24, %s6688_s21  ;;  %v3323_v14 = vsel %vm1209_vm0, %v3321_v36, %v3322_v35  ;;  %v8974_v24 = vcombine.low %v5701_v13, %v8955_v57  ;;  %v1960_v16 = vor.u32 %v1959_v31, %v1955_v29  ;;  %v2301_v36 = vrot.slane %v8928_v30, 1  ;;  %v5479_v35 = vld [vmem:[%s11546_s0 + $0x138] sm:$0xf]  ;;  %v9041_v32 = vld [vmem:[%s11546_s0 + $0x140] ss:$0 sps:$4 sm:$0x11]  }
 0x162   :  { %v8913_v33 = vpop.permute.xlu1 %1560  ;;  %v2981_v23 = vshll.u32 %v8977_v61, 16  ;;  %v1977_v30 = vsel %vm664_vm1, %v1972_v63, %v1976_v15  ;;  %v2305_v26 = vsel %vm1209_vm0, %v2303_v53, %v2304_v45  ;;  %v9021_v48 = vcombine.low %v5479_v35, %v9000_v44 }
 0x163   :  { %v8918_v56 = vpop.permute.xlu0 %1558  ;;  %v2993_v59 = vshll.u32 %v8974_v24, 16  ;;  %v2991_v38 = vshrl.u32 %v8974_v24, 16  ;;  %v3513_v28 = vsel %vm3483_vm5, %v3448_v39, %v8898_v19  ;;  %v2979_v4 = vshrl.u32 %v8977_v61, 16 }
 0x164   :  { %1093 = vrot.lane.b32.xlu1 %v940_v1, %s6684_s28  ;;  %v1964_v1 = vrot.slane %v1962_v12, 1  ;;  %v2986_v13 = vshll.u32 %v8989_v20, 16  ;;  %v3578_v25 = vsel %vm3548_vm6, %v3513_v28, %v8918_v56  ;;  %v2983_v12 = vrot.slane %v2981_v23, 1 }
 0x165   :  { %3394 = vrot.lane.b32.xlu0 %v3320_v9, %s6689_s22  ;;  %v2300_v9 = vrot.slane %v5965_v34, 1  ;;  %v2995_v29 = vrot.slane %v2993_v59, 1  ;;  %v3450_v56 = vsel %vm3418_vm4, %v7985_v11, %v8858_v3  ;;  %v954_v35 = vshrl.u32 %v9021_v48, 16 }
 0x166   :  { %v8937_v22 = vpop.permute.xlu1 %2104  ;;  %v1965_v46 = vsel %vm664_vm1, %v1960_v16, %v1964_v1  ;;  %v3515_v16 = vsel %vm3483_vm5, %v3450_v56, %v8885_v7  ;;  %v5773_v7 = vld [vmem:[%s11546_s0 + $0x138] sm:$0xe] }
 0x167   :  { %v8944_v21 = vpop.permute.xlu0 %2102  ;;  %v2302_v54 = vsel %vm1209_vm0, %v2300_v9, %v2301_v36  ;;  %v3580_v11 = vsel %vm3548_vm6, %v3515_v16, %v8913_v33  ;;  %v9087_v33 = vld [vmem:[%s11546_s0 + $0x14c] ss:$0 sps:$4 sm:$0x11]  }
 0x168   :  { %1095 = vrot.lane.b32.xlu1 %v952_v5, %s6684_s28  ;;  %v2998_v5 = vshll.u32 %v8982_v62, 16 }
 0x169   :  { %3396 = vrot.lane.b32.xlu0 %v3323_v14, %s6689_s22 }
 0x16a   :  { %v8969_v52 = vpop.permute.xlu1 %2360  ;;  %v3000_v31 = vrot.slane %v2998_v5, 1  ;;  %v961_v5 = vshll.u32 %v9041_v32, 16 }
 0x16b   :  { %v2359_v40 = vpop.permute.xlu0 %2358 }
 0x16c   :  { %1352 = vrot.lane.b32.xlu1 %v1281_v42, %s6683_s16  ;;  %v963_v56 = vrot.slane %v961_v5, 1 }
 0x16d   :  { %1350 = vrot.lane.b32.xlu0 %v1278_v6, %s6683_s16  ;;  %v3643_v6 = vsel %vm3613_vm7, %v3578_v25, %v8944_v21  ;;  %v956_v21 = vshll.u32 %v9021_v48, 16 }
 0x16e   :  { %v8991_v60 = vpop.permute.xlu1 %2584  ;;  %v3708_v53 = vsel %vm3678_vm8, %v3643_v6, %v2359_v40  ;;  %v2988_v6 = vrot.slane %v2986_v13, 1 }
 0x16f   :  { %v2583_v41 = vpop.permute.xlu0 %2582 }
 0x170   :  { %v9005_v47 = vpop.f32.mrb[0].mxu0  ;;  %1576 = vrot.lane.b32.xlu1 %v8904_v17, %s6682_s25  ;;  %v5481_v17 = vld [vmem:[%s11546_s0 + $0x144] sm:$0xf]  ;;  %v3773_v1 = vsel %vm3743_vm9, %v3708_v53, %v2583_v41  ;;  %v3645_v41 = vsel %vm3613_vm7, %v3580_v11, %v8937_v22  ;;  %v2996_v22 = vor.u32 %v2995_v29, %v2991_v38 }
 0x171   :  { %v9014_v14 = vpop.f32.mrb[1].mxu0  ;;  %1574 = vrot.lane.b32.xlu0 %v8911_v37, %s6682_s25  ;;  %v9055_v15 = vcombine.low %v5481_v17, %v9029_v51  ;;  %v4524_v9 = vsel %vm4520_vm13, %v9005_v47, 0.0  ;;  %v958_v17 = vrot.slane %v956_v21, 1  ;;  %v5774_v38 = vld [vmem:[%s11546_s0 + $0x144] sm:$0xe] }
 0x172   :  { %v9033_v37 = vpop.f32.mrb[2].mxu0  ;;  %v3129_v55 = vpop.permute.xlu1 %3128  ;;  %v4521_v34 = vsel %vm4520_vm13, %v9014_v14, 0.0  ;;  %v3001_v13 = vsel %vm664_vm1, %v2996_v22, %v3000_v31  ;;  %v5575_v53 = vld [vmem:[%s11546_s0 + $0x144] sm:$0xf]  ;;  %v3325_v31 = vrot.slane %v8989_v20, 1 }
 0x173   :  { %v9045_v42 = vpop.f32.mrb[3].mxu0  ;;  %v3127_v19 = vpop.permute.xlu0 %3126  ;;  %v4526_v23 = vsel %vm4520_vm13, %v9033_v37, 0.0  ;;  %v968_v39 = vshll.u32 %v9055_v15, 16 }
 0x174   :  { %v4522_v63 = vsel %vm4520_vm13, %v9045_v42, 0.0  ;;  %2120 = vrot.lane.b32.xlu1 %v1977_v30, %s6685_s15  ;;  %v3838_v40 = vsel %vm3808_vm10, %v3773_v1, %v3127_v19  ;;  %v2984_v19 = vor.u32 %v2983_v12, %v2979_v4  ;;  %v973_v4 = vshll.u32 %v9087_v33, 16  ;;  %v5520_v12 = vld [vmem:[%s11546_s0 + $0x144] sm:$0xe] }
 0x175   :  { %v4523_v45 = vadd.f32 %v4522_v63, %v4521_v34  ;;  %2118 = vrot.lane.b32.xlu0 %v1965_v46, %s6685_s15  ;;  %v3710_v46 = vsel %vm3678_vm8, %v3645_v41, %v8969_v52  ;;  %v6061_v34 = vcombine.low %v5773_v7, %v8963_v8  ;;  %v5577_v8 = vld [vmem:[%s11546_s0 + $0x150] sm:$0xf]  ;;  %v6062_v1 = vcombine.low %v5774_v38, %v8955_v57 }
 0x176   :  { %v9068_v36 = vpop.permute.xlu1 %1081 }
 0x177   :  { %v4525_v3 = vadd.f32 %v4524_v9, %v4523_v45  ;;  %v3383_v59 = vpop.permute.xlu0 %3382  ;;  %v9131_v45 = vld [vmem:[%s11546_s0 + $0x148] sm:$0xf]  ;;  %v3324_v16 = vrot.slane %v6061_v34, 1  ;;  %v3327_v41 = vrot.slane %v6062_v1, 1 }
 0x178   :  { %v3903_v30 = vsel %vm3873_vm11, %v3838_v40, %v3383_v59  ;;  %2376 = vrot.lane.b32.xlu1 %v2305_v26, %s6686_s26  ;;  %v3775_v26 = vsel %vm3743_vm9, %v3710_v46, %v8991_v60  ;;  %v970_v60 = vrot.slane %v968_v39, 1  ;;  %v9149_v40 = vcombine.low %v5575_v53, %v9131_v45  ;;  %v5703_v53 = vld [vmem:[%s11546_s0 + $0x150] sm:$0xf] }
 0x179   :  { %2374 = vrot.lane.b32.xlu0 %v2302_v54, %s6686_s26  ;;  %6315 = vmatprep.mubr.msk.bf16.mxu0 %vm4159_vm12, %v3903_v30  ;;  %v9094_v28 = vadd.f32 %v4526_v23, %v4525_v3  ;;  %v3840_v63 = vsel %vm3808_vm10, %v3775_v26, %v3129_v55  ;;  %v966_v54 = vshrl.u32 %v9055_v15, 16  ;;  %v9116_v55 = vld [vmem:[%s11546_s0 + $0x154] sm:$0xf]  ;;  %v5872_v3 = vcombine.low %v5520_v12, %v9029_v51  ;;  %v9163_v51 = vld [vmem:[%s11546_s0 + $0x158] ss:$0 sps:$4 sm:$0x11]  }
 0x17a   :  { %v9098_v25 = vpop.permute.xlu1 %1083  ;;  %v9144_v11 = vcombine.low %v5577_v8, %v9116_v55  ;;  %v975_v59 = vrot.slane %v973_v4, 1  ;;  %v3326_v7 = vsel %vm1209_vm0, %v3324_v16, %v3325_v31  ;;  %v3328_v23 = vrot.slane %v8982_v62, 1  ;;  %v6593_v62 = vld [vmem:[%s11546_s0 + $0x14c] ss:$0 sps:$4 sm:$0x11]  }
 0x17b   :  { %v3385_v52 = vpop.permute.xlu0 %3384  ;;  %v971_v20 = vor.u32 %v970_v60, %v966_v54  ;;  %v1285_v22 = vrot.slane %v5872_v3, 1  ;;  %v5647_v54 = vld [vmem:[%s11546_s0 + $0x144] sm:$0xe]  ;;  %v1998_v4 = vshll.u32 %v9163_v51, 16  ;;  %v1979_v8 = vshrl.u32 %v9149_v40, 16 }
 0x17c   :  { %v3905_v29 = vsel %vm3873_vm11, %v3840_v63, %v3385_v52  ;;  %2600 = vrot.lane.b32.xlu1 %v8974_v24, %s6687_s6  ;;  %v959_v24 = vor.u32 %v958_v17, %v954_v35  ;;  %v5519_v35 = vld [vmem:[%s11546_s0 + $0x138] sm:$0xe]  ;;  %v1993_v46 = vshll.u32 %v9144_v11, 16  ;;  %v1286_v17 = vrot.slane %v9087_v33, 1  ;;  %v9183_v33 = vld [vmem:[%s11546_s0 + $0x160] sm:$0xf] }
 0x17d   :  { %2598 = vrot.lane.b32.xlu0 %v8977_v61, %s6687_s6  ;;  %6316 = vmatmul.mubr.msk.bf16.gmra.mrb[28].mxu0 %vm4159_vm12, %v3905_v29  ;;  %v2989_v61 = vsel %vm664_vm1, %v2984_v19, %v2988_v6  ;;  %v5871_v30 = vcombine.low %v5519_v35, %v9000_v44  ;;  %v1981_v44 = vshll.u32 %v9149_v40, 16  ;;  %v976_v26 = vsel %vm664_vm1, %v971_v20, %v975_v59  ;;  %v5648_v19 = vld [vmem:[%s11546_s0 + $0x150] sm:$0xe]  ;;  %v5705_v6 = vld [vmem:[%s11546_s0 + $0x15c] sm:$0xf] }
 0x17e   :  { %v9133_v21 = vpop.permute.xlu1 %1340  ;;  %v964_v57 = vsel %vm664_vm1, %v959_v24, %v963_v56  ;;  %v3329_v63 = vsel %vm1209_vm0, %v3327_v41, %v3328_v23  ;;  %v1283_v56 = vrot.slane %v9041_v32, 1  ;;  %v1991_v29 = vshrl.u32 %v9144_v11, 16 }
 0x17f   :  { %v9138_v9 = vpop.permute.xlu0 %1338  ;;  %v1282_v52 = vrot.slane %v5871_v30, 1  ;;  %v1995_v60 = vrot.slane %v1993_v46, 1  ;;  %v1986_v24 = vshll.u32 %v6593_v62, 16  ;;  %v5968_v12 = vcombine.low %v5648_v19, %v9116_v55 }
 0x180   :  { %3144 = vrot.lane.b32.xlu1 %v3001_v13, %s6688_s21  ;;  %v1983_v13 = vrot.slane %v1981_v44, 1  ;;  %v9200_v32 = vcombine.low %v5705_v6, %v9183_v33  ;;  %v1287_v16 = vsel %vm1209_vm0, %v1285_v22, %v1286_v17  ;;  %v5967_v31 = vcombine.low %v5647_v54, %v9131_v45  ;;  %v9226_v22 = vld [vmem:[%s11546_s0 + $0x164] ss:$0 sps:$4 sm:$0x11]   ;;  %v5483_v44 = vld [vmem:[%s11546_s0 + $0x150] sm:$0xf] }
 0x181   :  { %3142 = vrot.lane.b32.xlu0 %v2989_v61, %s6688_s21  ;;  %v9208_v61 = vld [vmem:[%s11546_s0 + $0x154] sm:$0xf]  ;;  %v1284_v55 = vsel %vm1209_vm0, %v1282_v52, %v1283_v56  ;;  %v1996_v3 = vor.u32 %v1995_v60, %v1991_v29  ;;  %v2309_v41 = vrot.slane %v5968_v12, 1  ;;  %v2310_v45 = vrot.slane %v9163_v51, 1 }
 0x182   :  { %v9153_v5 = vpop.permute.xlu1 %1564  ;;  %v9217_v20 = vcombine.low %v5703_v53, %v9208_v61  ;;  %v1984_v59 = vor.u32 %v1983_v13, %v1979_v8  ;;  %v3017_v23 = vshll.u32 %v9200_v32, 16  ;;  %v2306_v30 = vrot.slane %v5967_v31, 1  ;;  %v9241_v51 = vld [vmem:[%s11546_s0 + $0x158] ss:$0 sps:$4 sm:$0x11]  }
 0x183   :  { %v9158_v39 = vpop.permute.xlu0 %1562  ;;  %v2307_v46 = vrot.slane %v6593_v62, 1  ;;  %v3015_v56 = vshrl.u32 %v9200_v32, 16  ;;  %v3452_v29 = vsel %vm3418_vm4, %v8160_v49, %v9068_v36  ;;  %v5485_v13 = vld [vmem:[%s11546_s0 + $0x15c] sm:$0xf]  ;;  %v9269_v49 = vld [vmem:[%s11546_s0 + $0x160] sm:$0xf] }
 0x184   :  { %1097 = vrot.lane.b32.xlu1 %v964_v57, %s6684_s28  ;;  %v2000_v57 = vrot.slane %v1998_v4, 1  ;;  %v3005_v62 = vshll.u32 %v9217_v20, 16  ;;  %v3019_v54 = vrot.slane %v3017_v23, 1  ;;  %v2311_v4 = vsel %vm1209_vm0, %v2309_v41, %v2310_v45 }
 0x185   :  { %3398 = vrot.lane.b32.xlu0 %v3326_v7, %s6689_s22  ;;  %v1988_v7 = vrot.slane %v1986_v24, 1  ;;  %v3517_v36 = vsel %vm3483_vm5, %v3452_v29, %v9138_v9  ;;  %v3022_v53 = vshll.u32 %v9226_v22, 16  ;;  %v3010_v9 = vshll.u32 %v9241_v51, 16 }
 0x186   :  { %v9185_v34 = vpop.permute.xlu1 %2108  ;;  %v3582_v31 = vsel %vm3548_vm6, %v3517_v36, %v9158_v39  ;;  %v9296_v39 = vcombine.low %v5485_v13, %v9269_v49  ;;  %v3454_v45 = vsel %vm3418_vm4, %v8198_v10, %v9098_v25  ;;  %v9327_v36 = vld [vmem:[%s11546_s0 + $0x164] ss:$0 sps:$4 sm:$0x11]  }
 0x187   :  { %v9192_v38 = vpop.permute.xlu0 %2106  ;;  %v1989_v52 = vsel %vm664_vm1, %v1984_v59, %v1988_v7  ;;  %v3007_v59 = vrot.slane %v3005_v62, 1  ;;  %v9288_v7 = vld [vmem:[%s11546_s0 + $0x158] ss:$0 sps:$4 sm:$0x11]  }
 0x188   :  { %1099 = vrot.lane.b32.xlu1 %v976_v26, %s6684_s28  ;;  %v9236_v26 = vld [vmem:[%s11546_s0 + $0x154] sm:$0xf]  ;;  %v3647_v41 = vsel %vm3613_vm7, %v3582_v31, %v9192_v38  ;;  %v985_v29 = vshll.u32 %v9288_v7, 16 }
 0x189   :  { %3400 = vrot.lane.b32.xlu0 %v3329_v63, %s6689_s22  ;;  %v2001_v63 = vsel %vm664_vm1, %v1996_v3, %v2000_v57  ;;  %v9261_v8 = vcombine.low %v5483_v44, %v9236_v26  ;;  %v3519_v44 = vsel %vm3483_vm5, %v3454_v45, %v9133_v21  ;;  %v5775_v21 = vld [vmem:[%s11546_s0 + $0x150] sm:$0xe] }
 0x18a   :  { %v9213_v1 = vpop.permute.xlu1 %2364  ;;  %v3584_v10 = vsel %vm3548_vm6, %v3519_v44, %v9153_v5  ;;  %v6063_v45 = vcombine.low %v5775_v21, %v9208_v61  ;;  %v5581_v61 = vld [vmem:[%s11546_s0 + $0x168] sm:$0xf] }
 0x18b   :  { %v2363_v35 = vpop.permute.xlu0 %2362  ;;  %v980_v38 = vshll.u32 %v9261_v8, 16 }
 0x18c   :  { %1356 = vrot.lane.b32.xlu1 %v1287_v16, %s6683_s16  ;;  %v3003_v16 = vshrl.u32 %v9217_v20, 16 }
 0x18d   :  { %1354 = vrot.lane.b32.xlu0 %v1284_v55, %s6683_s16  ;;  %v982_v31 = vrot.slane %v980_v38, 1  ;;  %v5776_v38 = vld [vmem:[%s11546_s0 + $0x15c] sm:$0xe] }
 0x18e   :  { %v9228_v17 = vpop.permute.xlu1 %2588 }
 0x18f   :  { %v2587_v19 = vpop.permute.xlu0 %2586 }
 0x190   :  { %v9244_v6 = vpop.f32.mrb[4].mxu0  ;;  %1580 = vrot.lane.b32.xlu1 %v9144_v11, %s6682_s25  ;;  %v2308_v11 = vsel %vm1209_vm0, %v2306_v30, %v2307_v46  ;;  %v3712_v30 = vsel %vm3678_vm8, %v3647_v41, %v2363_v35  ;;  %v3008_v41 = vor.u32 %v3007_v59, %v3003_v16  ;;  %v997_v16 = vshll.u32 %v9327_v36, 16 }
 0x191   :  { %v9254_v60 = vpop.f32.mrb[5].mxu0  ;;  %1578 = vrot.lane.b32.xlu0 %v9149_v40, %s6682_s25  ;;  %v3777_v62 = vsel %vm3743_vm9, %v3712_v30, %v2587_v19  ;;  %v3649_v19 = vsel %vm3613_vm7, %v3584_v10, %v9185_v34  ;;  %v978_v34 = vshrl.u32 %v9261_v8, 16 }
 0x192   :  { %v4528_v40 = vsel %vm4520_vm13, %v9254_v60, 0.0  ;;  %v9275_v24 = vpop.f32.mrb[6].mxu0  ;;  %v3133_v12 = vpop.permute.xlu1 %3132 }
 0x193   :  { %v4529_v55 = vadd.f32 %v4528_v40, %v9094_v28  ;;  %v9282_v3 = vpop.f32.mrb[7].mxu0  ;;  %v3131_v57 = vpop.permute.xlu0 %3130  ;;  %v3020_v28 = vor.u32 %v3019_v54, %v3015_v56  ;;  %v3024_v54 = vrot.slane %v3022_v53, 1  ;;  %v4534_v13 = vsel %vm4520_vm13, %v9275_v24, 0.0 }
 0x194   :  { %v4530_v23 = vsel %vm4520_vm13, %v9282_v3, 0.0  ;;  %2124 = vrot.lane.b32.xlu1 %v2001_v63, %s6685_s15  ;;  %v4532_v63 = vsel %vm4520_vm13, %v9244_v6, 0.0  ;;  %v3842_v35 = vsel %vm3808_vm10, %v3777_v62, %v3131_v57  ;;  %v992_v40 = vshll.u32 %v9296_v39, 16  ;;  %v5579_v62 = vld [vmem:[%s11546_s0 + $0x15c] sm:$0xf] }
 0x195   :  { %v4531_v46 = vadd.f32 %v4530_v23, %v4529_v55  ;;  %2122 = vrot.lane.b32.xlu0 %v1989_v52, %s6685_s15  ;;  %v3714_v53 = vsel %vm3678_vm8, %v3649_v19, %v9213_v1  ;;  %v3012_v23 = vrot.slane %v3010_v9, 1  ;;  %v3025_v59 = vsel %vm664_vm1, %v3020_v28, %v3024_v54  ;;  %v5522_v9 = vld [vmem:[%s11546_s0 + $0x15c] sm:$0xe] }
 0x196   :  { %v9309_v56 = vpop.permute.xlu1 %1085  ;;  %v3779_v55 = vsel %vm3743_vm9, %v3714_v53, %v9228_v17  ;;  %v994_v17 = vrot.slane %v992_v40, 1  ;;  %v3331_v28 = vrot.slane %v9241_v51, 1  ;;  %v6064_v54 = vcombine.low %v5776_v38, %v9183_v33 }
 0x197   :  { %v4533_v25 = vadd.f32 %v4532_v63, %v4531_v46  ;;  %v3387_v52 = vpop.permute.xlu0 %3386  ;;  %v3844_v1 = vsel %vm3808_vm10, %v3779_v55, %v3133_v12  ;;  %v990_v46 = vshrl.u32 %v9296_v39, 16  ;;  %v9357_v12 = vld [vmem:[%s11546_s0 + $0x16c] sm:$0xf]  ;;  %v9372_v63 = vld [vmem:[%s11546_s0 + $0x160] sm:$0xf]  ;;  %v5874_v21 = vcombine.low %v5522_v9, %v9269_v49 }
 0x198   :  { %2380 = vrot.lane.b32.xlu1 %v2311_v4, %s6686_s26  ;;  %v3907_v5 = vsel %vm3873_vm11, %v3842_v35, %v3387_v52  ;;  %v5521_v52 = vld [vmem:[%s11546_s0 + $0x150] sm:$0xe]  ;;  %v9390_v19 = vcombine.low %v5579_v62, %v9372_v63  ;;  %v3333_v53 = vrot.slane %v6064_v54, 1  ;;  %v9404_v49 = vld [vmem:[%s11546_s0 + $0x170] ss:$0 sps:$4 sm:$0x11]  }
 0x199   :  { %2378 = vrot.lane.b32.xlu0 %v2308_v11, %s6686_s26  ;;  %6319 = vmatprep.mubr.msk.bf16.mxu1 %vm4159_vm12, %v3907_v5  ;;  %v9335_v4 = vadd.f32 %v4534_v13, %v4533_v25  ;;  %v987_v11 = vrot.slane %v985_v29, 1  ;;  %v3330_v25 = vrot.slane %v6063_v45, 1  ;;  %v9385_v29 = vcombine.low %v5581_v61, %v9357_v12  ;;  %v5707_v54 = vld [vmem:[%s11546_s0 + $0x168] sm:$0xf] }
 0x19a   :  { %v9339_v57 = vpop.permute.xlu1 %1087  ;;  %v995_v51 = vor.u32 %v994_v17, %v990_v46  ;;  %v999_v13 = vrot.slane %v997_v16, 1  ;;  %v1292_v45 = vrot.slane %v9327_v36, 1  ;;  %v9424_v36 = vld [vmem:[%s11546_s0 + $0x178] sm:$0xf]  ;;  %v1289_v17 = vrot.slane %v9288_v7, 1 }
 0x19b   :  { %v3389_v30 = vpop.permute.xlu0 %3388  ;;  %v3332_v40 = vsel %vm1209_vm0, %v3330_v25, %v3331_v28  ;;  %v5649_v16 = vld [vmem:[%s11546_s0 + $0x15c] sm:$0xe]  ;;  %v2022_v9 = vshll.u32 %v9404_v49, 16  ;;  %v2003_v62 = vshrl.u32 %v9390_v19, 16 }
 0x19c   :  { %v3909_v44 = vsel %vm3873_vm11, %v3844_v1, %v3389_v30  ;;  %2604 = vrot.lane.b32.xlu1 %v9200_v32, %s6687_s6  ;;  %v983_v32 = vor.u32 %v982_v31, %v978_v34  ;;  %v3334_v34 = vrot.slane %v9226_v22, 1  ;;  %v5873_v31 = vcombine.low %v5521_v52, %v9236_v26  ;;  %v6611_v22 = vld [vmem:[%s11546_s0 + $0x164] ss:$0 sps:$4 sm:$0x11]   ;;  %v5650_v30 = vld [vmem:[%s11546_s0 + $0x168] sm:$0xe] }
 0x19d   :  { %2602 = vrot.lane.b32.xlu0 %v9217_v20, %s6687_s6  ;;  %6320 = vmatmul.mubr.msk.bf16.vlgmr.msra.gmra.mrb[0].mxu1 %vm4159_vm12, %v3909_v44  ;;  %v3013_v20 = vsel %vm664_vm1, %v3008_v41, %v3012_v23  ;;  %v2017_v41 = vshll.u32 %v9385_v29, 16  ;;  %v1291_v23 = vrot.slane %v5874_v21, 1  ;;  %v2005_v26 = vshll.u32 %v9390_v19, 16  ;;  %v9449_v52 = vld [vmem:[%s11546_s0 + $0x16c] sm:$0xf] }
 0x19e   :  { %v9374_v10 = vpop.permute.xlu1 %1344  ;;  %v988_v33 = vsel %vm664_vm1, %v983_v32, %v987_v11  ;;  %v1000_v1 = vsel %vm664_vm1, %v995_v51, %v999_v13  ;;  %v5709_v11 = vld [vmem:[%s11546_s0 + $0x174] sm:$0xf]  ;;  %v3335_v38 = vsel %vm1209_vm0, %v3333_v53, %v3334_v34  ;;  %v1288_v44 = vrot.slane %v5873_v31, 1 }
 0x19f   :  { %v9379_v35 = vpop.permute.xlu0 %1342  ;;  %v2019_v32 = vrot.slane %v2017_v41, 1  ;;  %v2010_v25 = vshll.u32 %v6611_v22, 16  ;;  %v5970_v28 = vcombine.low %v5650_v30, %v9357_v12  ;;  %v9441_v7 = vcombine.low %v5709_v11, %v9424_v36  ;;  %v9467_v30 = vld [vmem:[%s11546_s0 + $0x17c] ss:$0 sps:$4 sm:$0x11]  }
 0x1a0   :  { %3148 = vrot.lane.b32.xlu1 %v3025_v59, %s6688_s21  ;;  %v2015_v59 = vshrl.u32 %v9385_v29, 16  ;;  %v1293_v21 = vsel %vm1209_vm0, %v1291_v23, %v1292_v45  ;;  %v1290_v12 = vsel %vm1209_vm0, %v1288_v44, %v1289_v17  ;;  %v2024_v53 = vrot.slane %v2022_v9, 1  ;;  %v9477_v44 = vld [vmem:[%s11546_s0 + $0x16c] sm:$0xf] }
 0x1a1   :  { %3146 = vrot.lane.b32.xlu0 %v3013_v20, %s6688_s21  ;;  %v2007_v20 = vrot.slane %v2005_v26, 1  ;;  %v9458_v34 = vcombine.low %v5707_v54, %v9449_v52  ;;  %v2012_v41 = vrot.slane %v2010_v25, 1  ;;  %v2315_v26 = vrot.slane %v5970_v28, 1 }
 0x1a2   :  { %v9394_v5 = vpop.permute.xlu1 %1568  ;;  %v2313_v45 = vrot.slane %v6611_v22, 1  ;;  %v3039_v9 = vshrl.u32 %v9441_v7, 16 }
 0x1a3   :  { %v9399_v55 = vpop.permute.xlu0 %1566  ;;  %v2008_v31 = vor.u32 %v2007_v20, %v2003_v62  ;;  %v3029_v22 = vshll.u32 %v9458_v34, 16  ;;  %v3456_v20 = vsel %vm3418_vm4, %v8369_v50, %v9309_v56  ;;  %v9510_v50 = vld [vmem:[%s11546_s0 + $0x178] sm:$0xf] }
 0x1a4   :  { %1101 = vrot.lane.b32.xlu1 %v988_v33, %s6684_s28  ;;  %v5969_v33 = vcombine.low %v5649_v16, %v9372_v63  ;;  %v2316_v63 = vrot.slane %v9404_v49, 1  ;;  %v9482_v49 = vld [vmem:[%s11546_s0 + $0x170] ss:$0 sps:$4 sm:$0x11]   ;;  %v3521_v56 = vsel %vm3483_vm5, %v3456_v20, %v9379_v35 }
 0x1a5   :  { %3402 = vrot.lane.b32.xlu0 %v3332_v40, %s6689_s22  ;;  %v2020_v40 = vor.u32 %v2019_v32, %v2015_v59  ;;  %v2013_v32 = vsel %vm664_vm1, %v2008_v31, %v2012_v41  ;;  %v3586_v31 = vsel %vm3548_vm6, %v3521_v56, %v9399_v55  ;;  %v3034_v35 = vshll.u32 %v9482_v49, 16 }
 0x1a6   :  { %v9426_v46 = vpop.permute.xlu1 %2112  ;;  %v2312_v23 = vrot.slane %v5969_v33, 1  ;;  %v2317_v28 = vsel %vm1209_vm0, %v2315_v26, %v2316_v63  ;;  %v3031_v63 = vrot.slane %v3029_v22, 1  ;;  %v3458_v22 = vsel %vm3418_vm4, %v8407_v18, %v9339_v57 }
 0x1a7   :  { %v9433_v61 = vpop.permute.xlu0 %2110  ;;  %v2025_v59 = vsel %vm664_vm1, %v2020_v40, %v2024_v53  ;;  %v3046_v40 = vshll.u32 %v9467_v30, 16  ;;  %v3027_v53 = vshrl.u32 %v9458_v34, 16 }
 0x1a8   :  { %1103 = vrot.lane.b32.xlu1 %v1000_v1, %s6684_s28  ;;  %v3041_v1 = vshll.u32 %v9441_v7, 16 }
 0x1a9   :  { %3404 = vrot.lane.b32.xlu0 %v3335_v38, %s6689_s22  ;;  %v5487_v38 = vld [vmem:[%s11546_s0 + $0x168] sm:$0xf] }
 0x1aa   :  { %v9454_v51 = vpop.permute.xlu1 %2368  ;;  %v3043_v62 = vrot.slane %v3041_v1, 1  ;;  %v9502_v54 = vcombine.low %v5487_v38, %v9477_v44 }
 0x1ab   :  { %v2367_v13 = vpop.permute.xlu0 %2366 }
 0x1ac   :  { %1360 = vrot.lane.b32.xlu1 %v1293_v21, %s6683_s16  ;;  %v5489_v21 = vld [vmem:[%s11546_s0 + $0x174] sm:$0xf] }
 0x1ad   :  { %1358 = vrot.lane.b32.xlu0 %v1290_v12, %s6683_s16  ;;  %v9537_v55 = vcombine.low %v5489_v21, %v9510_v50  ;;  %v3048_v21 = vrot.slane %v3046_v40, 1 }
 0x1ae   :  { %v9469_v11 = vpop.permute.xlu1 %2592 }
 0x1af   :  { %v2591_v17 = vpop.permute.xlu0 %2590 }
 0x1b0   :  { %v9485_v16 = vpop.f32.mrb[8].mxu0  ;;  %1584 = vrot.lane.b32.xlu1 %v9385_v29, %s6682_s25  ;;  %v2314_v29 = vsel %vm1209_vm0, %v2312_v23, %v2313_v45  ;;  %v9529_v23 = vld [vmem:[%s11546_s0 + $0x170] ss:$0 sps:$4 sm:$0x11]   ;;  %v3651_v45 = vsel %vm3613_vm7, %v3586_v31, %v9433_v61  ;;  %v1004_v61 = vshll.u32 %v9502_v54, 16 }
 0x1b1   :  { %v9495_v25 = vpop.f32.mrb[9].mxu0  ;;  %1582 = vrot.lane.b32.xlu0 %v9390_v19, %s6682_s25  ;;  %v3716_v20 = vsel %vm3678_vm8, %v3651_v45, %v2367_v13  ;;  %v1009_v31 = vshll.u32 %v9529_v23, 16 }
 0x1b2   :  { %v4536_v19 = vsel %vm4520_vm13, %v9495_v25, 0.0  ;;  %v9516_v33 = vpop.f32.mrb[10].mxu0  ;;  %v3137_v12 = vpop.permute.xlu1 %3136 }
 0x1b3   :  { %11609 = vst [vmem:[#allocation6_spill] sm:$0xff] %v9516_v33  ;;  %v4537_v41 = vadd.f32 %v4536_v19, %v9335_v4  ;;  %v9523_v26 = vpop.f32.mrb[11].mxu0  ;;  %v3135_v1 = vpop.permute.xlu0 %3134  ;;  %v3044_v4 = vor.u32 %v3043_v62, %v3039_v9  ;;  %v3523_v19 = vsel %vm3483_vm5, %v3458_v22, %v9374_v10  ;;  %v4540_v9 = vsel %vm4520_vm13, %v9485_v16, 0.0  ;;  %v5777_v10 = vld [vmem:[%s11546_s0 + $0x168] sm:$0xe] }
 0x1b4   :  { %v4538_v38 = vsel %vm4520_vm13, %v9523_v26, 0.0  ;;  %2128 = vrot.lane.b32.xlu1 %v2025_v59, %s6685_s15  ;;  %v3781_v59 = vsel %vm3743_vm9, %v3716_v20, %v2591_v17  ;;  %v3588_v18 = vsel %vm3548_vm6, %v3523_v19, %v9394_v5  ;;  %v9568_v5 = vld [vmem:[%s11546_s0 + $0x17c] ss:$0 sps:$4 sm:$0x11]   ;;  %v3036_v19 = vrot.slane %v3034_v35, 1 }
 0x1b5   :  { %v4539_v56 = vadd.f32 %v4538_v38, %v4537_v41  ;;  %2126 = vrot.lane.b32.xlu0 %v2013_v32, %s6685_s15  ;;  %v3846_v13 = vsel %vm3808_vm10, %v3781_v59, %v3135_v1  ;;  %v3653_v17 = vsel %vm3613_vm7, %v3588_v18, %v9426_v46  ;;  %v4542_v41 = vsel %vm4520_vm13, %v9516_v33, 0.0  ;;  %v5524_v35 = vld [vmem:[%s11546_s0 + $0x174] sm:$0xe] }
 0x1b6   :  { %v9550_v62 = vpop.permute.xlu1 %1089  ;;  %v1016_v1 = vshll.u32 %v9537_v55, 16  ;;  %v3718_v45 = vsel %vm3678_vm8, %v3653_v17, %v9454_v51  ;;  %v1002_v46 = vshrl.u32 %v9502_v54, 16  ;;  %v1006_v38 = vrot.slane %v1004_v61, 1  ;;  %v5778_v61 = vld [vmem:[%s11546_s0 + $0x174] sm:$0xe] }
 0x1b7   :  { %v4541_v57 = vadd.f32 %v4540_v9, %v4539_v56  ;;  %v3391_v32 = vpop.permute.xlu0 %3390  ;;  %v3032_v56 = vor.u32 %v3031_v63, %v3027_v53  ;;  %v6065_v59 = vcombine.low %v5777_v10, %v9449_v52  ;;  %v1014_v18 = vshrl.u32 %v9537_v55, 16  ;;  %v5585_v52 = vld [vmem:[%s11546_s0 + $0x180] sm:$0xf] }
 0x1b8   :  { %v3911_v40 = vsel %vm3873_vm11, %v3846_v13, %v3391_v32  ;;  %2384 = vrot.lane.b32.xlu1 %v2317_v28, %s6686_s26  ;;  %v3783_v28 = vsel %vm3743_vm9, %v3718_v45, %v9469_v11  ;;  %v1018_v11 = vrot.slane %v1016_v1, 1  ;;  %v1021_v53 = vshll.u32 %v9568_v5, 16  ;;  %v5583_v13 = vld [vmem:[%s11546_s0 + $0x174] sm:$0xf]  ;;  %v9613_v32 = vld [vmem:[%s11546_s0 + $0x178] sm:$0xf] }
 0x1b9   :  { %2382 = vrot.lane.b32.xlu0 %v2314_v29, %s6686_s26  ;;  %6323 = vmatprep.mubr.msk.bf16.mxu1 %vm4159_vm12, %v3911_v40  ;;  %v9576_v22 = vadd.f32 %v4542_v41, %v4541_v57  ;;  %v3848_v51 = vsel %vm3808_vm10, %v3783_v28, %v3137_v12  ;;  %v1011_v29 = vrot.slane %v1009_v31, 1  ;;  %v9598_v12 = vld [vmem:[%s11546_s0 + $0x184] sm:$0xf]  ;;  %v3049_v63 = vsel %vm664_vm1, %v3044_v4, %v3048_v21  ;;  %v5523_v41 = vld [vmem:[%s11546_s0 + $0x168] sm:$0xe] }
 0x1ba   :  { %v9580_v20 = vpop.permute.xlu1 %1091  ;;  %v3336_v10 = vrot.slane %v6065_v59, 1  ;;  %v3337_v4 = vrot.slane %v9482_v49, 1  ;;  %v6066_v21 = vcombine.low %v5778_v61, %v9424_v36  ;;  %v9626_v40 = vcombine.low %v5585_v52, %v9598_v12 }
 0x1bb   :  { %v3393_v9 = vpop.permute.xlu0 %3392  ;;  %v5876_v1 = vcombine.low %v5524_v35, %v9510_v50  ;;  %v9631_v45 = vcombine.low %v5583_v13, %v9613_v32  ;;  %v1019_v49 = vor.u32 %v1018_v11, %v1014_v18  ;;  %v5875_v59 = vcombine.low %v5523_v41, %v9477_v44  ;;  %v9645_v50 = vld [vmem:[%s11546_s0 + $0x188] ss:$0 sps:$4 sm:$0x11]   ;;  %v5713_v11 = vld [vmem:[%s11546_s0 + $0x18c] sm:$0xf] }
 0x1bc   :  { %v3913_v57 = vsel %vm3873_vm11, %v3848_v51, %v3393_v9  ;;  %2608 = vrot.lane.b32.xlu1 %v9441_v7, %s6687_s6  ;;  %v1007_v7 = vor.u32 %v1006_v38, %v1002_v46  ;;  %v1023_v46 = vrot.slane %v1021_v53, 1  ;;  %v3338_v28 = vsel %vm1209_vm0, %v3336_v10, %v3337_v4  ;;  %v5651_v35 = vld [vmem:[%s11546_s0 + $0x174] sm:$0xe] }
 0x1bd   :  { %2606 = vrot.lane.b32.xlu0 %v9458_v34, %s6687_s6  ;;  %6324 = vmatmul.mubr.msk.bf16.gmra.mrb[4].mxu1 %vm4159_vm12, %v3913_v57  ;;  %v3037_v34 = vsel %vm664_vm1, %v3032_v56, %v3036_v19  ;;  %v3339_v56 = vrot.slane %v6066_v21, 1  ;;  %v3340_v19 = vrot.slane %v9467_v30, 1  ;;  %v2041_v9 = vshll.u32 %v9626_v40, 16  ;;  %v6629_v30 = vld [vmem:[%s11546_s0 + $0x17c] ss:$0 sps:$4 sm:$0x11]  }
 0x1be   :  { %v9615_v31 = vpop.permute.xlu1 %1348  ;;  %v1012_v36 = vsel %vm664_vm1, %v1007_v7, %v1011_v29  ;;  %v1297_v29 = vrot.slane %v5876_v1, 1  ;;  %v1298_v18 = vrot.slane %v9568_v5, 1  ;;  %v2029_v44 = vshll.u32 %v9631_v45, 16  ;;  %v5652_v57 = vld [vmem:[%s11546_s0 + $0x180] sm:$0xe] }
 0x1bf   :  { %v9620_v17 = vpop.permute.xlu0 %1346  ;;  %v1024_v61 = vsel %vm664_vm1, %v1019_v49, %v1023_v46  ;;  %v9665_v5 = vld [vmem:[%s11546_s0 + $0x190] sm:$0xf]  ;;  %v3341_v52 = vsel %vm1209_vm0, %v3339_v56, %v3340_v19  ;;  %v1295_v7 = vrot.slane %v9529_v23, 1  ;;  %v2043_v10 = vrot.slane %v2041_v9, 1  ;;  %v5711_v49 = vld [vmem:[%s11546_s0 + $0x180] sm:$0xf] }
 0x1c0   :  { %3152 = vrot.lane.b32.xlu1 %v3049_v63, %s6688_s21  ;;  %v1294_v63 = vrot.slane %v5875_v59, 1  ;;  %v2046_v4 = vshll.u32 %v9645_v50, 16  ;;  %v2027_v21 = vshrl.u32 %v9631_v45, 16  ;;  %v2031_v41 = vrot.slane %v2029_v44, 1  ;;  %v9690_v46 = vld [vmem:[%s11546_s0 + $0x184] sm:$0xf] }
 0x1c1   :  { %3150 = vrot.lane.b32.xlu0 %v3037_v34, %s6688_s21  ;;  %v2039_v34 = vshrl.u32 %v9626_v40, 16  ;;  %v2034_v1 = vshll.u32 %v6629_v30, 16  ;;  %v9682_v23 = vcombine.low %v5713_v11, %v9665_v5  ;;  %v5971_v56 = vcombine.low %v5651_v35, %v9613_v32  ;;  %v5491_v35 = vld [vmem:[%s11546_s0 + $0x180] sm:$0xf] }
 0x1c2   :  { %v9635_v38 = vpop.permute.xlu1 %1572  ;;  %v2048_v44 = vrot.slane %v2046_v4, 1  ;;  %v2322_v32 = vrot.slane %v9645_v50, 1  ;;  %v9723_v50 = vld [vmem:[%s11546_s0 + $0x188] ss:$0 sps:$4 sm:$0x11]  }
 0x1c3   :  { %v9640_v51 = vpop.permute.xlu0 %1570  ;;  %v2044_v9 = vor.u32 %v2043_v10, %v2039_v34  ;;  %v2036_v11 = vrot.slane %v2034_v1, 1  ;;  %v9718_v34 = vld [vmem:[%s11546_s0 + $0x184] sm:$0xf]  ;;  %v3063_v1 = vshrl.u32 %v9682_v23, 16 }
 0x1c4   :  { %1105 = vrot.lane.b32.xlu1 %v1012_v36, %s6684_s28  ;;  %v5972_v36 = vcombine.low %v5652_v57, %v9598_v12  ;;  %v1296_v12 = vsel %vm1209_vm0, %v1294_v63, %v1295_v7  ;;  %v2032_v57 = vor.u32 %v2031_v41, %v2027_v21  ;;  %v9708_v63 = vld [vmem:[%s11546_s0 + $0x194] ss:$0 sps:$4 sm:$0x11]  }
 0x1c5   :  { %3406 = vrot.lane.b32.xlu0 %v3338_v28, %s6689_s22  ;;  %v1299_v28 = vsel %vm1209_vm0, %v1297_v29, %v1298_v18  ;;  %v2318_v29 = vrot.slane %v5971_v56, 1  ;;  %v2319_v18 = vrot.slane %v6629_v30, 1  ;;  %v2049_v21 = vsel %vm664_vm1, %v2044_v9, %v2048_v44  ;;  %v5493_v9 = vld [vmem:[%s11546_s0 + $0x18c] sm:$0xf] }
 0x1c6   :  { %v9667_v53 = vpop.permute.xlu1 %2116  ;;  %v2321_v27 = vrot.slane %v5972_v36, 1  ;;  %v2037_v41 = vsel %vm664_vm1, %v2032_v57, %v2036_v11  ;;  %v3070_v57 = vshll.u32 %v9708_v63, 16 }
 0x1c7   :  { %v9674_v13 = vpop.permute.xlu0 %2114 }
 0x1c8   :  { %1107 = vrot.lane.b32.xlu1 %v1024_v61, %s6684_s28  ;;  %v9699_v61 = vcombine.low %v5711_v49, %v9690_v46  ;;  %v3460_v49 = vsel %vm3418_vm4, %v8582_v2, %v9550_v62  ;;  %v2323_v56 = vsel %vm1209_vm0, %v2321_v27, %v2322_v32  ;;  %v9751_v2 = vld [vmem:[%s11546_s0 + $0x190] sm:$0xf] }
 0x1c9   :  { %3408 = vrot.lane.b32.xlu0 %v3341_v52, %s6689_s22  ;;  %v3065_v52 = vshll.u32 %v9682_v23, 16  ;;  %v3525_v62 = vsel %vm3483_vm5, %v3460_v49, %v9620_v17  ;;  %v3058_v17 = vshll.u32 %v9723_v50, 16  ;;  %v9770_v49 = vld [vmem:[%s11546_s0 + $0x188] ss:$0 sps:$4 sm:$0x11]  }
 0x1ca   :  { %v9695_v19 = vpop.permute.xlu1 %2372  ;;  %v3053_v30 = vshll.u32 %v9699_v61, 16  ;;  %v3051_v11 = vshrl.u32 %v9699_v61, 16 }
 0x1cb   :  { %v2371_v59 = vpop.permute.xlu0 %2370  ;;  %v3067_v36 = vrot.slane %v3065_v52, 1  ;;  %v3590_v52 = vsel %vm3548_vm6, %v3525_v62, %v9640_v51  ;;  %v9778_v51 = vcombine.low %v5493_v9, %v9751_v2  ;;  %v3072_v9 = vrot.slane %v3070_v57, 1 }
 0x1cc   :  { %1364 = vrot.lane.b32.xlu1 %v1299_v28, %s6683_s16 }
 0x1cd   :  { %1362 = vrot.lane.b32.xlu0 %v1296_v12, %s6683_s16  ;;  %v9743_v12 = vcombine.low %v5491_v35, %v9718_v34  ;;  %v3055_v35 = vrot.slane %v3053_v30, 1  ;;  %v3462_v30 = vsel %vm3418_vm4, %v8620_v58, %v9580_v20 }
 0x1ce   :  { %v9710_v7 = vpop.permute.xlu1 %2596 }
 0x1cf   :  { %v2595_v10 = vpop.permute.xlu0 %2594 }
 0x1d0   :  { %v9726_v4 = vpop.f32.mrb[12].mxu0  ;;  %1588 = vrot.lane.b32.xlu1 %v9626_v40, %s6682_s25  ;;  %v2320_v40 = vsel %vm1209_vm0, %v2318_v29, %v2319_v18 }
 0x1d1   :  { %11610 = vst [vmem:[#allocation7_spill] sm:$0xff] %v9726_v4  ;;  %v9736_v28 = vpop.f32.mrb[13].mxu0  ;;  %1586 = vrot.lane.b32.xlu0 %v9631_v45, %s6682_s25 }
 0x1d2   :  { %11611 = vst [vmem:[#allocation8_spill] sm:$0xff] %v9736_v28  ;;  %v4544_v27 = vsel %vm4520_vm13, %v9736_v28, 0.0  ;;  %v9757_v45 = vpop.f32.mrb[14].mxu0  ;;  %v3141_v44 = vpop.permute.xlu1 %3140  ;;  %v3655_v28 = vsel %vm3613_vm7, %v3590_v52, %v9674_v13  ;;  %v1028_v13 = vshll.u32 %v9743_v12, 16  ;;  %v3527_v52 = vsel %vm3483_vm5, %v3462_v30, %v9615_v31  ;;  %v5779_v31 = vld [vmem:[%s11546_s0 + $0x180] sm:$0xe] }
 0x1d3   :  { %11612 = vst [vmem:[#allocation9_spill] sm:$0xff] %v9757_v45  ;;  %v4545_v32 = vadd.f32 %v4544_v27, %v9576_v22  ;;  %v9764_v29 = vpop.f32.mrb[15].mxu0  ;;  %v3139_v18 = vpop.permute.xlu0 %3138  ;;  %v3068_v22 = vor.u32 %v3067_v36, %v3063_v1  ;;  %v3720_v62 = vsel %vm3678_vm8, %v3655_v28, %v2371_v59  ;;  %v4548_v1 = vsel %vm4520_vm13, %v9726_v4, 0.0 }
 0x1d4   :  { %v4546_v33 = vsel %vm4520_vm13, %v9764_v29, 0.0  ;;  %2132 = vrot.lane.b32.xlu1 %v2049_v21, %s6685_s15  ;;  %v3785_v21 = vsel %vm3743_vm9, %v3720_v62, %v2595_v10  ;;  %v3592_v58 = vsel %vm3548_vm6, %v3527_v52, %v9635_v38  ;;  %v4550_v28 = vsel %vm4520_vm13, %v9757_v45, 0.0  ;;  %v9809_v38 = vld [vmem:[%s11546_s0 + $0x194] ss:$0 sps:$4 sm:$0x11]  }
 0x1d5   :  { %v4547_v27 = vadd.f32 %v4546_v33, %v4545_v32  ;;  %2130 = vrot.lane.b32.xlu0 %v2037_v41, %s6685_s15  ;;  %v3850_v33 = vsel %vm3808_vm10, %v3785_v21, %v3139_v18  ;;  %v1033_v41 = vshll.u32 %v9770_v49, 16  ;;  %v3657_v10 = vsel %vm3613_vm7, %v3592_v58, %v9667_v53 }
 0x1d6   :  { %v9791_v36 = vpop.permute.xlu1 %1093  ;;  %v1040_v32 = vshll.u32 %v9778_v51, 16  ;;  %v3722_v18 = vsel %vm3678_vm8, %v3657_v10, %v9695_v19  ;;  %v1026_v53 = vshrl.u32 %v9743_v12, 16  ;;  %v1030_v30 = vrot.slane %v1028_v13, 1  ;;  %v5588_v10 = vld [vmem:[%s11546_s0 + $0x190] sm:$0xf] }
 0x1d7   :  { %v4549_v20 = vadd.f32 %v4548_v1, %v4547_v27  ;;  %v3395_v59 = vpop.permute.xlu0 %3394  ;;  %v3056_v52 = vor.u32 %v3055_v35, %v3051_v11  ;;  %v3060_v21 = vrot.slane %v3058_v17, 1  ;;  %v6067_v1 = vcombine.low %v5779_v31, %v9690_v46  ;;  %v5526_v35 = vld [vmem:[%s11546_s0 + $0x18c] sm:$0xe]  ;;  %v9846_v17 = vld [vmem:[%s11546_s0 + $0x19c] sm:$0xf] }
 0x1d8   :  { %v3915_v57 = vsel %vm3873_vm11, %v3850_v33, %v3395_v59  ;;  %2388 = vrot.lane.b32.xlu1 %v2323_v56, %s6686_s26  ;;  %v3787_v56 = vsel %vm3743_vm9, %v3722_v18, %v9710_v7  ;;  %v5780_v33 = vld [vmem:[%s11546_s0 + $0x18c] sm:$0xe]  ;;  %v1038_v7 = vshrl.u32 %v9778_v51, 16  ;;  %v1045_v11 = vshll.u32 %v9809_v38, 16 }
 0x1d9   :  { %2386 = vrot.lane.b32.xlu0 %v2320_v40, %s6686_s26  ;;  %6327 = vmatprep.mubr.msk.bf16.mxu1 %vm4159_vm12, %v3915_v57  ;;  %v9817_v62 = vadd.f32 %v4550_v28, %v4549_v20  ;;  %v3852_v19 = vsel %vm3808_vm10, %v3787_v56, %v3141_v44  ;;  %v1035_v40 = vrot.slane %v1033_v41, 1  ;;  %v1042_v20 = vrot.slane %v1040_v32, 1  ;;  %v5587_v31 = vld [vmem:[%s11546_s0 + $0x18c] sm:$0xf]  ;;  %v5525_v57 = vld [vmem:[%s11546_s0 + $0x180] sm:$0xe] }
 0x1da   :  { %v9821_v27 = vpop.permute.xlu1 %1095  ;;  %v3073_v46 = vsel %vm664_vm1, %v3068_v22, %v3072_v9  ;;  %v1031_v44 = vor.u32 %v1030_v30, %v1026_v53  ;;  %v3342_v41 = vrot.slane %v6067_v1, 1  ;;  %v3343_v22 = vrot.slane %v9723_v50, 1 }
 0x1db   :  { %v3397_v58 = vpop.permute.xlu0 %3396  ;;  %v6068_v9 = vcombine.low %v5780_v33, %v9665_v5  ;;  %v5878_v50 = vcombine.low %v5526_v35, %v9751_v2  ;;  %v1043_v18 = vor.u32 %v1042_v20, %v1038_v7  ;;  %v1047_v53 = vrot.slane %v1045_v11, 1  ;;  %v5654_v35 = vld [vmem:[%s11546_s0 + $0x198] sm:$0xe] }
 0x1dc   :  { %v3917_v13 = vsel %vm3873_vm11, %v3852_v19, %v3397_v58  ;;  %2612 = vrot.lane.b32.xlu1 %v9682_v23, %s6687_s6  ;;  %v5589_v23 = vld [vmem:[%s11546_s0 + $0x198] sm:$0xf]  ;;  %v1036_v32 = vsel %vm664_vm1, %v1031_v44, %v1035_v40  ;;  %v5909_v30 = vcombine.low %v5587_v31, %v5588_v10  ;;  %v3346_v1 = vrot.slane %v9708_v63, 1  ;;  %v6646_v40 = vld [vmem:[%s11546_s0 + $0x1a0] ss:$0 sps:$4 sm:$0x11]  }
 0x1dd   :  { %2610 = vrot.lane.b32.xlu0 %v9699_v61, %s6687_s6  ;;  %6328 = vmatmul.mubr.msk.bf16.gmra.mrb[8].mxu1 %vm4159_vm12, %v3917_v13  ;;  %v3061_v61 = vsel %vm664_vm1, %v3056_v52, %v3060_v21  ;;  %v5910_v5 = vcombine.low %v5589_v23, %v9846_v17  ;;  %v3344_v52 = vsel %vm1209_vm0, %v3342_v41, %v3343_v22  ;;  %v3345_v21 = vrot.slane %v6068_v9, 1  ;;  %v6647_v63 = vld [vmem:[%s11546_s0 + $0x194] ss:$0 sps:$4 sm:$0x11]   ;;  %v5653_v23 = vld [vmem:[%s11546_s0 + $0x18c] sm:$0xe] }
 0x1de   :  { %v9848_v59 = vpop.permute.xlu1 %1352  ;;  %v5877_v19 = vcombine.low %v5525_v57, %v9718_v34  ;;  %v1303_v2 = vrot.slane %v5878_v50, 1  ;;  %v1304_v33 = vrot.slane %v9809_v38, 1  ;;  %v1048_v7 = vsel %vm664_vm1, %v1043_v18, %v1047_v53  ;;  %v5717_v9 = vld [vmem:[%s11546_s0 + $0x1a4] sm:$0xf] }
 0x1df   :  { %v9859_v28 = vpop.permute.xlu0 %1350  ;;  %v2065_v13 = vshll.u32 %v5910_v5, 16  ;;  %v2053_v34 = vshll.u32 %v5909_v30, 16  ;;  %v3347_v11 = vsel %vm1209_vm0, %v3345_v21, %v3346_v1  ;;  %v1301_v38 = vrot.slane %v9770_v49, 1  ;;  %v9904_v49 = vld [vmem:[%s11546_s0 + $0x1a8] sm:$0xf] }
 0x1e0   :  { %3156 = vrot.lane.b32.xlu1 %v3073_v46, %s6688_s21  ;;  %v1300_v46 = vrot.slane %v5877_v19, 1  ;;  %v2063_v41 = vshrl.u32 %v5910_v5, 16  ;;  %v2070_v31 = vshll.u32 %v6646_v40, 16  ;;  %v2051_v57 = vshrl.u32 %v5909_v30, 16  ;;  %v5715_v1 = vld [vmem:[%s11546_s0 + $0x198] sm:$0xf] }
 0x1e1   :  { %3154 = vrot.lane.b32.xlu0 %v3061_v61, %s6688_s21  ;;  %v1305_v61 = vsel %vm1209_vm0, %v1303_v2, %v1304_v33  ;;  %v2067_v22 = vrot.slane %v2065_v13, 1  ;;  %v2055_v50 = vrot.slane %v2053_v34, 1  ;;  %v5973_v21 = vcombine.low %v5653_v23, %v5588_v10  ;;  %v9917_v19 = vld [vmem:[%s11546_s0 + $0x19c] sm:$0xf] }
 0x1e2   :  { %v9869_v56 = vpop.permute.xlu1 %1576  ;;  %v1302_v53 = vsel %vm1209_vm0, %v1300_v46, %v1301_v38  ;;  %v9920_v33 = vcombine.low %v5717_v9, %v9904_v49  ;;  %v9925_v34 = vcombine.low %v5715_v1, %v9917_v19  ;;  %v2328_v38 = vrot.slane %v6646_v40, 1 }
 0x1e3   :  { %v9874_v58 = vpop.permute.xlu0 %1574  ;;  %v2068_v13 = vor.u32 %v2067_v22, %v2063_v41  ;;  %v2056_v10 = vor.u32 %v2055_v50, %v2051_v57  ;;  %v2325_v23 = vrot.slane %v6647_v63, 1  ;;  %v3464_v41 = vsel %vm3418_vm4, %v8791_v43, %v9791_v36 }
 0x1e4   :  { %1109 = vrot.lane.b32.xlu1 %v1036_v32, %s6684_s28  ;;  %v2058_v32 = vshll.u32 %v6647_v63, 16  ;;  %v3089_v9 = vshll.u32 %v9920_v33, 16  ;;  %v3087_v1 = vshrl.u32 %v9920_v33, 16 }
 0x1e5   :  { %3410 = vrot.lane.b32.xlu0 %v3344_v52, %s6689_s22  ;;  %v5974_v52 = vcombine.low %v5654_v35, %v9846_v17  ;;  %v2072_v17 = vrot.slane %v2070_v31, 1  ;;  %v2324_v35 = vrot.slane %v5973_v21, 1  ;;  %v3077_v31 = vshll.u32 %v9925_v34, 16 }
 0x1e6   :  { %v9886_v20 = vpop.permute.xlu1 %2120 }
 0x1e7   :  { %v2119_v44 = vpop.permute.xlu0 %2118  ;;  %v2327_v46 = vrot.slane %v5974_v52, 1  ;;  %v2073_v40 = vsel %vm664_vm1, %v2068_v13, %v2072_v17  ;;  %v2326_v36 = vsel %vm1209_vm0, %v2324_v35, %v2325_v23  ;;  %v3091_v13 = vrot.slane %v3089_v9, 1 }
 0x1e8   :  { %1111 = vrot.lane.b32.xlu1 %v1048_v7, %s6684_s28  ;;  %v2060_v7 = vrot.slane %v2058_v32, 1  ;;  %v3079_v35 = vrot.slane %v3077_v31, 1 }
 0x1e9   :  { %3412 = vrot.lane.b32.xlu0 %v3347_v11, %s6689_s22  ;;  %v2329_v43 = vsel %vm1209_vm0, %v2327_v46, %v2328_v38  ;;  %v3075_v46 = vshrl.u32 %v9925_v34, 16 }
 0x1ea   :  { %v9907_v18 = vpop.permute.xlu1 %2376  ;;  %v2061_v63 = vsel %vm664_vm1, %v2056_v10, %v2060_v7 }
 0x1eb   :  { %v2375_v2 = vpop.permute.xlu0 %2374 }
 0x1ec   :  { %1368 = vrot.lane.b32.xlu1 %v1305_v61, %s6683_s16  ;;  %v9934_v61 = vld [vmem:[%s11546_s0 + $0x1ac] ss:$0 sps:$4 sm:$0x11]  }
 0x1ed   :  { %1366 = vrot.lane.b32.xlu0 %v1302_v53, %s6683_s16  ;;  %v3094_v7 = vshll.u32 %v9934_v61, 16 }
 0x1ee   :  { %v2601_v11 = vpop.permute.xlu1 %2600 }
 0x1ef   :  { %v2599_v45 = vpop.permute.xlu0 %2598 }
 0x1f0   :  { %v9928_v4 = vpop.f32.mrb[16].mxu0  ;;  %1592 = vrot.lane.b32.xlu1 %v5910_v5, %s6682_s25  ;;  %v3529_v5 = vsel %vm3483_vm5, %v3464_v41, %v9859_v28 }
 0x1f1   :  { %v9939_v22 = vpop.f32.mrb[17].mxu0  ;;  %1590 = vrot.lane.b32.xlu0 %v5909_v30, %s6682_s25  ;;  %v9956_v30 = vld [vmem:[%s11546_s0 + $0x1a0] ss:$0 sps:$4 sm:$0x11]   ;;  %v3594_v53 = vsel %vm3548_vm6, %v3529_v5, %v9874_v58  ;;  %v4556_v9 = vsel %vm4520_vm13, %v9928_v4, 0.0 }
 0x1f2   :  { %v4552_v57 = vsel %vm4520_vm13, %v9939_v22, 0.0  ;;  %v9949_v50 = vpop.f32.mrb[18].mxu0  ;;  %v3145_v32 = vpop.permute.xlu1 %3144  ;;  %v3659_v17 = vsel %vm3613_vm7, %v3594_v53, %v2119_v44  ;;  %v3092_v53 = vor.u32 %v3091_v13, %v3087_v1 }
 0x1f3   :  { %v4553_v28 = vadd.f32 %v4552_v57, %v9817_v62  ;;  %v9961_v52 = vpop.f32.mrb[19].mxu0  ;;  %v3143_v21 = vpop.permute.xlu0 %3142  ;;  %v3466_v62 = vsel %vm3418_vm4, %v8826_v0, %v9821_v27  ;;  %v3724_v58 = vsel %vm3678_vm8, %v3659_v17, %v2375_v2  ;;  %v5782_v0 = vld [vmem:[%s11546_s0 + $0x1a4] sm:$0xe]  ;;  %v4558_v5 = vsel %vm4520_vm13, %v9949_v50, 0.0 }
 0x1f4   :  { %v4554_v10 = vsel %vm4520_vm13, %v9961_v52, 0.0  ;;  %2136 = vrot.lane.b32.xlu1 %v2073_v40, %s6685_s15  ;;  %v3531_v44 = vsel %vm3483_vm5, %v3466_v62, %v9848_v59  ;;  %v3789_v23 = vsel %vm3743_vm9, %v3724_v58, %v2599_v45  ;;  %v3082_v40 = vshll.u32 %v9956_v30, 16  ;;  %v5781_v45 = vld [vmem:[%s11546_s0 + $0x198] sm:$0xe] }
 0x1f5   :  { %v4555_v38 = vadd.f32 %v4554_v10, %v4553_v28  ;;  %2134 = vrot.lane.b32.xlu0 %v2061_v63, %s6685_s15  ;;  %v3596_v27 = vsel %vm3548_vm6, %v3531_v44, %v9869_v56  ;;  %v3854_v63 = vsel %vm3808_vm10, %v3789_v23, %v3143_v21  ;;  %v3096_v28 = vrot.slane %v3094_v7, 1 }
 0x1f6   :  { %v1098_v41 = vpop.permute.xlu1 %1097  ;;  %v3661_v59 = vsel %vm3613_vm7, %v3596_v27, %v9886_v20  ;;  %v6070_v21 = vcombine.low %v5782_v0, %v9904_v49  ;;  %v3080_v62 = vor.u32 %v3079_v35, %v3075_v46  ;;  %v3084_v58 = vrot.slane %v3082_v40, 1 }
 0x1f7   :  { %v4557_v2 = vadd.f32 %v4556_v9, %v4555_v38  ;;  %v3399_v31 = vpop.permute.xlu0 %3398  ;;  %v3726_v56 = vsel %vm3678_vm8, %v3661_v59, %v9907_v18  ;;  %v6069_v38 = vcombine.low %v5781_v45, %v9917_v19  ;;  %v3097_v49 = vsel %vm664_vm1, %v3092_v53, %v3096_v28 }
 0x1f8   :  { %v3919_v57 = vsel %vm3873_vm11, %v3854_v63, %v3399_v31  ;;  %2392 = vrot.lane.b32.xlu1 %v2329_v43, %s6686_s26  ;;  %v3791_v20 = vsel %vm3743_vm9, %v3726_v56, %v2601_v11  ;;  %v3351_v11 = vrot.slane %v6070_v21, 1  ;;  %v3085_v19 = vsel %vm664_vm1, %v3080_v62, %v3084_v58 }
 0x1f9   :  { %2390 = vrot.lane.b32.xlu0 %v2326_v36, %s6686_s26  ;;  %6331 = vmatprep.mubr.msk.bf16.mxu1 %vm4159_vm12, %v3919_v57  ;;  %v4559_v17 = vadd.f32 %v4558_v5, %v4557_v2  ;;  %v3856_v43 = vsel %vm3808_vm10, %v3791_v20, %v3145_v32  ;;  %v3352_v36 = vrot.slane %v9934_v61, 1  ;;  %v3348_v32 = vrot.slane %v6069_v38, 1 }
 0x1fa   :  { %v1100_v10 = vpop.permute.xlu1 %1099  ;;  %v3349_v7 = vrot.slane %v9956_v30, 1  ;;  %v3468_v2 = vsel %vm3418_vm4, %v9021_v48, %v1098_v41 }
 0x1fb   :  { %v3401_v1 = vpop.permute.xlu0 %3400  ;;  %v3470_v41 = vsel %vm3418_vm4, %v9055_v15, %v1100_v10 }
 0x1fc   :  { %v3921_v18 = vsel %vm3873_vm11, %v3856_v43, %v3401_v1  ;;  %2616 = vrot.lane.b32.xlu1 %v9920_v33, %s6687_s6  ;;  %v3353_v33 = vsel %vm1209_vm0, %v3351_v11, %v3352_v36  ;;  %v3350_v35 = vsel %vm1209_vm0, %v3348_v32, %v3349_v7 }
 0x1fd   :  { %2614 = vrot.lane.b32.xlu0 %v9925_v34, %s6687_s6  ;;  %6332 = vmatmul.mubr.msk.bf16.gmra.mrb[12].mxu1 %vm4159_vm12, %v3921_v18 }
 0x1fe   :  { %v1357_v13 = vpop.permute.xlu1 %1356 }
 0x1ff   :  { %v1355_v46 = vpop.permute.xlu0 %1354  ;;  %v3535_v58 = vsel %vm3483_vm5, %v3470_v41, %v1357_v13 }
 0x200   :  { %3160 = vrot.lane.b32.xlu1 %v3097_v49, %s6688_s21  ;;  %v3533_v31 = vsel %vm3483_vm5, %v3468_v2, %v1355_v46 }
 0x201   :  { %3158 = vrot.lane.b32.xlu0 %v3085_v19, %s6688_s21 }
 0x202   :  { %v1581_v34 = vpop.permute.xlu1 %1580 }
 0x203   :  { %v1579_v44 = vpop.permute.xlu0 %1578  ;;  %v3600_v1 = vsel %vm3548_vm6, %v3535_v58, %v1581_v34 }
 0x204   :  { %3416 = vrot.lane.b32.xlu1 %v3353_v33, %s6689_s22  ;;  %v3598_v57 = vsel %vm3548_vm6, %v3533_v31, %v1579_v44 }
 0x205   :  { %3414 = vrot.lane.b32.xlu0 %v3350_v35, %s6689_s22 }
 0x206   :  { %v2125_v61 = vpop.permute.xlu1 %2124 }
 0x207   :  { %v2123_v23 = vpop.permute.xlu0 %2122  ;;  %v3665_v36 = vsel %vm3613_vm7, %v3600_v1, %v2125_v61 }
 0x208   :  { %v3663_v21 = vsel %vm3613_vm7, %v3598_v57, %v2123_v23 }
 0x20a   :  { %v2381_v9 = vpop.permute.xlu1 %2380 }
 0x20b   :  { %v2379_v40 = vpop.permute.xlu0 %2378  ;;  %v3730_v13 = vsel %vm3678_vm8, %v3665_v36, %v2381_v9 }
 0x20c   :  { %v3728_v20 = vsel %vm3678_vm8, %v3663_v21, %v2379_v40 }
 0x20e   :  { %v2605_v30 = vpop.permute.xlu1 %2604 }
 0x20f   :  { %v2603_v0 = vpop.permute.xlu0 %2602  ;;  %v3795_v32 = vsel %vm3743_vm9, %v3730_v13, %v2605_v30 }
 0x210   :  { %v10020_v27 = vpop.f32.mrb[20].mxu0  ;;  %v3793_v38 = vsel %vm3743_vm9, %v3728_v20, %v2603_v0 }
 0x211   :  { %v10024_v63 = vpop.f32.mrb[21].mxu0 }
 0x212   :  { %v4560_v45 = vsel %vm4520_vm13, %v10024_v63, 0.0  ;;  %v10029_v59 = vpop.f32.mrb[22].mxu0  ;;  %v3149_v5 = vpop.permute.xlu1 %3148 }
 0x213   :  { %v4561_v53 = vadd.f32 %v4560_v45, %v4559_v17  ;;  %v10032_v56 = vpop.f32.mrb[23].mxu0  ;;  %v3147_v28 = vpop.permute.xlu0 %3146  ;;  %v4564_v17 = vsel %vm4520_vm13, %v10020_v27, 0.0  ;;  %v4566_v15 = vsel %vm4520_vm13, %v10029_v59, 0.0  ;;  %v3860_v46 = vsel %vm3808_vm10, %v3795_v32, %v3149_v5 }
 0x214   :  { %v4562_v48 = vsel %vm4520_vm13, %v10032_v56, 0.0  ;;  %v3858_v49 = vsel %vm3808_vm10, %v3793_v38, %v3147_v28 }
 0x215   :  { %v4563_v62 = vadd.f32 %v4562_v48, %v4561_v53 }
 0x216   :  { %v1102_v43 = vpop.permute.xlu1 %1101 }
 0x217   :  { %v4565_v18 = vadd.f32 %v4564_v17, %v4563_v62  ;;  %v3403_v11 = vpop.permute.xlu0 %3402  ;;  %v3472_v30 = vsel %vm3418_vm4, %v9261_v8, %v1102_v43 }
 0x218   :  { %v3923_v10 = vsel %vm3873_vm11, %v3858_v49, %v3403_v11 }
 0x219   :  { %6335 = vmatprep.mubr.msk.bf16.mxu1 %vm4159_vm12, %v3923_v10  ;;  %v4567_v19 = vadd.f32 %v4566_v15, %v4565_v18 }
 0x21a   :  { %v1104_v7 = vpop.permute.xlu1 %1103 }
 0x21b   :  { %v3405_v33 = vpop.permute.xlu0 %3404  ;;  %v3474_v17 = vsel %vm3418_vm4, %v9296_v39, %v1104_v7 }
 0x21c   :  { %v3925_v34 = vsel %vm3873_vm11, %v3860_v46, %v3405_v33 }
 0x21d   :  { %6336 = vmatmul.mubr.msk.bf16.gmra.mrb[16].mxu1 %vm4159_vm12, %v3925_v34 }
 0x21e   :  { %v1361_v35 = vpop.permute.xlu1 %1360 }
 0x21f   :  { %v1359_v44 = vpop.permute.xlu0 %1358  ;;  %v3539_v18 = vsel %vm3483_vm5, %v3474_v17, %v1361_v35 }
 0x220   :  { %v3537_v53 = vsel %vm3483_vm5, %v3472_v30, %v1359_v44 }
 0x222   :  { %v1585_v61 = vpop.permute.xlu1 %1584 }
 0x223   :  { %v1583_v23 = vpop.permute.xlu0 %1582  ;;  %v3604_v15 = vsel %vm3548_vm6, %v3539_v18, %v1585_v61 }
 0x224   :  { %v3602_v41 = vsel %vm3548_vm6, %v3537_v53, %v1583_v23 }
 0x226   :  { %v2129_v40 = vpop.permute.xlu1 %2128 }
 0x227   :  { %v2127_v0 = vpop.permute.xlu0 %2126  ;;  %v3669_v32 = vsel %vm3613_vm7, %v3604_v15, %v2129_v40 }
 0x228   :  { %v3667_v38 = vsel %vm3613_vm7, %v3602_v41, %v2127_v0 }
 0x22a   :  { %v2385_v9 = vpop.permute.xlu1 %2384 }
 0x22b   :  { %v2383_v2 = vpop.permute.xlu0 %2382  ;;  %v3734_v46 = vsel %vm3678_vm8, %v3669_v32, %v2385_v9 }
 0x22c   :  { %v3732_v43 = vsel %vm3678_vm8, %v3667_v38, %v2383_v2 }
 0x22e   :  { %v2609_v31 = vpop.permute.xlu1 %2608 }
 0x22f   :  { %v2607_v45 = vpop.permute.xlu0 %2606  ;;  %v3799_v34 = vsel %vm3743_vm9, %v3734_v46, %v2609_v31 }
 0x230   :  { %v10056_v57 = vpop.f32.mrb[24].mxu0  ;;  %v3797_v49 = vsel %vm3743_vm9, %v3732_v43, %v2607_v45 }
 0x231   :  { %v10060_v5 = vpop.f32.mrb[25].mxu0  ;;  %v4572_v11 = vsel %vm4520_vm13, %v10056_v57, 0.0 }
 0x232   :  { %v4568_v28 = vsel %vm4520_vm13, %v10060_v5, 0.0  ;;  %v10065_v21 = vpop.f32.mrb[26].mxu0  ;;  %v3153_v48 = vpop.permute.xlu1 %3152 }
 0x233   :  { %v4569_v20 = vadd.f32 %v4568_v28, %v4567_v19  ;;  %v10068_v62 = vpop.f32.mrb[27].mxu0  ;;  %v3151_v58 = vpop.permute.xlu0 %3150  ;;  %v4574_v39 = vsel %vm4520_vm13, %v10065_v21, 0.0  ;;  %v3864_v44 = vsel %vm3808_vm10, %v3799_v34, %v3153_v48 }
 0x234   :  { %v4570_v8 = vsel %vm4520_vm13, %v10068_v62, 0.0  ;;  %v3862_v13 = vsel %vm3808_vm10, %v3797_v49, %v3151_v58 }
 0x235   :  { %v4571_v1 = vadd.f32 %v4570_v8, %v4569_v20 }
 0x236   :  { %v1106_v36 = vpop.permute.xlu1 %1105 }
 0x237   :  { %v4573_v10 = vadd.f32 %v4572_v11, %v4571_v1  ;;  %v3407_v19 = vpop.permute.xlu0 %3406  ;;  %v3476_v31 = vsel %vm3418_vm4, %v9502_v54, %v1106_v36 }
 0x238   :  { %v3927_v7 = vsel %vm3873_vm11, %v3862_v13, %v3407_v19 }
 0x239   :  { %6339 = vmatprep.mubr.msk.bf16.mxu1 %vm4159_vm12, %v3927_v7  ;;  %v4575_v33 = vadd.f32 %v4574_v39, %v4573_v10 }
 0x23a   :  { %v1108_v35 = vpop.permute.xlu1 %1107 }
 0x23b   :  { %v3409_v61 = vpop.permute.xlu0 %3408  ;;  %v3478_v36 = vsel %vm3418_vm4, %v9537_v55, %v1108_v35 }
 0x23c   :  { %v3929_v23 = vsel %vm3873_vm11, %v3864_v44, %v3409_v61 }
 0x23d   :  { %6340 = vmatmul.mubr.msk.bf16.gmra.mrb[20].mxu1 %vm4159_vm12, %v3929_v23 }
 0x23e   :  { %v1365_v40 = vpop.permute.xlu1 %1364 }
 0x23f   :  { %v1363_v0 = vpop.permute.xlu0 %1362  ;;  %v3543_v19 = vsel %vm3483_vm5, %v3478_v36, %v1365_v40 }
 0x240   :  { %v3541_v38 = vsel %vm3483_vm5, %v3476_v31, %v1363_v0 }
 0x242   :  { %v1589_v2 = vpop.permute.xlu1 %1588 }
 0x243   :  { %v1587_v45 = vpop.permute.xlu0 %1586  ;;  %v3608_v46 = vsel %vm3548_vm6, %v3543_v19, %v1589_v2 }
 0x244   :  { %v3606_v1 = vsel %vm3548_vm6, %v3541_v38, %v1587_v45 }
 0x246   :  { %v2133_v30 = vpop.permute.xlu1 %2132 }
 0x247   :  { %v2131_v53 = vpop.permute.xlu0 %2130  ;;  %v3673_v61 = vsel %vm3613_vm7, %v3608_v46, %v2133_v30 }
 0x248   :  { %v3671_v15 = vsel %vm3613_vm7, %v3606_v1, %v2131_v53 }
 0x24a   :  { %v2389_v9 = vpop.permute.xlu1 %2388 }
 0x24b   :  { %v2387_v28 = vpop.permute.xlu0 %2386  ;;  %v3738_v23 = vsel %vm3678_vm8, %v3673_v61, %v2389_v9 }
 0x24c   :  { %v3736_v10 = vsel %vm3678_vm8, %v3671_v15, %v2387_v28 }
 0x24e   :  { %v2613_v41 = vpop.permute.xlu1 %2612 }
 0x24f   :  { %v2611_v20 = vpop.permute.xlu0 %2610  ;;  %v3803_v0 = vsel %vm3743_vm9, %v3738_v23, %v2613_v41 }
 0x250   :  { %v10092_v58 = vpop.f32.mrb[28].mxu0  ;;  %v3801_v32 = vsel %vm3743_vm9, %v3736_v10, %v2611_v20 }
 0x251   :  { %v10096_v48 = vpop.f32.mrb[29].mxu0  ;;  %v4580_v39 = vsel %vm4520_vm13, %v10092_v58, 0.0 }
 0x252   :  { %v4576_v8 = vsel %vm4520_vm13, %v10096_v48, 0.0  ;;  %v10101_v17 = vpop.f32.mrb[30].mxu0  ;;  %v3157_v43 = vpop.permute.xlu1 %3156 }
 0x253   :  { %v4577_v18 = vadd.f32 %v4576_v8, %v4575_v33  ;;  %v10104_v49 = vpop.f32.mrb[31].mxu0  ;;  %v3155_v11 = vpop.permute.xlu0 %3154  ;;  %v4582_v55 = vsel %vm4520_vm13, %v10101_v17, 0.0  ;;  %v3868_v2 = vsel %vm3808_vm10, %v3803_v0, %v3157_v43 }
 0x254   :  { %v4578_v54 = vsel %vm4520_vm13, %v10104_v49, 0.0  ;;  %v3866_v34 = vsel %vm3808_vm10, %v3801_v32, %v3155_v11 }
 0x255   :  { %v4579_v13 = vadd.f32 %v4578_v54, %v4577_v18 }
 0x256   :  { %v1110_v7 = vpop.permute.xlu1 %1109 }
 0x257   :  { %v4581_v33 = vadd.f32 %v4580_v39, %v4579_v13  ;;  %v3411_v44 = vpop.permute.xlu0 %3410  ;;  %v3480_v43 = vsel %vm3418_vm4, %v9743_v12, %v1110_v7 }
 0x258   :  { %v3931_v35 = vsel %vm3873_vm11, %v3866_v34, %v3411_v44 }
 0x259   :  { %6343 = vmatprep.mubr.msk.bf16.mxu1 %vm4159_vm12, %v3931_v35  ;;  %v4583_v40 = vadd.f32 %v4582_v55, %v4581_v33 }
 0x25a   :  { %v1112_v45 = vpop.permute.xlu1 %1111 }
 0x25b   :  { %v3413_v53 = vpop.permute.xlu0 %3412  ;;  %v3482_v41 = vsel %vm3418_vm4, %v9778_v51, %v1112_v45 }
 0x25c   :  { %v3933_v28 = vsel %vm3873_vm11, %v3868_v2, %v3413_v53 }
 0x25d   :  { %6344 = vmatmul.mubr.msk.bf16.gmra.mrb[24].mxu1 %vm4159_vm12, %v3933_v28 }
 0x25e   :  { %v1369_v30 = vpop.permute.xlu1 %1368 }
 0x25f   :  { %v1367_v20 = vpop.permute.xlu0 %1366  ;;  %v3547_v36 = vsel %vm3483_vm5, %v3482_v41, %v1369_v30 }
 0x260   :  { %v3545_v13 = vsel %vm3483_vm5, %v3480_v43, %v1367_v20 }
 0x262   :  { %v1593_v31 = vpop.permute.xlu1 %1592 }
 0x263   :  { %v1591_v38 = vpop.permute.xlu0 %1590  ;;  %v3612_v19 = vsel %vm3548_vm6, %v3547_v36, %v1593_v31 }
 0x264   :  { %v3610_v51 = vsel %vm3548_vm6, %v3545_v13, %v1591_v38 }
 0x266   :  { %v2137_v8 = vpop.permute.xlu1 %2136 }
 0x267   :  { %v2135_v1 = vpop.permute.xlu0 %2134  ;;  %v3677_v33 = vsel %vm3613_vm7, %v3612_v19, %v2137_v8 }
 0x268   :  { %v3675_v44 = vsel %vm3613_vm7, %v3610_v51, %v2135_v1 }
 0x26a   :  { %v2393_v9 = vpop.permute.xlu1 %2392 }
 0x26b   :  { %v2391_v18 = vpop.permute.xlu0 %2390  ;;  %v3742_v61 = vsel %vm3678_vm8, %v3677_v33, %v2393_v9 }
 0x26c   :  { %v3740_v35 = vsel %vm3678_vm8, %v3675_v44, %v2391_v18 }
 0x26e   :  { %v2617_v11 = vpop.permute.xlu1 %2616 }
 0x26f   :  { %v2615_v15 = vpop.permute.xlu0 %2614  ;;  %v3807_v23 = vsel %vm3743_vm9, %v3742_v61, %v2617_v11 }
 0x270   :  { %v10130_v54 = vpop.f32.mrb[0].mxu1  ;;  %v3805_v45 = vsel %vm3743_vm9, %v3740_v35, %v2615_v15 }
 0x271   :  { %v10135_v10 = vpop.f32.mrb[1].mxu1 }
 0x272   :  { %v4584_v32 = vsel %vm4520_vm13, %v10135_v10, 0.0  ;;  %v10141_v39 = vpop.f32.mrb[2].mxu1  ;;  %v3161_v46 = vpop.permute.xlu1 %3160 }
 0x273   :  { %v4585_v34 = vadd.f32 %v4584_v32, %v4583_v40  ;;  %v10145_v12 = vpop.f32.mrb[3].mxu1  ;;  %v3159_v7 = vpop.permute.xlu0 %3158  ;;  %v4588_v40 = vsel %vm4520_vm13, %v10130_v54, 0.0  ;;  %v3872_v2 = vsel %vm3808_vm10, %v3807_v23, %v3161_v46  ;;  %v4590_v38 = vsel %vm4520_vm13, %v10141_v39, 0.0 }
 0x274   :  { %v4586_v55 = vsel %vm4520_vm13, %v10145_v12, 0.0  ;;  %v3870_v30 = vsel %vm3808_vm10, %v3805_v45, %v3159_v7 }
 0x275   :  { %v4587_v0 = vadd.f32 %v4586_v55, %v4585_v34 }
 0x276   :  { %v3417_v53 = vpop.permute.xlu1 %3416 }
 0x277   :  { %v4589_v28 = vadd.f32 %v4588_v40, %v4587_v0  ;;  %v3937_v20 = vsel %vm3873_vm11, %v3872_v2, %v3417_v53  ;;  %v3415_v31 = vpop.permute.xlu0 %3414 }
 0x278   :  { %v3935_v8 = vsel %vm3873_vm11, %v3870_v30, %v3415_v31 }
 0x279   :  { %6347 = vmatprep.mubr.msk.bf16.mxu1 %vm4159_vm12, %v3935_v8  ;;  %v4591_v1 = vadd.f32 %v4590_v38, %v4589_v28 }
 0x27a   :  { %6348 = vmatmul.mubr.msk.bf16.gmra.mrb[28].mxu1 %vm4159_vm12, %v3937_v20 }
 0x290   :  { %v10164_v9 = vpop.f32.mrb[4].mxu1 }
 0x291   :  { %v10166_v18 = vpop.f32.mrb[5].mxu1  ;;  %v4596_v19 = vsel %vm4520_vm13, %v10164_v9, 0.0 }
 0x292   :  { %v4592_v11 = vsel %vm4520_vm13, %v10166_v18, 0.0  ;;  %v10170_v15 = vpop.f32.mrb[6].mxu1 }
 0x293   :  { %v4593_v41 = vadd.f32 %v4592_v11, %v4591_v1  ;;  %v10172_v43 = vpop.f32.mrb[7].mxu1  ;;  %v4598_v46 = vsel %vm4520_vm13, %v10170_v15, 0.0 }
 0x294   :  { %v4594_v36 = vsel %vm4520_vm13, %v10172_v43, 0.0 }
 0x295   :  { %v4595_v13 = vadd.f32 %v4594_v36, %v4593_v41 }
 0x297   :  { %v4597_v32 = vadd.f32 %v4596_v19, %v4595_v13 }
 0x299   :  { %v4599_v51 = vadd.f32 %v4598_v46, %v4597_v32 }
 0x2b0   :  { %v10180_v33 = vpop.f32.mrb[8].mxu1 }
 0x2b1   :  { %v10182_v34 = vpop.f32.mrb[9].mxu1  ;;  %v4604_v0 = vsel %vm4520_vm13, %v10180_v33, 0.0 }
 0x2b2   :  { %v4600_v7 = vsel %vm4520_vm13, %v10182_v34, 0.0  ;;  %v10186_v44 = vpop.f32.mrb[10].mxu1 }
 0x2b3   :  { %v4601_v61 = vadd.f32 %v4600_v7, %v4599_v51  ;;  %v10188_v55 = vpop.f32.mrb[11].mxu1  ;;  %v4606_v40 = vsel %vm4520_vm13, %v10186_v44, 0.0 }
 0x2b4   :  { %v4602_v35 = vsel %vm4520_vm13, %v10188_v55, 0.0 }
 0x2b5   :  { %v4603_v23 = vadd.f32 %v4602_v35, %v4601_v61 }
 0x2b7   :  { %v4605_v45 = vadd.f32 %v4604_v0, %v4603_v23 }
 0x2b9   :  { %v4607_v2 = vadd.f32 %v4606_v40, %v4605_v45 }
 0x2d0   :  { %v10196_v53 = vpop.f32.mrb[12].mxu1 }
 0x2d1   :  { %v10198_v28 = vpop.f32.mrb[13].mxu1  ;;  %v4612_v11 = vsel %vm4520_vm13, %v10196_v53, 0.0 }
 0x2d2   :  { %v4608_v30 = vsel %vm4520_vm13, %v10198_v28, 0.0  ;;  %v10202_v20 = vpop.f32.mrb[14].mxu1 }
 0x2d3   :  { %v4609_v31 = vadd.f32 %v4608_v30, %v4607_v2  ;;  %v10204_v38 = vpop.f32.mrb[15].mxu1  ;;  %v4614_v36 = vsel %vm4520_vm13, %v10202_v20, 0.0 }
 0x2d4   :  { %v4610_v8 = vsel %vm4520_vm13, %v10204_v38, 0.0 }
 0x2d5   :  { %v4611_v1 = vadd.f32 %v4610_v8, %v4609_v31 }
 0x2d7   :  { %v4613_v41 = vadd.f32 %v4612_v11, %v4611_v1 }
 0x2d9   :  { %v4615_v13 = vadd.f32 %v4614_v36, %v4613_v41 }
 0x2f0   :  { %v10212_v19 = vpop.f32.mrb[16].mxu1 }
 0x2f1   :  { %v10214_v32 = vpop.f32.mrb[17].mxu1  ;;  %v4620_v0 = vsel %vm4520_vm13, %v10212_v19, 0.0 }
 0x2f2   :  { %v4616_v46 = vsel %vm4520_vm13, %v10214_v32, 0.0  ;;  %v10218_v51 = vpop.f32.mrb[18].mxu1 }
 0x2f3   :  { %11613 = vst [vmem:[#allocation10_spill] sm:$0xff] %v10218_v51  ;;  %v4617_v7 = vadd.f32 %v4616_v46, %v4615_v13  ;;  %v10220_v61 = vpop.f32.mrb[19].mxu1  ;;  %v4622_v40 = vsel %vm4520_vm13, %v10218_v51, 0.0 }
 0x2f4   :  { %v4618_v35 = vsel %vm4520_vm13, %v10220_v61, 0.0 }
 0x2f5   :  { %v4619_v23 = vadd.f32 %v4618_v35, %v4617_v7 }
 0x2f7   :  { %v4621_v45 = vadd.f32 %v4620_v0, %v4619_v23 }
 0x2f9   :  { %v4623_v2 = vadd.f32 %v4622_v40, %v4621_v45 }
 0x310   :  { %v10228_v30 = vpop.f32.mrb[20].mxu1 }
 0x311   :  { %11614 = vst [vmem:[#allocation11_spill] sm:$0xff] %v10228_v30  ;;  %v10230_v31 = vpop.f32.mrb[21].mxu1  ;;  %v4628_v46 = vsel %vm4520_vm13, %v10228_v30, 0.0 }
 0x312   :  { %11615 = vst [vmem:[#allocation12_spill] sm:$0xff] %v10230_v31  ;;  %v4624_v8 = vsel %vm4520_vm13, %v10230_v31, 0.0  ;;  %v10234_v1 = vpop.f32.mrb[22].mxu1 }
 0x313   :  { %11616 = vst [vmem:[#allocation13_spill] sm:$0xff] %v10234_v1  ;;  %v4625_v11 = vadd.f32 %v4624_v8, %v4623_v2  ;;  %v10236_v41 = vpop.f32.mrb[23].mxu1  ;;  %v4630_v35 = vsel %vm4520_vm13, %v10234_v1, 0.0 }
 0x314   :  { %11617 = vst [vmem:[#allocation14_spill] sm:$0xff] %v10236_v41  ;;  %v4626_v36 = vsel %vm4520_vm13, %v10236_v41, 0.0 }
 0x315   :  { %v4627_v13 = vadd.f32 %v4626_v36, %v4625_v11 }
 0x317   :  { %v4629_v7 = vadd.f32 %v4628_v46, %v4627_v13 }
 0x319   :  { %v4631_v23 = vadd.f32 %v4630_v35, %v4629_v7 }
 0x330   :  { %v10244_v0 = vpop.f32.mrb[24].mxu1 }
 0x331   :  { %11618 = vst [vmem:[#allocation15_spill] sm:$0xff] %v10244_v0  ;;  %v10246_v45 = vpop.f32.mrb[25].mxu1  ;;  %v4636_v13 = vsel %vm4520_vm13, %v10244_v0, 0.0 }
 0x332   :  { %11619 = vst [vmem:[#allocation16_spill] sm:$0xff] %v10246_v45  ;;  %v4632_v40 = vsel %vm4520_vm13, %v10246_v45, 0.0  ;;  %v10250_v2 = vpop.f32.mrb[26].mxu1 }
 0x333   :  { %11620 = vst [vmem:[#allocation17_spill] sm:$0xff] %v10250_v2  ;;  %v4633_v8 = vadd.f32 %v4632_v40, %v4631_v23  ;;  %v10252_v41 = vpop.f32.mrb[27].mxu1  ;;  %v4638_v7 = vsel %vm4520_vm13, %v10250_v2, 0.0 }
 0x334   :  { %11621 = vst [vmem:[#allocation18_spill] sm:$0xff] %v10252_v41  ;;  %v4634_v11 = vsel %vm4520_vm13, %v10252_v41, 0.0 }
 0x335   :  { %v4635_v36 = vadd.f32 %v4634_v11, %v4633_v8 }
 0x337   :  { %v4637_v46 = vadd.f32 %v4636_v13, %v4635_v36 }
 0x339   :  { %v4639_v35 = vadd.f32 %v4638_v7, %v4637_v46 }
 0x34d   :  { %v10260_v1 = vpop.f32.mrb[28].mxu1 }
 0x34e   :  { %v10262_v45 = vpop.f32.mrb[29].mxu1  ;;  %v4644_v36 = vsel %vm4520_vm13, %v10260_v1, 0.0 }
 0x34f   :  { %11622 = vst [vmem:[#allocation19_spill] sm:$0xff] %v10262_v45  ;;  %v4640_v23 = vsel %vm4520_vm13, %v10262_v45, 0.0  ;;  %v10266_v40 = vpop.f32.mrb[30].mxu1 }
 0x350   :  { %v4641_v30 = vadd.f32 %v4640_v23, %v4639_v35  ;;  %v10268_v41 = vpop.f32.mrb[31].mxu1  ;;  %v4646_v46 = vsel %vm4520_vm13, %v10266_v40, 0.0 }
 0x351   :  { %11623 = vst [vmem:[#allocation20_spill] sm:$0xff] %v10268_v41  ;;  %v4642_v8 = vsel %vm4520_vm13, %v10268_v41, 0.0 }
 0x352   :  { %v4643_v11 = vadd.f32 %v4642_v8, %v4641_v30 }
 0x354   :  { %v4645_v13 = vadd.f32 %v4644_v36, %v4643_v11  ;;  %v11631_v11 = vld [vmem:[#allocation9_spill] sm:$0xff] }
 0x356   :  { %v4647_v7 = vadd.f32 %v4646_v46, %v4645_v13 }
 0x358   :  { %v4648_v2 = vrot.slane %v4647_v7, 4 }
 0x35a   :  { %v4649_v0 = vadd.f32 %v4648_v2, %v4647_v7 }
 0x35c   :  { %v4650_v45 = vrot.slane %v4649_v0, 2 }
 0x35e   :  { %v4651_v31 = vadd.f32 %v4650_v45, %v4649_v0  ;;  %v11629_v0 = vld [vmem:[#allocation8_spill] sm:$0xff]  ;;  %v11630_v45 = vld [vmem:[#allocation7_spill] sm:$0xff] }
 0x360   :  { %v4652_v51 = vrot.slane %v4651_v31, 1 }
 0x362   :  { %v4653_v35 = vadd.f32 %v4652_v51, %v4651_v31  ;;  %v11628_v31 = vld [vmem:[#allocation6_spill] sm:$0xff] }
 0x364   :  { %v10276_v23 = vmul.f32 0.001953125, %v4653_v35  ;;  %v11636_v35 = vld [vmem:[#allocation10_spill] sm:$0xff] }
 0x366   :  { %v10280_v41 = vsub.f32 %v9014_v14, %v10276_v23  ;;  %v10284_v30 = vsub.f32 %v9045_v42, %v10276_v23  ;;  %v10288_v8 = vsub.f32 %v9005_v47, %v10276_v23  ;;  %v10292_v2 = vsub.f32 %v9033_v37, %v10276_v23 }
 0x367   :  { %v10296_v51 = vsub.f32 %v9254_v60, %v10276_v23  ;;  %v10300_v14 = vsub.f32 %v9282_v3, %v10276_v23  ;;  %v10304_v42 = vsub.f32 %v9244_v6, %v10276_v23  ;;  %v10308_v47 = vsub.f32 %v9275_v24, %v10276_v23 }
 0x368   :  { %11624 = vst [vmem:[#allocation21_spill] sm:$0xff] %v10280_v41  ;;  %11625 = vst [vmem:[#allocation22_spill] sm:$0xff] %v10284_v30  ;;  %v10312_v37 = vsub.f32 %v9495_v25, %v10276_v23  ;;  %v10316_v60 = vsub.f32 %v9523_v26, %v10276_v23  ;;  %v10320_v3 = vsub.f32 %v9485_v16, %v10276_v23 }
 0x369   :  { %11626 = vst [vmem:[#allocation23_spill] sm:$0xff] %v10288_v8  ;;  %11627 = vst [vmem:[#allocation24_spill] sm:$0xff] %v10292_v2  ;;  %v10324_v6 = vsub.f32 %v11628_v31, %v10276_v23  ;;  %v10328_v24 = vsub.f32 %v11629_v0, %v10276_v23  ;;  %v10332_v25 = vsub.f32 %v9764_v29, %v10276_v23  ;;  %v11638_v31 = vld [vmem:[#allocation12_spill] sm:$0xff]  ;;  %v11640_v0 = vld [vmem:[#allocation14_spill] sm:$0xff] }
 0x36a   :  { %v10336_v26 = vsub.f32 %v11630_v45, %v10276_v23  ;;  %v10340_v16 = vsub.f32 %v11631_v11, %v10276_v23  ;;  %v10344_v36 = vsub.f32 %v9939_v22, %v10276_v23  ;;  %v10348_v13 = vsub.f32 %v9961_v52, %v10276_v23  ;;  %v11642_v45 = vld [vmem:[#allocation11_spill] sm:$0xff]  ;;  %v11644_v11 = vld [vmem:[#allocation13_spill] sm:$0xff] }
 0x36b   :  { %v10352_v29 = vsub.f32 %v9928_v4, %v10276_v23  ;;  %v10356_v46 = vsub.f32 %v9949_v50, %v10276_v23  ;;  %v10360_v7 = vsub.f32 %v10024_v63, %v10276_v23  ;;  %v10364_v22 = vsub.f32 %v10032_v56, %v10276_v23 }
 0x36c   :  { %v10368_v52 = vsub.f32 %v10020_v27, %v10276_v23  ;;  %v10372_v4 = vsub.f32 %v10029_v59, %v10276_v23  ;;  %v10376_v50 = vsub.f32 %v10060_v5, %v10276_v23  ;;  %v10380_v63 = vsub.f32 %v10068_v62, %v10276_v23 }
 0x36d   :  { %v10384_v56 = vsub.f32 %v10056_v57, %v10276_v23  ;;  %v10388_v27 = vsub.f32 %v10065_v21, %v10276_v23  ;;  %v10392_v59 = vsub.f32 %v10096_v48, %v10276_v23  ;;  %v10396_v5 = vsub.f32 %v10104_v49, %v10276_v23 }
 0x36e   :  { %v10400_v62 = vsub.f32 %v10092_v58, %v10276_v23  ;;  %v10404_v57 = vsub.f32 %v10101_v17, %v10276_v23  ;;  %v10408_v21 = vsub.f32 %v10135_v10, %v10276_v23  ;;  %v10412_v48 = vsub.f32 %v10145_v12, %v10276_v23 }
 0x36f   :  { %v10416_v49 = vsub.f32 %v10130_v54, %v10276_v23  ;;  %v10420_v58 = vsub.f32 %v10141_v39, %v10276_v23  ;;  %v10424_v17 = vsub.f32 %v10166_v18, %v10276_v23  ;;  %v10428_v10 = vsub.f32 %v10172_v43, %v10276_v23 }
 0x370   :  { %v10432_v12 = vsub.f32 %v10164_v9, %v10276_v23  ;;  %v10436_v54 = vsub.f32 %v10170_v15, %v10276_v23  ;;  %v10440_v39 = vsub.f32 %v10182_v34, %v10276_v23  ;;  %v10444_v18 = vsub.f32 %v10188_v55, %v10276_v23 }
 0x371   :  { %v10448_v43 = vsub.f32 %v10180_v33, %v10276_v23  ;;  %v10452_v9 = vsub.f32 %v10186_v44, %v10276_v23  ;;  %v10456_v15 = vsub.f32 %v10198_v28, %v10276_v23  ;;  %v10460_v34 = vsub.f32 %v10204_v38, %v10276_v23 }
 0x372   :  { %v10464_v55 = vsub.f32 %v10196_v53, %v10276_v23  ;;  %v10468_v33 = vsub.f32 %v10202_v20, %v10276_v23  ;;  %v10472_v44 = vsub.f32 %v10214_v32, %v10276_v23  ;;  %v10476_v28 = vsub.f32 %v10220_v61, %v10276_v23 }
 0x373   :  { %v10480_v38 = vsub.f32 %v10212_v19, %v10276_v23  ;;  %v10484_v53 = vsub.f32 %v11636_v35, %v10276_v23  ;;  %v10488_v20 = vsub.f32 %v11638_v31, %v10276_v23  ;;  %v10492_v32 = vsub.f32 %v11640_v0, %v10276_v23 }
 0x374   :  { %11632 = vst [vmem:[#allocation6_spill] sm:$0xff] %v10468_v33  ;;  %11633 = vst [vmem:[#allocation8_spill] sm:$0xff] %v10472_v44  ;;  %v10496_v61 = vsub.f32 %v11642_v45, %v10276_v23  ;;  %v10500_v19 = vsub.f32 %v11644_v11, %v10276_v23 }
 0x375   :  { %11634 = vst [vmem:[#allocation7_spill] sm:$0xff] %v10476_v28  ;;  %11635 = vst [vmem:[#allocation9_spill] sm:$0xff] %v10480_v38  ;;  %v11646_v38 = vld [vmem:[#allocation16_spill] sm:$0xff] }
 0x376   :  { %11637 = vst [vmem:[#allocation10_spill] sm:$0xff] %v10484_v53  ;;  %11639 = vst [vmem:[#allocation12_spill] sm:$0xff] %v10488_v20  ;;  %v10504_v35 = vsub.f32 %v11646_v38, %v10276_v23  ;;  %v11648_v53 = vld [vmem:[#allocation18_spill] sm:$0xff]  ;;  %v11650_v20 = vld [vmem:[#allocation15_spill] sm:$0xff] }
 0x377   :  { %11641 = vst [vmem:[#allocation14_spill] sm:$0xff] %v10492_v32  ;;  %11643 = vst [vmem:[#allocation11_spill] sm:$0xff] %v10496_v61  ;;  %v10508_v31 = vsub.f32 %v11648_v53, %v10276_v23  ;;  %v10512_v0 = vsub.f32 %v11650_v20, %v10276_v23  ;;  %v11652_v32 = vld [vmem:[#allocation17_spill] sm:$0xff]  ;;  %v11654_v61 = vld [vmem:[#allocation19_spill] sm:$0xff]  ;;  %v10528_v53 = vsub.f32 %v10260_v1, %v10276_v23 }
 0x378   :  { %11645 = vst [vmem:[#allocation13_spill] sm:$0xff] %v10500_v19  ;;  %11647 = vst [vmem:[#allocation16_spill] sm:$0xff] %v10504_v35  ;;  %v10516_v45 = vsub.f32 %v11652_v32, %v10276_v23  ;;  %v10520_v11 = vsub.f32 %v11654_v61, %v10276_v23  ;;  %v11656_v19 = vld [vmem:[#allocation20_spill] sm:$0xff]  ;;  %v10532_v20 = vsub.f32 %v10266_v40, %v10276_v23 }
 0x379   :  { %11649 = vst [vmem:[#allocation18_spill] sm:$0xff] %v10508_v31  ;;  %11651 = vst [vmem:[#allocation15_spill] sm:$0xff] %v10512_v0  ;;  %v10524_v38 = vsub.f32 %v11656_v19, %v10276_v23  ;;  %v4719_v32 = vmul.f32 %v10280_v41, %v10280_v41  ;;  %v4721_v61 = vmul.f32 %v10288_v8, %v10288_v8 }
 0x37a   :  { %11653 = vst [vmem:[#allocation17_spill] sm:$0xff] %v10516_v45  ;;  %11655 = vst [vmem:[#allocation19_spill] sm:$0xff] %v10520_v11  ;;  %v4720_v45 = vmul.f32 %v10284_v30, %v10284_v30  ;;  %v4722_v19 = vmul.f32 %v10292_v2, %v10292_v2  ;;  %v4723_v40 = vmul.f32 %v10296_v51, %v10296_v51 }
 0x37b   :  { %11657 = vst [vmem:[#allocation20_spill] sm:$0xff] %v10524_v38  ;;  %11658 = vst [vmem:[#allocation25_spill] sm:$0xff] %v10528_v53  ;;  %v4783_v38 = vsel %vm4520_vm13, %v4719_v32, 0.0  ;;  %v4786_v23 = vsel %vm4520_vm13, %v4721_v61, 0.0  ;;  %v4724_v30 = vmul.f32 %v10300_v14, %v10300_v14  ;;  %v4725_v2 = vmul.f32 %v10304_v42, %v10304_v42 }
 0x37c   :  { %11659 = vst [vmem:[#allocation26_spill] sm:$0xff] %v10532_v20  ;;  %v4784_v1 = vsel %vm4520_vm13, %v4720_v45, 0.0  ;;  %v4788_v20 = vsel %vm4520_vm13, %v4722_v19, 0.0  ;;  %v4790_v32 = vsel %vm4520_vm13, %v4723_v40, 0.0  ;;  %v4726_v45 = vmul.f32 %v10308_v47, %v10308_v47 }
 0x37d   :  { %v4785_v53 = vadd.f32 %v4784_v1, %v4783_v38  ;;  %v4792_v38 = vsel %vm4520_vm13, %v4724_v30, 0.0  ;;  %v4794_v61 = vsel %vm4520_vm13, %v4725_v2, 0.0  ;;  %v4730_v30 = vmul.f32 %v10324_v6, %v10324_v6 }
 0x37e   :  { %v4731_v2 = vmul.f32 %v10328_v24, %v10328_v24 }
 0x37f   :  { %v4787_v41 = vadd.f32 %v4786_v23, %v4785_v53  ;;  %v4727_v53 = vmul.f32 %v10312_v37, %v10312_v37 }
 0x381   :  { %v4789_v8 = vadd.f32 %v4788_v20, %v4787_v41  ;;  %v4728_v41 = vmul.f32 %v10316_v60, %v10316_v60  ;;  %v4796_v20 = vsel %vm4520_vm13, %v4726_v45, 0.0  ;;  %v4798_v40 = vsel %vm4520_vm13, %v4727_v53, 0.0 }
 0x382   :  { %v4732_v45 = vmul.f32 %v10332_v25, %v10332_v25  ;;  %v4733_v53 = vmul.f32 %v10336_v26, %v10336_v26 }
 0x383   :  { %v4791_v11 = vadd.f32 %v4790_v32, %v4789_v8  ;;  %v4729_v8 = vmul.f32 %v10320_v3, %v10320_v3 }
 0x385   :  { %v4793_v1 = vadd.f32 %v4792_v38, %v4791_v11  ;;  %v4800_v11 = vsel %vm4520_vm13, %v4728_v41, 0.0  ;;  %v4734_v41 = vmul.f32 %v10340_v16, %v10340_v16 }
 0x387   :  { %v4795_v23 = vadd.f32 %v4794_v61, %v4793_v1  ;;  %v4802_v1 = vsel %vm4520_vm13, %v4729_v8, 0.0  ;;  %v4735_v8 = vmul.f32 %v10344_v36, %v10344_v36 }
 0x389   :  { %v4797_v19 = vadd.f32 %v4796_v20, %v4795_v23  ;;  %v4804_v23 = vsel %vm4520_vm13, %v4730_v30, 0.0  ;;  %v4736_v30 = vmul.f32 %v10348_v13, %v10348_v13 }
 0x38b   :  { %v4799_v32 = vadd.f32 %v4798_v40, %v4797_v19  ;;  %v4806_v19 = vsel %vm4520_vm13, %v4731_v2, 0.0  ;;  %v4737_v2 = vmul.f32 %v10352_v29, %v10352_v29 }
 0x38d   :  { %v4801_v38 = vadd.f32 %v4800_v11, %v4799_v32  ;;  %v4808_v32 = vsel %vm4520_vm13, %v4732_v45, 0.0  ;;  %v4738_v45 = vmul.f32 %v10356_v46, %v10356_v46 }
 0x38f   :  { %v4803_v61 = vadd.f32 %v4802_v1, %v4801_v38  ;;  %v4810_v38 = vsel %vm4520_vm13, %v4733_v53, 0.0  ;;  %v4739_v53 = vmul.f32 %v10360_v7, %v10360_v7 }
 0x391   :  { %v4805_v20 = vadd.f32 %v4804_v23, %v4803_v61  ;;  %v4812_v61 = vsel %vm4520_vm13, %v4734_v41, 0.0  ;;  %v4740_v41 = vmul.f32 %v10364_v22, %v10364_v22 }
 0x393   :  { %v4807_v40 = vadd.f32 %v4806_v19, %v4805_v20  ;;  %v4814_v20 = vsel %vm4520_vm13, %v4735_v8, 0.0  ;;  %v4741_v8 = vmul.f32 %v10368_v52, %v10368_v52 }
 0x395   :  { %v4809_v11 = vadd.f32 %v4808_v32, %v4807_v40  ;;  %v4816_v40 = vsel %vm4520_vm13, %v4736_v30, 0.0  ;;  %v4742_v30 = vmul.f32 %v10372_v4, %v10372_v4 }
 0x397   :  { %v4811_v1 = vadd.f32 %v4810_v38, %v4809_v11  ;;  %v4818_v11 = vsel %vm4520_vm13, %v4737_v2, 0.0  ;;  %v4743_v2 = vmul.f32 %v10376_v50, %v10376_v50 }
 0x399   :  { %v4813_v23 = vadd.f32 %v4812_v61, %v4811_v1  ;;  %v4820_v1 = vsel %vm4520_vm13, %v4738_v45, 0.0  ;;  %v4744_v45 = vmul.f32 %v10380_v63, %v10380_v63 }
 0x39b   :  { %v4815_v19 = vadd.f32 %v4814_v20, %v4813_v23  ;;  %v4822_v23 = vsel %vm4520_vm13, %v4739_v53, 0.0  ;;  %v4745_v53 = vmul.f32 %v10384_v56, %v10384_v56 }
 0x39d   :  { %v4817_v32 = vadd.f32 %v4816_v40, %v4815_v19  ;;  %v4824_v19 = vsel %vm4520_vm13, %v4740_v41, 0.0  ;;  %v4746_v41 = vmul.f32 %v10388_v27, %v10388_v27 }
 0x39f   :  { %v4819_v38 = vadd.f32 %v4818_v11, %v4817_v32  ;;  %v4826_v32 = vsel %vm4520_vm13, %v4741_v8, 0.0  ;;  %v4747_v8 = vmul.f32 %v10392_v59, %v10392_v59 }
 0x3a1   :  { %v4821_v61 = vadd.f32 %v4820_v1, %v4819_v38  ;;  %v4828_v38 = vsel %vm4520_vm13, %v4742_v30, 0.0  ;;  %v4748_v30 = vmul.f32 %v10396_v5, %v10396_v5 }
 0x3a3   :  { %v4823_v20 = vadd.f32 %v4822_v23, %v4821_v61  ;;  %v4830_v61 = vsel %vm4520_vm13, %v4743_v2, 0.0  ;;  %v4749_v2 = vmul.f32 %v10400_v62, %v10400_v62 }
 0x3a5   :  { %v4825_v40 = vadd.f32 %v4824_v19, %v4823_v20  ;;  %v4832_v20 = vsel %vm4520_vm13, %v4744_v45, 0.0  ;;  %v4750_v45 = vmul.f32 %v10404_v57, %v10404_v57 }
 0x3a7   :  { %v4827_v11 = vadd.f32 %v4826_v32, %v4825_v40  ;;  %v4834_v40 = vsel %vm4520_vm13, %v4745_v53, 0.0  ;;  %v4751_v53 = vmul.f32 %v10408_v21, %v10408_v21 }
 0x3a9   :  { %v4829_v1 = vadd.f32 %v4828_v38, %v4827_v11  ;;  %v4836_v11 = vsel %vm4520_vm13, %v4746_v41, 0.0  ;;  %v4752_v41 = vmul.f32 %v10412_v48, %v10412_v48 }
 0x3ab   :  { %v4831_v23 = vadd.f32 %v4830_v61, %v4829_v1  ;;  %v4838_v1 = vsel %vm4520_vm13, %v4747_v8, 0.0  ;;  %v4753_v8 = vmul.f32 %v10416_v49, %v10416_v49 }
 0x3ad   :  { %v4833_v19 = vadd.f32 %v4832_v20, %v4831_v23  ;;  %v4840_v23 = vsel %vm4520_vm13, %v4748_v30, 0.0  ;;  %v4754_v30 = vmul.f32 %v10420_v58, %v10420_v58 }
 0x3af   :  { %v4835_v32 = vadd.f32 %v4834_v40, %v4833_v19  ;;  %v4842_v19 = vsel %vm4520_vm13, %v4749_v2, 0.0  ;;  %v4755_v2 = vmul.f32 %v10424_v17, %v10424_v17 }
 0x3b1   :  { %v4837_v38 = vadd.f32 %v4836_v11, %v4835_v32  ;;  %v4844_v32 = vsel %vm4520_vm13, %v4750_v45, 0.0  ;;  %v4756_v45 = vmul.f32 %v10428_v10, %v10428_v10 }
 0x3b3   :  { %v4839_v61 = vadd.f32 %v4838_v1, %v4837_v38  ;;  %v4846_v38 = vsel %vm4520_vm13, %v4751_v53, 0.0  ;;  %v4757_v53 = vmul.f32 %v10432_v12, %v10432_v12 }
 0x3b5   :  { %v4841_v20 = vadd.f32 %v4840_v23, %v4839_v61  ;;  %v4848_v61 = vsel %vm4520_vm13, %v4752_v41, 0.0  ;;  %v4758_v41 = vmul.f32 %v10436_v54, %v10436_v54 }
 0x3b7   :  { %v4843_v40 = vadd.f32 %v4842_v19, %v4841_v20  ;;  %v4850_v20 = vsel %vm4520_vm13, %v4753_v8, 0.0  ;;  %v4759_v8 = vmul.f32 %v10440_v39, %v10440_v39 }
 0x3b9   :  { %v4845_v11 = vadd.f32 %v4844_v32, %v4843_v40  ;;  %v4852_v40 = vsel %vm4520_vm13, %v4754_v30, 0.0  ;;  %v4760_v30 = vmul.f32 %v10444_v18, %v10444_v18 }
 0x3bb   :  { %v4847_v1 = vadd.f32 %v4846_v38, %v4845_v11  ;;  %v4854_v11 = vsel %vm4520_vm13, %v4755_v2, 0.0  ;;  %v4761_v2 = vmul.f32 %v10448_v43, %v10448_v43 }
 0x3bd   :  { %v4849_v23 = vadd.f32 %v4848_v61, %v4847_v1  ;;  %v4856_v1 = vsel %vm4520_vm13, %v4756_v45, 0.0  ;;  %v4762_v45 = vmul.f32 %v10452_v9, %v10452_v9 }
 0x3bf   :  { %v4851_v19 = vadd.f32 %v4850_v20, %v4849_v23  ;;  %v4858_v23 = vsel %vm4520_vm13, %v4757_v53, 0.0  ;;  %v4763_v53 = vmul.f32 %v10456_v15, %v10456_v15 }
 0x3c1   :  { %v4853_v32 = vadd.f32 %v4852_v40, %v4851_v19  ;;  %v4860_v19 = vsel %vm4520_vm13, %v4758_v41, 0.0  ;;  %v4764_v41 = vmul.f32 %v10460_v34, %v10460_v34 }
 0x3c3   :  { %v4855_v38 = vadd.f32 %v4854_v11, %v4853_v32  ;;  %v4862_v32 = vsel %vm4520_vm13, %v4759_v8, 0.0  ;;  %v4765_v8 = vmul.f32 %v10464_v55, %v10464_v55 }
 0x3c5   :  { %v4857_v61 = vadd.f32 %v4856_v1, %v4855_v38  ;;  %v4864_v38 = vsel %vm4520_vm13, %v4760_v30, 0.0  ;;  %v4766_v30 = vmul.f32 %v10468_v33, %v10468_v33 }
 0x3c7   :  { %v4859_v20 = vadd.f32 %v4858_v23, %v4857_v61  ;;  %v4866_v61 = vsel %vm4520_vm13, %v4761_v2, 0.0  ;;  %v4767_v2 = vmul.f32 %v10472_v44, %v10472_v44 }
 0x3c9   :  { %v4861_v40 = vadd.f32 %v4860_v19, %v4859_v20  ;;  %v4868_v20 = vsel %vm4520_vm13, %v4762_v45, 0.0  ;;  %v4768_v45 = vmul.f32 %v10476_v28, %v10476_v28 }
 0x3cb   :  { %v4863_v11 = vadd.f32 %v4862_v32, %v4861_v40  ;;  %v4870_v40 = vsel %vm4520_vm13, %v4763_v53, 0.0  ;;  %v11660_v53 = vld [vmem:[#allocation9_spill] sm:$0xff] }
 0x3cd   :  { %v4865_v1 = vadd.f32 %v4864_v38, %v4863_v11  ;;  %v4872_v11 = vsel %vm4520_vm13, %v4764_v41, 0.0  ;;  %v11661_v41 = vld [vmem:[#allocation10_spill] sm:$0xff] }
 0x3cf   :  { %v4867_v23 = vadd.f32 %v4866_v61, %v4865_v1  ;;  %v4874_v1 = vsel %vm4520_vm13, %v4765_v8, 0.0  ;;  %v11662_v8 = vld [vmem:[#allocation12_spill] sm:$0xff] }
 0x3d1   :  { %v4869_v19 = vadd.f32 %v4868_v20, %v4867_v23  ;;  %v4876_v23 = vsel %vm4520_vm13, %v4766_v30, 0.0  ;;  %v11663_v30 = vld [vmem:[#allocation14_spill] sm:$0xff] }
 0x3d3   :  { %v4871_v32 = vadd.f32 %v4870_v40, %v4869_v19  ;;  %v4769_v19 = vmul.f32 %v11660_v53, %v11660_v53  ;;  %v4878_v40 = vsel %vm4520_vm13, %v4767_v2, 0.0  ;;  %v11664_v2 = vld [vmem:[#allocation11_spill] sm:$0xff] }
 0x3d5   :  { %v4873_v38 = vadd.f32 %v4872_v11, %v4871_v32  ;;  %v4770_v32 = vmul.f32 %v11661_v41, %v11661_v41  ;;  %v4880_v11 = vsel %vm4520_vm13, %v4768_v45, 0.0  ;;  %v11665_v45 = vld [vmem:[#allocation13_spill] sm:$0xff] }
 0x3d7   :  { %v4875_v61 = vadd.f32 %v4874_v1, %v4873_v38  ;;  %v4771_v38 = vmul.f32 %v11662_v8, %v11662_v8  ;;  %v4882_v1 = vsel %vm4520_vm13, %v4769_v19, 0.0 }
 0x3d9   :  { %v4877_v20 = vadd.f32 %v4876_v23, %v4875_v61  ;;  %v4772_v61 = vmul.f32 %v11663_v30, %v11663_v30  ;;  %v4884_v23 = vsel %vm4520_vm13, %v4770_v32, 0.0 }
 0x3db   :  { %v4879_v33 = vadd.f32 %v4878_v40, %v4877_v20  ;;  %v4773_v20 = vmul.f32 %v11664_v2, %v11664_v2  ;;  %v4886_v40 = vsel %vm4520_vm13, %v4771_v38, 0.0 }
 0x3dd   :  { %v4881_v44 = vadd.f32 %v4880_v11, %v4879_v33  ;;  %v4774_v33 = vmul.f32 %v11665_v45, %v11665_v45  ;;  %v4888_v11 = vsel %vm4520_vm13, %v4772_v61, 0.0  ;;  %v4890_v19 = vsel %vm4520_vm13, %v4773_v20, 0.0  ;;  %v11666_v61 = vld [vmem:[#allocation17_spill] sm:$0xff]  ;;  %v11667_v20 = vld [vmem:[#allocation19_spill] sm:$0xff] }
 0x3df   :  { %v4883_v28 = vadd.f32 %v4882_v1, %v4881_v44  ;;  %v4775_v44 = vmul.f32 %v10504_v35, %v10504_v35  ;;  %v4892_v32 = vsel %vm4520_vm13, %v4774_v33, 0.0  ;;  %v11668_v33 = vld [vmem:[#allocation20_spill] sm:$0xff] }
 0x3e1   :  { %v4885_v53 = vadd.f32 %v4884_v23, %v4883_v28  ;;  %v4776_v28 = vmul.f32 %v10508_v31, %v10508_v31  ;;  %v4894_v38 = vsel %vm4520_vm13, %v4775_v44, 0.0  ;;  %v11669_v44 = vld [vmem:[#allocation25_spill] sm:$0xff] }
 0x3e3   :  { %v4887_v41 = vadd.f32 %v4886_v40, %v4885_v53  ;;  %v4777_v53 = vmul.f32 %v10512_v0, %v10512_v0 }
 0x3e5   :  { %v4889_v8 = vadd.f32 %v4888_v11, %v4887_v41  ;;  %v4778_v41 = vmul.f32 %v11666_v61, %v11666_v61  ;;  %v4896_v11 = vsel %vm4520_vm13, %v4776_v28, 0.0  ;;  %v11670_v28 = vld [vmem:[#allocation26_spill] sm:$0xff] }
 0x3e7   :  { %v4891_v1 = vadd.f32 %v4890_v19, %v4889_v8  ;;  %v4779_v8 = vmul.f32 %v11667_v20, %v11667_v20  ;;  %v4898_v19 = vsel %vm4520_vm13, %v4777_v53, 0.0 }
 0x3e9   :  { %v4893_v23 = vadd.f32 %v4892_v32, %v4891_v1  ;;  %v4780_v1 = vmul.f32 %v11668_v33, %v11668_v33  ;;  %v4900_v32 = vsel %vm4520_vm13, %v4778_v41, 0.0 }
 0x3eb   :  { %v4895_v40 = vadd.f32 %v4894_v38, %v4893_v23  ;;  %v4781_v23 = vmul.f32 %v11669_v44, %v11669_v44  ;;  %v4902_v38 = vsel %vm4520_vm13, %v4779_v8, 0.0 }
 0x3ed   :  { %v4897_v35 = vadd.f32 %v4896_v11, %v4895_v40  ;;  %v4782_v40 = vmul.f32 %v11670_v28, %v11670_v28  ;;  %v4904_v11 = vsel %vm4520_vm13, %v4780_v1, 0.0  ;;  %v4917_v1 = vld [vmem:[%s11548_s2] sm:$0x1]  ;;  %s6692_s2 = smov [#allocation2]  }
 0x3ef   :  { %v4899_v31 = vadd.f32 %v4898_v19, %v4897_v35  ;;  %v4906_v35 = vsel %vm4520_vm13, %v4781_v23, 0.0  ;;  %v4908_v19 = vsel %vm4520_vm13, %v4782_v40, 0.0  ;;  %v11673_v40 = vld [vmem:[#allocation22_spill] sm:$0xff] }
 0x3f1   :  { %v4901_v0 = vadd.f32 %v4900_v32, %v4899_v31 }
 0x3f3   :  { %v4903_v61 = vadd.f32 %v4902_v38, %v4901_v0 }
 0x3f5   :  { %v4905_v20 = vadd.f32 %v4904_v11, %v4903_v61  ;;  %v11671_v61 = vld [vmem:[#allocation5_spill] sm:$0xff] }
 0x3f6   :  { %v4924_v38 = vsub.s32 0, %v11671_v61 }
 0x3f7   :  { %v4907_v53 = vadd.f32 %v4906_v35, %v4905_v20 }
 0x3f9   :  { %v4909_v45 = vadd.f32 %v4908_v19, %v4907_v53  ;;  %v11674_v53 = vld [vmem:[#allocation23_spill] sm:$0xff] }
 0x3fb   :  { %v4910_v41 = vrot.slane %v4909_v45, 4 }
 0x3fd   :  { %v4911_v31 = vadd.f32 %v4910_v41, %v4909_v45  ;;  %v10735_v45 = vld [vmem:[%s11549_s3] ss:$0 sm:$0xff]  ;;  %v11675_v41 = vld [vmem:[#allocation24_spill] sm:$0xff]  ;;  %s5452_s3 = sshll.u32 %s6692_s2, 4  ;;  %s11503_s3 = int_to_ptr.vmem [resolvable:$true] %s5452_s3 }
 0x3fe   :  { %s6658_s22 = scalar_lea.vmem %s11503_s3, 4096  ;;  %p6663_p1 = scmp.lt.s32.totalorder %s11503_s3, %s11503_s3 }
 0x3ff   :  { %v4912_v32 = vrot.slane %v4911_v31, 2  ;;  %p6659_p0 = scmp.ne.s32.totalorder %s11503_s3, %s6658_s22  ;;  %p6664_p2 = scmp.lt.s32.totalorder %s6658_s22, %s6658_s22 }
 0x401   :  { %v4913_v2 = vadd.f32 %v4912_v32, %v4911_v31  ;;  %p6665_p3 = por %p6664_p2, %p6663_p1 }
 0x403   :  { %v4914_v44 = vrot.slane %v4913_v2, 1  ;;  %p6666_p4 = pnand %p6665_p3, %p6659_p0 }
 0x405   :  { %v4915_v30 = vadd.f32 %v4914_v44, %v4913_v2  ;;  %v11672_v2 = vld [vmem:[#allocation21_spill] sm:$0xff] }
 0x407   :  { %v4916_v8 = vmul.f32 0.001953125, %v4915_v30 }
 0x409   :  { %v4918_v0 = vadd.f32 1e-05, %v4916_v8 }
 0x40b   :  { %6656 = vrsqrt.f32 %v4918_v0 }
 0x415   :  { %v6657_v23 = vpop.eup %6656 }
 0x416   :  { %v4920_v20 = vmul.f32 %v6657_v23, %v4917_v1 }
 0x418   :  { %v10730_v11 = vrot.slane %v4920_v20, %v4924_v38  ;;  %v11676_v20 = vld [vmem:[#allocation6_spill] sm:$0xff] }
 0x41a   :  { %v4988_v30 = vmul.f32 %v10730_v11, %v11668_v33  ;;  %v10741_v44 = vmul.f32 %v10730_v11, %v11672_v2  ;;  %v10745_v35 = vmul.f32 %v10730_v11, %v11673_v40  ;;  %v10749_v19 = vmul.f32 %v10730_v11, %v11674_v53  ;;  %v11678_v2 = vld [vmem:[#allocation7_spill] sm:$0xff]  ;;  %v11679_v40 = vld [vmem:[#allocation9_spill] sm:$0xff]  ;;  %v11681_v53 = vld [vmem:[#allocation10_spill] sm:$0xff] }
 0x41b   :  { %v10753_v31 = vmul.f32 %v10730_v11, %v11675_v41  ;;  %v10757_v32 = vmul.f32 %v10730_v11, %v10296_v51  ;;  %v10761_v33 = vmul.f32 %v10730_v11, %v10300_v14  ;;  %v10765_v8 = vmul.f32 %v10730_v11, %v10304_v42  ;;  %v11683_v41 = vld [vmem:[#allocation12_spill] sm:$0xff] }
 0x41c   :  { %v5059_v0 = vadd.f32 %v10735_v45, %v4988_v30  ;;  %v10770_v1 = vmul.f32 %v10730_v11, %v10308_v47  ;;  %v10774_v61 = vmul.f32 %v10730_v11, %v10312_v37  ;;  %v10778_v51 = vmul.f32 %v10730_v11, %v10316_v60  ;;  %v11677_v30 = vld [vmem:[#allocation8_spill] sm:$0xff] }
 0x41d   :  { %v10782_v14 = vmul.f32 %v10730_v11, %v10320_v3  ;;  %v10786_v42 = vmul.f32 %v10730_v11, %v10324_v6  ;;  %v10790_v47 = vmul.f32 %v10730_v11, %v10328_v24  ;;  %v10794_v37 = vmul.f32 %v10730_v11, %v10332_v25 }
 0x41e   :  { %v5123_v38 = vmax.f32 %v5059_v0, 0.0  ;;  %v10798_v60 = vmul.f32 %v10730_v11, %v10336_v26  ;;  %v10802_v3 = vmul.f32 %v10730_v11, %v10340_v16  ;;  %v10806_v6 = vmul.f32 %v10730_v11, %v10344_v36 }
 0x41f   :  { %v10810_v24 = vmul.f32 %v10730_v11, %v10348_v13  ;;  %v10814_v25 = vmul.f32 %v10730_v11, %v10352_v29  ;;  %v10818_v26 = vmul.f32 %v10730_v11, %v10356_v46  ;;  %v10822_v16 = vmul.f32 %v10730_v11, %v10360_v7 }
 0x420   :  { %v6246_v23 = vpack.c.bf16 %v5123_v38, %v5123_v38  ;;  %v10826_v36 = vmul.f32 %v10730_v11, %v10364_v22  ;;  %v10830_v13 = vmul.f32 %v10730_v11, %v10368_v52  ;;  %v10834_v29 = vmul.f32 %v10730_v11, %v10372_v4  ;;  %v11685_v38 = vld [vmem:[#allocation14_spill] sm:$0xff] }
 0x421   :  { %v10838_v46 = vmul.f32 %v10730_v11, %v10376_v50  ;;  %v10842_v7 = vmul.f32 %v10730_v11, %v10380_v63  ;;  %v10846_v22 = vmul.f32 %v10730_v11, %v10384_v56  ;;  %v10850_v52 = vmul.f32 %v10730_v11, %v10388_v27 }
 0x422   :  { %5444 = vst.msk [vmem:[#allocation2 + $0xf4] sm:$0xf] %vm5382_vm14, %v6246_v23  ;;  %v10855_v4 = vmul.f32 %v10730_v11, %v10392_v59  ;;  %v10859_v50 = vmul.f32 %v10730_v11, %v10396_v5  ;;  %v10863_v63 = vmul.f32 %v10730_v11, %v10400_v62  ;;  %v10867_v56 = vmul.f32 %v10730_v11, %v10404_v57 }
 0x423   :  { %v10871_v27 = vmul.f32 %v10730_v11, %v10408_v21  ;;  %v10875_v59 = vmul.f32 %v10730_v11, %v10412_v48  ;;  %v10879_v5 = vmul.f32 %v10730_v11, %v10416_v49  ;;  %v10883_v62 = vmul.f32 %v10730_v11, %v10420_v58 }
 0x424   :  { %v10887_v57 = vmul.f32 %v10730_v11, %v10424_v17  ;;  %v10891_v21 = vmul.f32 %v10730_v11, %v10428_v10  ;;  %v10895_v48 = vmul.f32 %v10730_v11, %v10432_v12  ;;  %v10899_v49 = vmul.f32 %v10730_v11, %v10436_v54 }
 0x425   :  { %v10903_v58 = vmul.f32 %v10730_v11, %v10440_v39  ;;  %v10907_v17 = vmul.f32 %v10730_v11, %v10444_v18  ;;  %v10911_v10 = vmul.f32 %v10730_v11, %v10448_v43  ;;  %v10915_v12 = vmul.f32 %v10730_v11, %v10452_v9 }
 0x426   :  { %v10919_v54 = vmul.f32 %v10730_v11, %v10456_v15  ;;  %v10923_v39 = vmul.f32 %v10730_v11, %v10460_v34  ;;  %v10927_v18 = vmul.f32 %v10730_v11, %v10464_v55  ;;  %v10931_v43 = vmul.f32 %v10730_v11, %v11676_v20  ;;  %v11687_v20 = vld [vmem:[#allocation11_spill] sm:$0xff] }
 0x427   :  { %v10935_v9 = vmul.f32 %v10730_v11, %v11677_v30  ;;  %v10939_v15 = vmul.f32 %v10730_v11, %v11678_v2  ;;  %v10943_v34 = vmul.f32 %v10730_v11, %v11679_v40  ;;  %v10947_v55 = vmul.f32 %v10730_v11, %v11681_v53  ;;  %v11689_v2 = vld [vmem:[#allocation13_spill] sm:$0xff] }
 0x428   :  { %v10951_v0 = vmul.f32 %v10730_v11, %v11683_v41  ;;  %v10955_v23 = vmul.f32 %v10730_v11, %v11685_v38  ;;  %v10959_v30 = vmul.f32 %v10730_v11, %v11687_v20  ;;  %v10963_v40 = vmul.f32 %v10730_v11, %v11689_v2 }
 0x429   :  { %11680 = vst [vmem:[#allocation20_spill] sm:$0xff] %v10943_v34  ;;  %11682 = vst [vmem:[#allocation26_spill] sm:$0xff] %v10947_v55  ;;  %v11691_v34 = vld [vmem:[#allocation16_spill] sm:$0xff]  ;;  %v11692_v55 = vld [vmem:[#allocation18_spill] sm:$0xff] }
 0x42a   :  { %11684 = vst [vmem:[#allocation5_spill] sm:$0xff] %v10951_v0  ;;  %11686 = vst [vmem:[#allocation21_spill] sm:$0xff] %v10955_v23  ;;  %v10967_v53 = vmul.f32 %v10730_v11, %v11691_v34  ;;  %v10971_v41 = vmul.f32 %v10730_v11, %v11692_v55  ;;  %v11693_v0 = vld [vmem:[#allocation15_spill] sm:$0xff]  ;;  %v11694_v23 = vld [vmem:[#allocation17_spill] sm:$0xff]  ;;  %v10991_v55 = vmul.f32 %v10730_v11, %v11670_v28 }
 0x42b   :  { %11688 = vst [vmem:[#allocation22_spill] sm:$0xff] %v10959_v30  ;;  %11690 = vst [vmem:[#allocation23_spill] sm:$0xff] %v10963_v40  ;;  %v10975_v38 = vmul.f32 %v10730_v11, %v11693_v0  ;;  %v10979_v20 = vmul.f32 %v10730_v11, %v11694_v23  ;;  %v11695_v30 = vld [vmem:[#allocation19_spill] sm:$0xff]  ;;  %v11696_v40 = vld [vmem:[#allocation25_spill] sm:$0xff]  ;;  %v10995_v0 = vadd.f32 %v10735_v45, %v10741_v44 }
 0x42c   :  { %v10983_v2 = vmul.f32 %v10730_v11, %v11695_v30  ;;  %v10987_v34 = vmul.f32 %v10730_v11, %v11696_v40  ;;  %v10999_v23 = vadd.f32 %v10735_v45, %v10745_v35  ;;  %v11003_v30 = vadd.f32 %v10735_v45, %v10749_v19 }
 0x42d   :  { %v11007_v40 = vadd.f32 %v10735_v45, %v10753_v31  ;;  %v11011_v28 = vadd.f32 %v10735_v45, %v10757_v32  ;;  %v11015_v11 = vadd.f32 %v10735_v45, %v10761_v33  ;;  %v11019_v44 = vadd.f32 %v10735_v45, %v10765_v8 }
 0x42e   :  { %v11023_v35 = vadd.f32 %v10735_v45, %v10770_v1  ;;  %v11027_v19 = vadd.f32 %v10735_v45, %v10774_v61  ;;  %v11031_v31 = vadd.f32 %v10735_v45, %v10778_v51  ;;  %v11035_v32 = vadd.f32 %v10735_v45, %v10782_v14 }
 0x42f   :  { %v11039_v33 = vadd.f32 %v10735_v45, %v10786_v42  ;;  %v11043_v8 = vadd.f32 %v10735_v45, %v10790_v47  ;;  %v11047_v1 = vadd.f32 %v10735_v45, %v10794_v37  ;;  %v11051_v61 = vadd.f32 %v10735_v45, %v10798_v60 }
 0x430   :  { %v11055_v51 = vadd.f32 %v10735_v45, %v10802_v3  ;;  %v11059_v14 = vadd.f32 %v10735_v45, %v10806_v6  ;;  %v11063_v42 = vadd.f32 %v10735_v45, %v10810_v24  ;;  %v11067_v47 = vadd.f32 %v10735_v45, %v10814_v25 }
 0x431   :  { %v11071_v37 = vadd.f32 %v10735_v45, %v10818_v26  ;;  %v11075_v60 = vadd.f32 %v10735_v45, %v10822_v16  ;;  %v11079_v3 = vadd.f32 %v10735_v45, %v10826_v36  ;;  %v11083_v6 = vadd.f32 %v10735_v45, %v10830_v13 }
 0x432   :  { %v11087_v24 = vadd.f32 %v10735_v45, %v10834_v29  ;;  %v11091_v25 = vadd.f32 %v10735_v45, %v10838_v46  ;;  %v11095_v26 = vadd.f32 %v10735_v45, %v10842_v7  ;;  %v11099_v16 = vadd.f32 %v10735_v45, %v10846_v22 }
 0x433   :  { %v11103_v36 = vadd.f32 %v10735_v45, %v10850_v52  ;;  %v11107_v13 = vadd.f32 %v10735_v45, %v10855_v4  ;;  %v11111_v29 = vadd.f32 %v10735_v45, %v10859_v50  ;;  %v11115_v46 = vadd.f32 %v10735_v45, %v10863_v63 }
 0x434   :  { %v11119_v7 = vadd.f32 %v10735_v45, %v10867_v56  ;;  %v11123_v22 = vadd.f32 %v10735_v45, %v10871_v27  ;;  %v11127_v52 = vadd.f32 %v10735_v45, %v10875_v59  ;;  %v11131_v4 = vadd.f32 %v10735_v45, %v10879_v5 }
 0x435   :  { %v11135_v50 = vadd.f32 %v10735_v45, %v10883_v62  ;;  %v11139_v63 = vadd.f32 %v10735_v45, %v10887_v57  ;;  %v11143_v56 = vadd.f32 %v10735_v45, %v10891_v21  ;;  %v11147_v27 = vadd.f32 %v10735_v45, %v10895_v48 }
 0x436   :  { %v11151_v59 = vadd.f32 %v10735_v45, %v10899_v49  ;;  %v11155_v5 = vadd.f32 %v10735_v45, %v10903_v58  ;;  %v11159_v62 = vadd.f32 %v10735_v45, %v10907_v17  ;;  %v11163_v57 = vadd.f32 %v10735_v45, %v10911_v10 }
 0x437   :  { %11697 = vst [vmem:[#allocation24_spill] sm:$0xff] %v11135_v50  ;;  %11698 = vst [vmem:[#allocation6_spill] sm:$0xff] %v11139_v63  ;;  %v11167_v21 = vadd.f32 %v10735_v45, %v10915_v12  ;;  %v11171_v48 = vadd.f32 %v10735_v45, %v10919_v54  ;;  %v11175_v49 = vadd.f32 %v10735_v45, %v10923_v39  ;;  %v11706_v54 = vld [vmem:[#allocation20_spill] sm:$0xff] }
 0x438   :  { %11699 = vst [vmem:[#allocation8_spill] sm:$0xff] %v11143_v56  ;;  %11700 = vst [vmem:[#allocation7_spill] sm:$0xff] %v11147_v27  ;;  %v11179_v58 = vadd.f32 %v10735_v45, %v10927_v18  ;;  %v11183_v17 = vadd.f32 %v10735_v45, %v10931_v43  ;;  %v11187_v10 = vadd.f32 %v10735_v45, %v10935_v9 }
 0x439   :  { %11701 = vst [vmem:[#allocation9_spill] sm:$0xff] %v11175_v49  ;;  %v11191_v12 = vadd.f32 %v10735_v45, %v10939_v15  ;;  %v11195_v39 = vadd.f32 %v10735_v45, %v11706_v54  ;;  %v11708_v49 = vld [vmem:[#allocation26_spill] sm:$0xff] }
 0x43a   :  { %11702 = vst [vmem:[#allocation10_spill] sm:$0xff] %v11179_v58  ;;  %11703 = vst [vmem:[#allocation12_spill] sm:$0xff] %v11183_v17  ;;  %v11199_v18 = vadd.f32 %v10735_v45, %v11708_v49  ;;  %v11709_v58 = vld [vmem:[#allocation5_spill] sm:$0xff]  ;;  %v11219_v49 = vadd.f32 %v10735_v45, %v10967_v53  ;;  %v11239_v53 = vadd.f32 %v10735_v45, %v10987_v34  ;;  %v5069_v34 = vmax.f32 %v11023_v35, 0.0 }
 0x43b   :  { %11704 = vst [vmem:[#allocation14_spill] sm:$0xff] %v11187_v10  ;;  %11705 = vst [vmem:[#allocation11_spill] sm:$0xff] %v11191_v12  ;;  %v11203_v43 = vadd.f32 %v10735_v45, %v11709_v58  ;;  %v11711_v17 = vld [vmem:[#allocation21_spill] sm:$0xff]  ;;  %v11713_v10 = vld [vmem:[#allocation22_spill] sm:$0xff]  ;;  %v11223_v58 = vadd.f32 %v10735_v45, %v10971_v41  ;;  %v11243_v41 = vadd.f32 %v10735_v45, %v10991_v55  ;;  %v5072_v55 = vmax.f32 %v11035_v32, 0.0 }
 0x43c   :  { %11707 = vst [vmem:[#allocation13_spill] sm:$0xff] %v11195_v39  ;;  %v11207_v9 = vadd.f32 %v10735_v45, %v11711_v17  ;;  %v11211_v15 = vadd.f32 %v10735_v45, %v11713_v10  ;;  %v11715_v12 = vld [vmem:[#allocation23_spill] sm:$0xff]  ;;  %11717 = vst [vmem:[#allocation19_spill] sm:$0xff] %v11219_v49  ;;  %v11227_v17 = vadd.f32 %v10735_v45, %v10975_v38  ;;  %v5063_v38 = vmax.f32 %v10999_v23, 0.0 }
 0x43d   :  { %11710 = vst [vmem:[#allocation16_spill] sm:$0xff] %v11203_v43  ;;  %v11215_v54 = vadd.f32 %v10735_v45, %v11715_v12  ;;  %11718 = vst [vmem:[#allocation25_spill] sm:$0xff] %v11223_v58  ;;  %v11231_v10 = vadd.f32 %v10735_v45, %v10979_v20  ;;  %v11235_v12 = vadd.f32 %v10735_v45, %v10983_v2  ;;  %v5062_v58 = vmax.f32 %v10995_v0, 0.0 }
 0x43e   :  { %11712 = vst [vmem:[#allocation18_spill] sm:$0xff] %v11207_v9  ;;  %11714 = vst [vmem:[#allocation15_spill] sm:$0xff] %v11211_v15  ;;  %v5065_v20 = vmax.f32 %v11007_v40, 0.0  ;;  %v5067_v2 = vmax.f32 %v11015_v11, 0.0  ;;  %v5071_v45 = vmax.f32 %v11031_v31, 0.0  ;;  %v5125_v23 = vmax.f32 %v11243_v41, 0.0 }
 0x43f   :  { %11716 = vst [vmem:[#allocation17_spill] sm:$0xff] %v11215_v54  ;;  %11719 = vst [vmem:[#allocation20_spill] sm:$0xff] %v11227_v17  ;;  %v5064_v17 = vmax.f32 %v11003_v30, 0.0  ;;  %v6185_v43 = vpack.c.bf16 %v5062_v58, %v5062_v58  ;;  %v6186_v30 = vpack.c.bf16 %v5063_v38, %v5063_v38  ;;  %v6192_v11 = vpack.c.bf16 %v5069_v34, %v5069_v34 }
 0x440   :  { %11720 = vst [vmem:[#allocation26_spill] sm:$0xff] %v11231_v10  ;;  %11721 = vst [vmem:[#allocation5_spill] sm:$0xff] %v11235_v12  ;;  %v5066_v10 = vmax.f32 %v11011_v28, 0.0  ;;  %v5068_v12 = vmax.f32 %v11019_v44, 0.0  ;;  %v11723_v0 = vld [vmem:[#allocation9_spill] sm:$0xff]  ;;  %v6188_v40 = vpack.c.bf16 %v5065_v20, %v5065_v20  ;;  %v6190_v28 = vpack.c.bf16 %v5067_v2, %v5067_v2 }
 0x441   :  { %11722 = vst [vmem:[#allocation21_spill] sm:$0xff] %v11239_v53  ;;  %v5070_v53 = vmax.f32 %v11027_v19, 0.0  ;;  %v6187_v9 = vpack.c.bf16 %v5064_v17, %v5064_v17  ;;  %v6194_v44 = vpack.c.bf16 %v5071_v45, %v5071_v45  ;;  %v6195_v50 = vpack.c.bf16 %v5072_v55, %v5072_v55  ;;  %5383 = vst.msk [vmem:[#allocation2] sm:$0xf] %vm5382_vm14, %v6185_v43 }
 0x442   :  { %v6189_v15 = vpack.c.bf16 %v5066_v10, %v5066_v10  ;;  %v6191_v54 = vpack.c.bf16 %v5068_v12, %v5068_v12  ;;  %5384 = vst.msk [vmem:[#allocation2 + $0x4] sm:$0xf] %vm5382_vm14, %v6186_v30  ;;  %v11733_v32 = vmax.f32 %v11039_v33, 0.0  ;;  %v11734_v17 = vmax.f32 %v11043_v8, 0.0  ;;  %5386 = vst.msk [vmem:[#allocation2 + $0xc] sm:$0xf] %vm5382_vm14, %v6188_v40 }
 0x443   :  { %v6193_v49 = vpack.c.bf16 %v5070_v53, %v5070_v53  ;;  %5385 = vst.msk [vmem:[#allocation2 + $0x8] sm:$0xf] %vm5382_vm14, %v6187_v9  ;;  %v11735_v12 = vmax.f32 %v11047_v1, 0.0  ;;  %v11736_v38 = vmax.f32 %v11051_v61, 0.0  ;;  %5388 = vst.msk [vmem:[#allocation2 + $0x14] sm:$0xf] %vm5382_vm14, %v6190_v28 }
 0x444   :  { %v6196_v58 = vpack.c.bf16 %v11733_v32, %v11733_v32  ;;  %v6197_v10 = vpack.c.bf16 %v11734_v17, %v11734_v17  ;;  %5387 = vst.msk [vmem:[#allocation2 + $0x10] sm:$0xf] %vm5382_vm14, %v6189_v15  ;;  %5389 = vst.msk [vmem:[#allocation2 + $0x18] sm:$0xf] %vm5382_vm14, %v6191_v54  ;;  %v11737_v33 = vmax.f32 %v11055_v51, 0.0  ;;  %v11738_v1 = vmax.f32 %v11059_v14, 0.0 }
 0x445   :  { %v6198_v53 = vpack.c.bf16 %v11735_v12, %v11735_v12  ;;  %v6199_v43 = vpack.c.bf16 %v11736_v38, %v11736_v38  ;;  %v11739_v61 = vmax.f32 %v11063_v42, 0.0  ;;  %v11740_v2 = vmax.f32 %v11067_v47, 0.0  ;;  %5390 = vst.msk [vmem:[#allocation2 + $0x1c] sm:$0xf] %vm5382_vm14, %v6192_v11  ;;  %5391 = vst.msk [vmem:[#allocation2 + $0x20] sm:$0xf] %vm5382_vm14, %v6193_v49 }
 0x446   :  { %v11729_v63 = vld [vmem:[#allocation20_spill] sm:$0xff]  ;;  %v6200_v8 = vpack.c.bf16 %v11737_v33, %v11737_v33  ;;  %v6201_v9 = vpack.c.bf16 %v11738_v1, %v11738_v1  ;;  %5392 = vst.msk [vmem:[#allocation2 + $0x24] sm:$0xf] %vm5382_vm14, %v6194_v44  ;;  %5393 = vst.msk [vmem:[#allocation2 + $0x28] sm:$0xf] %vm5382_vm14, %v6195_v50  ;;  %v11741_v51 = vmax.f32 %v11071_v37, 0.0 }
 0x447   :  { %v5120_v35 = vmax.f32 %v11729_v63, 0.0  ;;  %v11730_v56 = vld [vmem:[#allocation26_spill] sm:$0xff]  ;;  %v11731_v27 = vld [vmem:[#allocation5_spill] sm:$0xff]  ;;  %v6202_v20 = vpack.c.bf16 %v11739_v61, %v11739_v61  ;;  %v6203_v15 = vpack.c.bf16 %v11740_v2, %v11740_v2  ;;  %v11742_v42 = vmax.f32 %v11075_v60, 0.0  ;;  %5394 = vst.msk [vmem:[#allocation2 + $0x2c] sm:$0xf] %vm5382_vm14, %v6196_v58 }
 0x448   :  { %v5121_v19 = vmax.f32 %v11730_v56, 0.0  ;;  %v5122_v31 = vmax.f32 %v11731_v27, 0.0  ;;  %v11732_v39 = vld [vmem:[#allocation21_spill] sm:$0xff]  ;;  %v6204_v14 = vpack.c.bf16 %v11741_v51, %v11741_v51  ;;  %v11743_v47 = vmax.f32 %v11079_v3, 0.0  ;;  %5395 = vst.msk [vmem:[#allocation2 + $0x30] sm:$0xf] %vm5382_vm14, %v6197_v10 }
 0x449   :  { %v6205_v54 = vpack.c.bf16 %v11742_v42, %v11742_v42  ;;  %v11744_v45 = vmax.f32 %v11083_v6, 0.0  ;;  %5396 = vst.msk [vmem:[#allocation2 + $0x34] sm:$0xf] %vm5382_vm14, %v6198_v53  ;;  %5397 = vst.msk [vmem:[#allocation2 + $0x38] sm:$0xf] %vm5382_vm14, %v6199_v43  ;;  %v11745_v37 = vmax.f32 %v11087_v24, 0.0 }
 0x44a   :  { %v6206_v34 = vpack.c.bf16 %v11743_v47, %v11743_v47  ;;  %v11746_v3 = vmax.f32 %v11091_v25, 0.0  ;;  %v11747_v6 = vmax.f32 %v11095_v26, 0.0  ;;  %v11748_v30 = vmax.f32 %v11099_v16, 0.0  ;;  %5398 = vst.msk [vmem:[#allocation2 + $0x3c] sm:$0xf] %vm5382_vm14, %v6200_v8  ;;  %v11759_v38 = vld [vmem:[#allocation6_spill] sm:$0xff] }
 0x44b   :  { %v6207_v49 = vpack.c.bf16 %v11744_v45, %v11744_v45  ;;  %v6208_v60 = vpack.c.bf16 %v11745_v37, %v11745_v37  ;;  %5399 = vst.msk [vmem:[#allocation2 + $0x40] sm:$0xf] %vm5382_vm14, %v6201_v9  ;;  %5400 = vst.msk [vmem:[#allocation2 + $0x44] sm:$0xf] %vm5382_vm14, %v6202_v20  ;;  %v11749_v24 = vmax.f32 %v11103_v36, 0.0  ;;  %v11750_v26 = vmax.f32 %v11107_v13, 0.0 }
 0x44c   :  { %v6209_v50 = vpack.c.bf16 %v11746_v3, %v11746_v3  ;;  %v6210_v55 = vpack.c.bf16 %v11747_v6, %v11747_v6  ;;  %v6211_v40 = vpack.c.bf16 %v11748_v30, %v11748_v30  ;;  %5401 = vst.msk [vmem:[#allocation2 + $0x48] sm:$0xf] %vm5382_vm14, %v6203_v15  ;;  %v11751_v16 = vmax.f32 %v11111_v29, 0.0  ;;  %5402 = vst.msk [vmem:[#allocation2 + $0x4c] sm:$0xf] %vm5382_vm14, %v6204_v14  ;;  %v11761_v33 = vld [vmem:[#allocation8_spill] sm:$0xff] }
 0x44d   :  { %v6212_v25 = vpack.c.bf16 %v11749_v24, %v11749_v24  ;;  %v6213_v28 = vpack.c.bf16 %v11750_v26, %v11750_v26  ;;  %v11752_v44 = vmax.f32 %v11115_v46, 0.0  ;;  %5403 = vst.msk [vmem:[#allocation2 + $0x50] sm:$0xf] %vm5382_vm14, %v6205_v54  ;;  %5404 = vst.msk [vmem:[#allocation2 + $0x54] sm:$0xf] %vm5382_vm14, %v6206_v34  ;;  %v11753_v36 = vmax.f32 %v11119_v7, 0.0 }
 0x44e   :  { %v6214_v11 = vpack.c.bf16 %v11751_v16, %v11751_v16  ;;  %5405 = vst.msk [vmem:[#allocation2 + $0x58] sm:$0xf] %vm5382_vm14, %v6207_v49  ;;  %v11754_v29 = vmax.f32 %v11123_v22, 0.0  ;;  %v11755_v46 = vmax.f32 %v11127_v52, 0.0  ;;  %v11756_v10 = vmax.f32 %v11131_v4, 0.0  ;;  %v11757_v7 = vld [vmem:[#allocation24_spill] sm:$0xff] }
 0x44f   :  { %v6215_v32 = vpack.c.bf16 %v11752_v44, %v11752_v44  ;;  %v6216_v13 = vpack.c.bf16 %v11753_v36, %v11753_v36  ;;  %5406 = vst.msk [vmem:[#allocation2 + $0x5c] sm:$0xf] %vm5382_vm14, %v6208_v60  ;;  %5407 = vst.msk [vmem:[#allocation2 + $0x60] sm:$0xf] %vm5382_vm14, %v6209_v50  ;;  %v11758_v22 = vmax.f32 %v11757_v7, 0.0  ;;  %v11760_v52 = vmax.f32 %v11759_v38, 0.0 }
 0x450   :  { %v6217_v58 = vpack.c.bf16 %v11754_v29, %v11754_v29  ;;  %v6218_v17 = vpack.c.bf16 %v11755_v46, %v11755_v46  ;;  %v6219_v12 = vpack.c.bf16 %v11756_v10, %v11756_v10  ;;  %5408 = vst.msk [vmem:[#allocation2 + $0x64] sm:$0xf] %vm5382_vm14, %v6210_v55  ;;  %5409 = vst.msk [vmem:[#allocation2 + $0x68] sm:$0xf] %vm5382_vm14, %v6211_v40  ;;  %v11762_v4 = vmax.f32 %v11761_v33, 0.0  ;;  %v11763_v1 = vld [vmem:[#allocation7_spill] sm:$0xff] }
 0x451   :  { %v6220_v53 = vpack.c.bf16 %v11758_v22, %v11758_v22  ;;  %v6221_v43 = vpack.c.bf16 %v11760_v52, %v11760_v52  ;;  %v11764_v9 = vmax.f32 %v11763_v1, 0.0  ;;  %5410 = vst.msk [vmem:[#allocation2 + $0x6c] sm:$0xf] %vm5382_vm14, %v6212_v25  ;;  %5411 = vst.msk [vmem:[#allocation2 + $0x70] sm:$0xf] %vm5382_vm14, %v6213_v28  ;;  %v11765_v20 = vmax.f32 %v11151_v59, 0.0 }
 0x452   :  { %v6222_v8 = vpack.c.bf16 %v11762_v4, %v11762_v4  ;;  %5412 = vst.msk [vmem:[#allocation2 + $0x74] sm:$0xf] %vm5382_vm14, %v6214_v11  ;;  %5413 = vst.msk [vmem:[#allocation2 + $0x78] sm:$0xf] %vm5382_vm14, %v6215_v32  ;;  %v11766_v15 = vmax.f32 %v11155_v5, 0.0  ;;  %v11767_v14 = vmax.f32 %v11159_v62, 0.0  ;;  %v6243_v33 = vpack.c.bf16 %v5120_v35, %v5120_v35 }
 0x453   :  { %v6223_v61 = vpack.c.bf16 %v11764_v9, %v11764_v9  ;;  %v6224_v2 = vpack.c.bf16 %v11765_v20, %v11765_v20  ;;  %v11768_v54 = vmax.f32 %v11163_v57, 0.0  ;;  %5414 = vst.msk [vmem:[#allocation2 + $0x7c] sm:$0xf] %vm5382_vm14, %v6216_v13  ;;  %5415 = vst.msk [vmem:[#allocation2 + $0x80] sm:$0xf] %vm5382_vm14, %v6217_v58  ;;  %v11769_v59 = vmax.f32 %v11167_v21, 0.0 }
 0x454   :  { %v6225_v51 = vpack.c.bf16 %v11766_v15, %v11766_v15  ;;  %v6226_v42 = vpack.c.bf16 %v11767_v14, %v11767_v14  ;;  %5416 = vst.msk [vmem:[#allocation2 + $0x84] sm:$0xf] %vm5382_vm14, %v6218_v17  ;;  %5417 = vst.msk [vmem:[#allocation2 + $0x88] sm:$0xf] %vm5382_vm14, %v6219_v12  ;;  %v11770_v62 = vmax.f32 %v11171_v48, 0.0  ;;  %v11771_v57 = vmax.f32 %v11723_v0, 0.0 }
 0x455   :  { %v6227_v47 = vpack.c.bf16 %v11768_v54, %v11768_v54  ;;  %v6228_v5 = vpack.c.bf16 %v11769_v59, %v11769_v59  ;;  %v11772_v49 = vld [vmem:[#allocation10_spill] sm:$0xff]  ;;  %5418 = vst.msk [vmem:[#allocation2 + $0x8c] sm:$0xf] %vm5382_vm14, %v6220_v53  ;;  %5419 = vst.msk [vmem:[#allocation2 + $0x90] sm:$0xf] %vm5382_vm14, %v6221_v43  ;;  %v11774_v21 = vld [vmem:[#allocation12_spill] sm:$0xff]  ;;  %v6244_v4 = vpack.c.bf16 %v5121_v19, %v5121_v19 }
 0x456   :  { %v6229_v34 = vpack.c.bf16 %v11770_v62, %v11770_v62  ;;  %v6230_v45 = vpack.c.bf16 %v11771_v57, %v11771_v57  ;;  %v11773_v37 = vmax.f32 %v11772_v49, 0.0  ;;  %5420 = vst.msk [vmem:[#allocation2 + $0x94] sm:$0xf] %vm5382_vm14, %v6222_v8  ;;  %5421 = vst.msk [vmem:[#allocation2 + $0x98] sm:$0xf] %vm5382_vm14, %v6223_v61  ;;  %v11775_v48 = vmax.f32 %v11774_v21, 0.0 }
 0x457   :  { %v11776_v3 = vld [vmem:[#allocation14_spill] sm:$0xff]  ;;  %v11778_v55 = vld [vmem:[#allocation11_spill] sm:$0xff]  ;;  %v11780_v24 = vld [vmem:[#allocation13_spill] sm:$0xff]  ;;  %5422 = vst.msk [vmem:[#allocation2 + $0x9c] sm:$0xf] %vm5382_vm14, %v6224_v2  ;;  %v11782_v28 = vmax.f32 %v11199_v18, 0.0  ;;  %v6245_v63 = vpack.c.bf16 %v5122_v31, %v5122_v31  ;;  %v6248_v1 = vpack.c.bf16 %v5125_v23, %v5125_v23 }
 0x458   :  { %v6231_v60 = vpack.c.bf16 %v11773_v37, %v11773_v37  ;;  %v6232_v0 = vpack.c.bf16 %v11775_v48, %v11775_v48  ;;  %v11777_v50 = vmax.f32 %v11776_v3, 0.0  ;;  %v11779_v30 = vmax.f32 %v11778_v55, 0.0  ;;  %5423 = vst.msk [vmem:[#allocation2 + $0xa0] sm:$0xf] %vm5382_vm14, %v6225_v51  ;;  %5424 = vst.msk [vmem:[#allocation2 + $0xa4] sm:$0xf] %vm5382_vm14, %v6226_v42 }
 0x459   :  { %v11781_v25 = vmax.f32 %v11780_v24, 0.0  ;;  %5425 = vst.msk [vmem:[#allocation2 + $0xa8] sm:$0xf] %vm5382_vm14, %v6227_v47  ;;  %v6236_v16 = vpack.c.bf16 %v11782_v28, %v11782_v28  ;;  %v11783_v11 = vld [vmem:[#allocation16_spill] sm:$0xff]  ;;  %v11785_v36 = vld [vmem:[#allocation18_spill] sm:$0xff]  ;;  %v11787_v58 = vld [vmem:[#allocation15_spill] sm:$0xff] }
 0x45a   :  { %v6233_v6 = vpack.c.bf16 %v11777_v50, %v11777_v50  ;;  %v6234_v40 = vpack.c.bf16 %v11779_v30, %v11779_v30  ;;  %v11784_v44 = vmax.f32 %v11783_v11, 0.0  ;;  %v11786_v13 = vmax.f32 %v11785_v36, 0.0  ;;  %5426 = vst.msk [vmem:[#allocation2 + $0xac] sm:$0xf] %vm5382_vm14, %v6228_v5  ;;  %5427 = vst.msk [vmem:[#allocation2 + $0xb0] sm:$0xf] %vm5382_vm14, %v6229_v34 }
 0x45b   :  { %v6235_v26 = vpack.c.bf16 %v11781_v25, %v11781_v25  ;;  %v11788_v46 = vmax.f32 %v11787_v58, 0.0  ;;  %5428 = vst.msk [vmem:[#allocation2 + $0xb4] sm:$0xf] %vm5382_vm14, %v6230_v45  ;;  %5429 = vst.msk [vmem:[#allocation2 + $0xb8] sm:$0xf] %vm5382_vm14, %v6231_v60  ;;  %v11789_v18 = vld [vmem:[#allocation17_spill] sm:$0xff] }
 0x45c   :  { %v6237_v32 = vpack.c.bf16 %v11784_v44, %v11784_v44  ;;  %v6238_v29 = vpack.c.bf16 %v11786_v13, %v11786_v13  ;;  %v11790_v10 = vmax.f32 %v11789_v18, 0.0  ;;  %v11791_v7 = vld [vmem:[#allocation19_spill] sm:$0xff]  ;;  %v11793_v38 = vld [vmem:[#allocation25_spill] sm:$0xff]  ;;  %5430 = vst.msk [vmem:[#allocation2 + $0xbc] sm:$0xf] %vm5382_vm14, %v6232_v0  ;;  %v11795_v35 = vmax.f32 %v11732_v39, 0.0 }
 0x45d   :  { %v6239_v17 = vpack.c.bf16 %v11788_v46, %v11788_v46  ;;  %v11792_v22 = vmax.f32 %v11791_v7, 0.0  ;;  %v11794_v52 = vmax.f32 %v11793_v38, 0.0  ;;  %5431 = vst.msk [vmem:[#allocation2 + $0xc0] sm:$0xf] %vm5382_vm14, %v6233_v6  ;;  %5432 = vst.msk [vmem:[#allocation2 + $0xc4] sm:$0xf] %vm5382_vm14, %v6234_v40 }
 0x45e   :  { %v6240_v12 = vpack.c.bf16 %v11790_v10, %v11790_v10  ;;  %5433 = vst.msk [vmem:[#allocation2 + $0xc8] sm:$0xf] %vm5382_vm14, %v6235_v26  ;;  %v6247_v8 = vpack.c.bf16 %v11795_v35, %v11795_v35  ;;  %5434 = vst.msk [vmem:[#allocation2 + $0xcc] sm:$0xf] %vm5382_vm14, %v6236_v16 }
 0x45f   :  { %v6241_v53 = vpack.c.bf16 %v11792_v22, %v11792_v22  ;;  %v6242_v43 = vpack.c.bf16 %v11794_v52, %v11794_v52  ;;  %5435 = vst.msk [vmem:[#allocation2 + $0xd0] sm:$0xf] %vm5382_vm14, %v6237_v32  ;;  %5436 = vst.msk [vmem:[#allocation2 + $0xd4] sm:$0xf] %vm5382_vm14, %v6238_v29 }
 0x460   :  { %5437 = vst.msk [vmem:[#allocation2 + $0xd8] sm:$0xf] %vm5382_vm14, %v6239_v17  ;;  %5438 = vst.msk [vmem:[#allocation2 + $0xdc] sm:$0xf] %vm5382_vm14, %v6240_v12 }
 0x461   :  { %5439 = vst.msk [vmem:[#allocation2 + $0xe0] sm:$0xf] %vm5382_vm14, %v6241_v53  ;;  %5440 = vst.msk [vmem:[#allocation2 + $0xe4] sm:$0xf] %vm5382_vm14, %v6242_v43 }
 0x462   :  { %5441 = vst.msk [vmem:[#allocation2 + $0xe8] sm:$0xf] %vm5382_vm14, %v6243_v33  ;;  %5442 = vst.msk [vmem:[#allocation2 + $0xec] sm:$0xf] %vm5382_vm14, %v6244_v4 }
 0x463   :  { %5443 = vst.msk [vmem:[#allocation2 + $0xf0] sm:$0xf] %vm5382_vm14, %v6245_v63  ;;  %5445 = vst.msk [vmem:[#allocation2 + $0xf8] sm:$0xf] %vm5382_vm14, %v6247_v8 }
 0x464   :  { %5446 = vst.msk [vmem:[#allocation2 + $0xfc] sm:$0xf] %vm5382_vm14, %v6248_v1 }
 0x465   :  { %6669 = shalt.err (!%p6666_p4)
}
 0x466   :  { %s6670_s17 = scalar_lea.hbm %s11550_s4, 4096 }
 0x467   :  { %p6671_p5 = scmp.ne.s32.totalorder %s11550_s4, %s6670_s17  ;;  %p6674_p6 = scmp.lt.u32.totalorder %s6670_s17, %s11550_s4 }
 0x469   :  { %p6676_p7 = pnand %p6674_p6, %p6671_p5 }
 0x46b   :  { %6679 = shalt.err (!%p6676_p7)
}
 0x46c   :  { %s6693_s24 = smov 64   ;;  %s6694_s27 = smov 4  }
 0x46d   :  { %5458 = dma.vmem_to_hbm [thread:$0]  %s11503_s3, 4096, %s11550_s4, [#allocation3], %s6693_s24, %s6693_s24, %s6694_s27  }
 0x46e   :  { %6680 = dma.done.wait [#allocation3], 4096  }
 0x46f   :  { %6681 = vsyncadd [#allocation3], 4294963200 }
 0x470   :  { %5462 = vsyncpa [#allocation3], 1 }

</bundles_post_ra>
